<compile_context>
chip_gen: v7x
topology: tpu7x:2x2x1
jax: 0.10.0
libtpu: 0.0.40
codegen_flags: <defaults>
</compile_context>

<pallas_src>
import functools

import jax
import jax.numpy as jnp
from jax.experimental import pallas as pl
from jax.experimental.pallas import tpu as pltpu


# ------------------------------------------------------------------ helpers --

def _ln(t):
    """LayerNorm over last dim, gamma=1 / beta=0 / eps=1e-5 (PyTorch defaults)."""
    mu = jnp.mean(t, axis=-1, keepdims=True)
    var = jnp.mean((t - mu) * (t - mu), axis=-1, keepdims=True)
    return (t - mu) * jax.lax.rsqrt(var + 1e-5)


def _mm(a, b):
    """bf16-input matmul with f32 accumulation (MXU-native on all TPU gens)."""
    return jnp.dot(a.astype(jnp.bfloat16), b.astype(jnp.bfloat16),
                   preferred_element_type=jnp.float32)


def _heads_cat(w):
    """(h, D, kd) -> (D, h*kd): head h occupies output columns [h*kd:(h+1)*kd]."""
    h, d, kd = w.shape
    return jnp.transpose(w, (1, 0, 2)).reshape(d, h * kd)


# ------------------------------------------------------------ layer kernel --

def _layer_kernel(x_ref, m_ref, mt_ref, wqkv_ref, wproj_ref, bproj_ref,
                  ws_ref, wh_ref, bfuse_ref, w1_ref, b1_ref, w2_ref, b2_ref,
                  o_ref, *, head_count, is_fw, alpha, scale):
    x = x_ref[0]          # (L, D)  f32
    m = m_ref[0]          # (L, 1)  f32
    mt = mt_ref[0]        # (1, L)  f32
    L, D = x.shape
    kd = D // head_count

    # ---- fused QKV projection: one matmul, split by static lane slices ----
    qkv = _mm(x, wqkv_ref[...])                       # (L, 3D)  f32
    q = qkv[:, :D]
    k = qkv[:, D:2 * D]
    v = qkv[:, 2 * D:]

    # ---- masks built in-kernel (no (L,L) HBM traffic) ----
    row = jax.lax.broadcasted_iota(jnp.int32, (L, L), 0)
    col = jax.lax.broadcasted_iota(jnp.int32, (L, L), 1)
    if is_fw:
        dir_mask = (col < row).astype(jnp.float32)    # tril, diagonal=-1
    else:
        dir_mask = (col > row).astype(jnp.float32)    # triu, diagonal=+1
    mask = dir_mask * m * mt                          # rep_mask outer-product * dir
    dis = jnp.abs(row.astype(jnp.float32) - col.astype(jnp.float32))
    bias = (-alpha) * dis                             # alpha * (-|i-j|)

    inv_scale = 1.0 / scale
    head_outs = []
    for hh in range(head_count):
        sl = slice(hh * kd, (hh + 1) * kd)
        qh = _ln(q[:, sl])                            # per-head LayerNorm(k_dim)
        kh = _ln(k[:, sl])
        vh = _ln(v[:, sl])
        s = jax.lax.dot_general(qh.astype(jnp.bfloat16), kh.astype(jnp.bfloat16),
                                (((1,), (1,)), ((), ())),
                                preferred_element_type=jnp.float32) * inv_scale
        s = s + bias
        # masked softmax over keys (dim=2 in the PyTorch reference)
        masked = s * mask
        mx = jnp.max(masked, axis=1, keepdims=True)
        e = jnp.exp(masked - mx) * mask
        den = jnp.sum(e, axis=1, keepdims=True)
        den = den + (den == 0).astype(jnp.float32)
        attn = e * pl.reciprocal(den + 1e-20, approx=True)
        head_outs.append(_mm(attn, vh))               # (L, kd)
    attn_cat = jnp.concatenate(head_outs, axis=-1)    # (L, D)

    # ---- output projection + LayerNorm (dropout = identity) ----
    attn_out = _ln(_mm(attn_cat, wproj_ref[...]) + bproj_ref[...])

    # ---- fusion gate (s = layer input, h = attention output) ----
    s_f = _ln(_mm(x, ws_ref[...]))
    h_f = _ln(_mm(attn_out, wh_ref[...]))
    z = s_f + h_f + bfuse_ref[...]
    f = 1.0 / (1.0 + jnp.exp(-z))                     # sigmoid
    fuse = _ln(f * s_f + (1.0 - f) * h_f)

    # ---- position-wise feed-forward (1x1 convs == per-token linears) ----
    h1 = jnp.maximum(_mm(fuse, w1_ref[...]) + b1_ref[...], 0.0)
    h2 = _mm(h1, w2_ref[...]) + b2_ref[...]
    o_ref[0] = _ln(h2 + fuse)


def layer_batch(x, rep_mask, rep_mask_t, p, is_fw, alpha, e_dim, head_count):
    B, L, D = x.shape
    F = p["ffn"]["w1"]["w"].shape[1]

    wqkv = jnp.concatenate([_heads_cat(p["attn"]["w_q"]),
                            _heads_cat(p["attn"]["w_k"]),
                            _heads_cat(p["attn"]["w_v"])], axis=1).astype(jnp.bfloat16)
    wproj = p["attn"]["proj"]["w"].astype(jnp.bfloat16)
    bproj = p["attn"]["proj"]["b"].reshape(1, D).astype(jnp.float32)
    ws = p["fusion"]["w_s"].astype(jnp.bfloat16)
    wh = p["fusion"]["w_h"].astype(jnp.bfloat16)
    bfuse = p["fusion"]["b"].reshape(1, D).astype(jnp.float32)
    w1 = p["ffn"]["w1"]["w"].astype(jnp.bfloat16)
    b1 = p["ffn"]["w1"]["b"].reshape(1, F).astype(jnp.float32)
    w2 = p["ffn"]["w2"]["w"].astype(jnp.bfloat16)
    b2 = p["ffn"]["w2"]["b"].reshape(1, D).astype(jnp.float32)

    kern = functools.partial(_layer_kernel, head_count=head_count, is_fw=is_fw,
                             alpha=float(alpha), scale=float(e_dim) ** 0.5)
    full = lambda b: (0, 0)
    return pl.pallas_call(
        kern,
        out_shape=jax.ShapeDtypeStruct((B, L, D), jnp.float32),
        grid=(B,),
        in_specs=[pl.BlockSpec((1, L, D), lambda b: (b, 0, 0)),
                  pl.BlockSpec((1, L, 1), lambda b: (b, 0, 0)),
                  pl.BlockSpec((1, 1, L), lambda b: (b, 0, 0)),
                  pl.BlockSpec((D, 3 * D), full),
                  pl.BlockSpec((D, D), full),
                  pl.BlockSpec((1, D), full),
                  pl.BlockSpec((D, D), full),
                  pl.BlockSpec((D, D), full),
                  pl.BlockSpec((1, D), full),
                  pl.BlockSpec((D, F), full),
                  pl.BlockSpec((1, F), full),
                  pl.BlockSpec((F, D), full),
                  pl.BlockSpec((1, D), full)],
        out_specs=pl.BlockSpec((1, L, D), lambda b: (b, 0, 0)),
        compiler_params=pltpu.CompilerParams(dimension_semantics=("parallel",)),
    )(x.astype(jnp.float32), rep_mask, rep_mask_t, wqkv, wproj, bproj,
      ws, wh, bfuse, w1, b1, w2, b2)


# ------------------------------------------------- Source2Token + max-pool --

def _pool_s2t_kernel(u_ref, m_ref, w1_ref, b1_ref, w2_ref, b2_ref, o_ref):
    u = u_ref[0]          # (L, H) f32
    m = m_ref[0]          # (L, 1) f32

    t = _ln(_mm(u, w1_ref[...]) + b1_ref[...])
    t = jnp.where(t > 0, t, jnp.exp(jnp.minimum(t, 0.0)) - 1.0)   # ELU
    t = _ln(_mm(t, w2_ref[...]) + b2_ref[...])

    # masked softmax over the sequence axis (dim=1 in the reference)
    masked = t * m
    mx = jnp.max(masked, axis=0, keepdims=True)
    e = jnp.exp(masked - mx) * m
    den = jnp.sum(e, axis=0, keepdims=True)
    den = den + (den == 0).astype(jnp.float32)
    attn = e * pl.reciprocal(den + 1e-20, approx=True)

    s2t = jnp.sum(u * attn, axis=0, keepdims=True)    # (1, H)
    pool = jnp.max(u * m, axis=0, keepdims=True)      # (1, H)  MaxPool2d((L,1))
    o_ref[0] = jnp.concatenate([s2t, pool], axis=-1)  # (1, 2H) -> 128 lanes


def pool_s2t(u, rep_mask, p):
    B, L, H = u.shape
    full = lambda b: (0, 0)
    out = pl.pallas_call(
        _pool_s2t_kernel,
        out_shape=jax.ShapeDtypeStruct((B, 1, 2 * H), jnp.float32),
        grid=(B,),
        in_specs=[pl.BlockSpec((1, L, H), lambda b: (b, 0, 0)),
                  pl.BlockSpec((1, L, 1), lambda b: (b, 0, 0)),
                  pl.BlockSpec((H, H), full),
                  pl.BlockSpec((1, H), full),
                  pl.BlockSpec((H, H), full),
                  pl.BlockSpec((1, H), full)],
        out_specs=pl.BlockSpec((1, 1, 2 * H), lambda b: (b, 0, 0)),
        compiler_params=pltpu.CompilerParams(dimension_semantics=("parallel",)),
    )(u, rep_mask,
      p["fc1"]["w"].astype(jnp.bfloat16), p["fc1"]["b"].reshape(1, H).astype(jnp.float32),
      p["fc2"]["w"].astype(jnp.bfloat16), p["fc2"]["b"].reshape(1, H).astype(jnp.float32))
    return out.reshape(B, 2 * H)


# ----------------------------------------------------------------- encoder --

def sentence_encoder(x, rep_mask, params, *, alpha, e_dim, head_count):
    """x: (B, L, e_dim), rep_mask: (B, L, 1) float -> (B, 4*e_dim)."""
    rep_mask = rep_mask.astype(jnp.float32)
    rep_mask_t = jnp.transpose(rep_mask, (0, 2, 1))                # (B, 1, L)
    fw = layer_batch(x, rep_mask, rep_mask_t, params["fw"], True, alpha, e_dim, head_count)
    bw = layer_batch(x, rep_mask, rep_mask_t, params["bw"], False, alpha, e_dim, head_count)
    u = jnp.concatenate([fw, bw], axis=-1)                         # (B, L, 2e)
    return pool_s2t(u, rep_mask, params["s2t"])                    # (B, 4e) = [s2t | maxpool]


# ------------------------------------------------------------------ params --

def init_params(key, e_dim, head_count, ff_dim):
    keys = iter(jax.random.split(key, 32))

    def xavier(shape):
        fan_in, fan_out = shape[-2], shape[-1]
        std = (2.0 / (fan_in + fan_out)) ** 0.5
        return std * jax.random.normal(next(keys), shape, dtype=jnp.float32)

    def lin(i, o):
        return {"w": xavier((i, o)), "b": jnp.zeros((o,), jnp.float32)}

    kd = e_dim // head_count

    def mha():
        return {"w_q": xavier((head_count, e_dim, kd)),
                "w_k": xavier((head_count, e_dim, kd)),
                "w_v": xavier((head_count, e_dim, kd)),
                "proj": lin(e_dim, e_dim)}

    def layer():
        return {"attn": mha(),
                "fusion": {"w_s": xavier((e_dim, e_dim)),
                           "w_h": xavier((e_dim, e_dim)),
                           "b": jnp.zeros((e_dim,), jnp.float32)},
                "ffn": {"w1": lin(e_dim, ff_dim), "w2": lin(ff_dim, e_dim)}}

    return {"fw": layer(), "bw": layer(),
            "s2t": {"fc1": lin(2 * e_dim, 2 * e_dim),
                    "fc2": lin(2 * e_dim, 2 * e_dim)}}


# -------------------------------------------------------------------- main --

if __name__ == "__main__":
    e_dim, head_count, alpha, ff_dim = 32, 4, 1.5, 64
    B, L = 2, 8

    key = jax.random.PRNGKey(0)
    pkey, xkey = jax.random.split(key)
    params = init_params(pkey, e_dim, head_count, ff_dim)

    x = jax.random.normal(xkey, (B, L, e_dim), jnp.float32)
    lengths = jnp.array([L, L - 2], dtype=jnp.int32)
    rep_mask = (jnp.arange(L)[None, :] < lengths[:, None]).astype(jnp.float32)[..., None]

    fwd = jax.jit(functools.partial(sentence_encoder, alpha=alpha, e_dim=e_dim,
                                    head_count=head_count))
    out = fwd(x, rep_mask, params)
    jax.block_until_ready(out)
    assert out.shape == (B, 4 * e_dim) and out.dtype == jnp.float32
    assert bool(jnp.all(jnp.isfinite(out)))
    print("KERNEL_OK")
</pallas_src>

<mosaic_0001>
module attributes {stable_mosaic.version = 11 : i64} {
  func.func @_pool_s2t_kernel(%arg0: i32, %arg1: memref<1x8x64xf32, #tpu.memory_space<vmem>>, %arg2: memref<1x8x1xf32, #tpu.memory_space<vmem>>, %arg3: memref<64x64xbf16, #tpu.memory_space<vmem>>, %arg4: memref<1x64xf32, #tpu.memory_space<vmem>>, %arg5: memref<64x64xbf16, #tpu.memory_space<vmem>>, %arg6: memref<1x64xf32, #tpu.memory_space<vmem>>, %arg7: memref<1x1x128xf32, #tpu.memory_space<vmem>>) attributes {dimension_semantics = [#tpu.dimension_semantics<parallel>], iteration_bounds = array<i64: 2>, scalar_prefetch = 0 : i64, scratch_operands = 0 : i64, tpu.core_type = #tpu.core_type<tc>, window_params = [{transform_indices = @transform_0, window_bounds = array<i64: 1, 8, 64>}, {transform_indices = @transform_1, window_bounds = array<i64: 1, 8, 1>}, {pipeline_mode = #tpu.pipeline_mode<synchronous>, transform_indices = @transform_2, window_bounds = array<i64: 64, 64>}, {pipeline_mode = #tpu.pipeline_mode<synchronous>, transform_indices = @transform_3, window_bounds = array<i64: 1, 64>}, {pipeline_mode = #tpu.pipeline_mode<synchronous>, transform_indices = @transform_4, window_bounds = array<i64: 64, 64>}, {pipeline_mode = #tpu.pipeline_mode<synchronous>, transform_indices = @transform_5, window_bounds = array<i64: 1, 64>}, {transform_indices = @transform_6, window_bounds = array<i64: 1, 1, 128>}]} {
    %c0 = arith.constant 0 : index
    %c0_0 = arith.constant 0 : index
    %c0_1 = arith.constant 0 : index
    %0 = vector.load %arg1[%c0, %c0_0, %c0_1] : memref<1x8x64xf32, #tpu.memory_space<vmem>>, vector<1x8x64xf32>
    %1 = vector.shape_cast %0 : vector<1x8x64xf32> to vector<8x64xf32>
    %c0_2 = arith.constant 0 : index
    %c0_3 = arith.constant 0 : index
    %c0_4 = arith.constant 0 : index
    %2 = vector.load %arg2[%c0_2, %c0_3, %c0_4] : memref<1x8x1xf32, #tpu.memory_space<vmem>>, vector<1x8x1xf32>
    %3 = vector.shape_cast %2 : vector<1x8x1xf32> to vector<8x1xf32>
    %c0_5 = arith.constant 0 : index
    %c0_6 = arith.constant 0 : index
    %4 = vector.load %arg3[%c0_5, %c0_6] : memref<64x64xbf16, #tpu.memory_space<vmem>>, vector<64x64xbf16>
    %5 = arith.truncf %1 : vector<8x64xf32> to vector<8x64xbf16>
    %cst = arith.constant dense<0.000000e+00> : vector<8x64xf32>
    %6 = tpu.matmul %5, %4, %cst {dimension_numbers = #tpu.dot_dimension_numbers<[1], [0], [0], [1], [0, 0, 1, 1], [], []>} : vector<8x64xbf16>, vector<64x64xbf16>, vector<8x64xf32> -> vector<8x64xf32>
    %c0_7 = arith.constant 0 : index
    %c0_8 = arith.constant 0 : index
    %7 = vector.load %arg4[%c0_7, %c0_8] : memref<1x64xf32, #tpu.memory_space<vmem>>, vector<1x64xf32>
    %8 = vector.broadcast %7 : vector<1x64xf32> to vector<8x64xf32>
    %9 = arith.addf %6, %8 : vector<8x64xf32>
    %cst_9 = arith.constant dense<0.000000e+00> : vector<8xf32>
    %10 = vector.multi_reduction <add>, %9, %cst_9 [1] : vector<8x64xf32> to vector<8xf32>
    %11 = vector.shape_cast %10 : vector<8xf32> to vector<8x1xf32>
    %cst_10 = arith.constant 6.400000e+01 : f32
    %12 = vector.broadcast %cst_10 : f32 to vector<8x1xf32>
    %13 = arith.divf %11, %12 : vector<8x1xf32>
    %14 = vector.broadcast %13 : vector<8x1xf32> to vector<8x64xf32>
    %15 = arith.subf %9, %14 : vector<8x64xf32>
    %16 = vector.broadcast %13 : vector<8x1xf32> to vector<8x64xf32>
    %17 = arith.subf %9, %16 : vector<8x64xf32>
    %18 = arith.mulf %15, %17 : vector<8x64xf32>
    %cst_11 = arith.constant dense<0.000000e+00> : vector<8xf32>
    %19 = vector.multi_reduction <add>, %18, %cst_11 [1] : vector<8x64xf32> to vector<8xf32>
    %20 = vector.shape_cast %19 : vector<8xf32> to vector<8x1xf32>
    %cst_12 = arith.constant 6.400000e+01 : f32
    %21 = vector.broadcast %cst_12 : f32 to vector<8x1xf32>
    %22 = arith.divf %20, %21 : vector<8x1xf32>
    %23 = vector.broadcast %13 : vector<8x1xf32> to vector<8x64xf32>
    %24 = arith.subf %9, %23 : vector<8x64xf32>
    %cst_13 = arith.constant 9.99999974E-6 : f32
    %25 = vector.broadcast %cst_13 : f32 to vector<8x1xf32>
    %26 = arith.addf %22, %25 : vector<8x1xf32>
    %27 = math.rsqrt %26 : vector<8x1xf32>
    %28 = vector.broadcast %27 : vector<8x1xf32> to vector<8x64xf32>
    %29 = arith.mulf %24, %28 : vector<8x64xf32>
    %cst_14 = arith.constant 0.000000e+00 : f32
    %30 = vector.broadcast %cst_14 : f32 to vector<8x64xf32>
    %31 = arith.cmpf ogt, %29, %30 : vector<8x64xf32>
    %cst_15 = arith.constant 0.000000e+00 : f32
    %32 = vector.broadcast %cst_15 : f32 to vector<8x64xf32>
    %33 = arith.minimumf %29, %32 : vector<8x64xf32>
    %34 = math.exp %33 : vector<8x64xf32>
    %cst_16 = arith.constant 1.000000e+00 : f32
    %35 = vector.broadcast %cst_16 : f32 to vector<8x64xf32>
    %36 = arith.subf %34, %35 : vector<8x64xf32>
    %37 = arith.select %31, %29, %36 : vector<8x64xi1>, vector<8x64xf32>
    %c0_17 = arith.constant 0 : index
    %c0_18 = arith.constant 0 : index
    %38 = vector.load %arg5[%c0_17, %c0_18] : memref<64x64xbf16, #tpu.memory_space<vmem>>, vector<64x64xbf16>
    %39 = arith.truncf %37 : vector<8x64xf32> to vector<8x64xbf16>
    %cst_19 = arith.constant dense<0.000000e+00> : vector<8x64xf32>
    %40 = tpu.matmul %39, %38, %cst_19 {dimension_numbers = #tpu.dot_dimension_numbers<[1], [0], [0], [1], [0, 0, 1, 1], [], []>} : vector<8x64xbf16>, vector<64x64xbf16>, vector<8x64xf32> -> vector<8x64xf32>
    %c0_20 = arith.constant 0 : index
    %c0_21 = arith.constant 0 : index
    %41 = vector.load %arg6[%c0_20, %c0_21] : memref<1x64xf32, #tpu.memory_space<vmem>>, vector<1x64xf32>
    %42 = vector.broadcast %41 : vector<1x64xf32> to vector<8x64xf32>
    %43 = arith.addf %40, %42 : vector<8x64xf32>
    %cst_22 = arith.constant dense<0.000000e+00> : vector<8xf32>
    %44 = vector.multi_reduction <add>, %43, %cst_22 [1] : vector<8x64xf32> to vector<8xf32>
    %45 = vector.shape_cast %44 : vector<8xf32> to vector<8x1xf32>
    %cst_23 = arith.constant 6.400000e+01 : f32
    %46 = vector.broadcast %cst_23 : f32 to vector<8x1xf32>
    %47 = arith.divf %45, %46 : vector<8x1xf32>
    %48 = vector.broadcast %47 : vector<8x1xf32> to vector<8x64xf32>
    %49 = arith.subf %43, %48 : vector<8x64xf32>
    %50 = vector.broadcast %47 : vector<8x1xf32> to vector<8x64xf32>
    %51 = arith.subf %43, %50 : vector<8x64xf32>
    %52 = arith.mulf %49, %51 : vector<8x64xf32>
    %cst_24 = arith.constant dense<0.000000e+00> : vector<8xf32>
    %53 = vector.multi_reduction <add>, %52, %cst_24 [1] : vector<8x64xf32> to vector<8xf32>
    %54 = vector.shape_cast %53 : vector<8xf32> to vector<8x1xf32>
    %cst_25 = arith.constant 6.400000e+01 : f32
    %55 = vector.broadcast %cst_25 : f32 to vector<8x1xf32>
    %56 = arith.divf %54, %55 : vector<8x1xf32>
    %57 = vector.broadcast %47 : vector<8x1xf32> to vector<8x64xf32>
    %58 = arith.subf %43, %57 : vector<8x64xf32>
    %cst_26 = arith.constant 9.99999974E-6 : f32
    %59 = vector.broadcast %cst_26 : f32 to vector<8x1xf32>
    %60 = arith.addf %56, %59 : vector<8x1xf32>
    %61 = math.rsqrt %60 : vector<8x1xf32>
    %62 = vector.broadcast %61 : vector<8x1xf32> to vector<8x64xf32>
    %63 = arith.mulf %58, %62 : vector<8x64xf32>
    %64 = vector.broadcast %3 : vector<8x1xf32> to vector<8x64xf32>
    %65 = arith.mulf %63, %64 : vector<8x64xf32>
    %cst_27 = arith.constant dense<0xFF800000> : vector<64xf32>
    %66 = vector.multi_reduction <maximumf>, %65, %cst_27 [0] : vector<8x64xf32> to vector<64xf32>
    %67 = vector.shape_cast %66 : vector<64xf32> to vector<1x64xf32>
    %68 = vector.broadcast %67 : vector<1x64xf32> to vector<8x64xf32>
    %69 = arith.subf %65, %68 : vector<8x64xf32>
    %70 = math.exp %69 : vector<8x64xf32>
    %71 = vector.broadcast %3 : vector<8x1xf32> to vector<8x64xf32>
    %72 = arith.mulf %70, %71 : vector<8x64xf32>
    %cst_28 = arith.constant dense<0.000000e+00> : vector<64xf32>
    %73 = vector.multi_reduction <add>, %72, %cst_28 [0] : vector<8x64xf32> to vector<64xf32>
    %74 = vector.shape_cast %73 : vector<64xf32> to vector<1x64xf32>
    %cst_29 = arith.constant 0.000000e+00 : f32
    %75 = vector.broadcast %cst_29 : f32 to vector<1x64xf32>
    %76 = arith.cmpf oeq, %74, %75 : vector<1x64xf32>
    %77 = arith.extui %76 : vector<1x64xi1> to vector<1x64xi32>
    %78 = arith.sitofp %77 : vector<1x64xi32> to vector<1x64xf32>
    %79 = arith.addf %74, %78 : vector<1x64xf32>
    %cst_30 = arith.constant 9.99999968E-21 : f32
    %80 = vector.broadcast %cst_30 : f32 to vector<1x64xf32>
    %81 = arith.addf %79, %80 : vector<1x64xf32>
    %82 = tpu.reciprocal %81 {approx = true} : vector<1x64xf32> -> vector<1x64xf32>
    %83 = vector.broadcast %82 : vector<1x64xf32> to vector<8x64xf32>
    %84 = arith.mulf %72, %83 : vector<8x64xf32>
    %85 = arith.mulf %1, %84 : vector<8x64xf32>
    %cst_31 = arith.constant dense<0.000000e+00> : vector<64xf32>
    %86 = vector.multi_reduction <add>, %85, %cst_31 [0] : vector<8x64xf32> to vector<64xf32>
    %87 = vector.shape_cast %86 : vector<64xf32> to vector<1x64xf32>
    %88 = vector.broadcast %3 : vector<8x1xf32> to vector<8x64xf32>
    %89 = arith.mulf %1, %88 : vector<8x64xf32>
    %cst_32 = arith.constant dense<0xFF800000> : vector<64xf32>
    %90 = vector.multi_reduction <maximumf>, %89, %cst_32 [0] : vector<8x64xf32> to vector<64xf32>
    %91 = vector.shape_cast %90 : vector<64xf32> to vector<1x64xf32>
    %92 = tpu.concatenate %87, %91 in 1 : vector<1x64xf32>, vector<1x64xf32> -> vector<1x128xf32>
    %c0_33 = arith.constant 0 : index
    %c0_34 = arith.constant 0 : index
    %c0_35 = arith.constant 0 : index
    %93 = vector.load %arg7[%c0_33, %c0_34, %c0_35] : memref<1x1x128xf32, #tpu.memory_space<vmem>>, vector<1x1x128xf32>
    %94 = vector.shape_cast %93 : vector<1x1x128xf32> to vector<1x128xf32>
    %95 = vector.shape_cast %92 : vector<1x128xf32> to vector<1x1x128xf32>
    tpu.vector_store %arg7[%c0_33, %c0_34, %c0_35], %95 {strides = array<i32>} : memref<1x1x128xf32, #tpu.memory_space<vmem>>, vector<1x1x128xf32>,
    return
  }
  func.func @transform_0(%arg0: i32) -> (i32, i32, i32) {
    %c0_i32 = arith.constant 0 : i32
    %c0_i32_0 = arith.constant 0 : i32
    %c0_i32_1 = arith.constant 0 : i32
    return %arg0, %c0_i32, %c0_i32_0 : i32, i32, i32
  }
  func.func @transform_1(%arg0: i32) -> (i32, i32, i32) {
    %c0_i32 = arith.constant 0 : i32
    %c0_i32_0 = arith.constant 0 : i32
    %c0_i32_1 = arith.constant 0 : i32
    return %arg0, %c0_i32, %c0_i32_0 : i32, i32, i32
  }
  func.func @transform_2(%arg0: i32) -> (i32, i32) {
    %c0_i32 = arith.constant 0 : i32
    %c0_i32_0 = arith.constant 0 : i32
    %c0_i32_1 = arith.constant 0 : i32
    return %c0_i32, %c0_i32_0 : i32, i32
  }
  func.func @transform_3(%arg0: i32) -> (i32, i32) {
    %c0_i32 = arith.constant 0 : i32
    %c0_i32_0 = arith.constant 0 : i32
    %c0_i32_1 = arith.constant 0 : i32
    return %c0_i32, %c0_i32_0 : i32, i32
  }
  func.func @transform_4(%arg0: i32) -> (i32, i32) {
    %c0_i32 = arith.constant 0 : i32
    %c0_i32_0 = arith.constant 0 : i32
    %c0_i32_1 = arith.constant 0 : i32
    return %c0_i32, %c0_i32_0 : i32, i32
  }
  func.func @transform_5(%arg0: i32) -> (i32, i32) {
    %c0_i32 = arith.constant 0 : i32
    %c0_i32_0 = arith.constant 0 : i32
    %c0_i32_1 = arith.constant 0 : i32
    return %c0_i32, %c0_i32_0 : i32, i32
  }
  func.func @transform_6(%arg0: i32) -> (i32, i32, i32) {
    %c0_i32 = arith.constant 0 : i32
    %c0_i32_0 = arith.constant 0 : i32
    %c0_i32_1 = arith.constant 0 : i32
    return %arg0, %c0_i32, %c0_i32_0 : i32, i32, i32
  }
}

module attributes {stable_mosaic.version = 11 : i64} {
  func.func @_layer_kernel(%arg0: i32, %arg1: memref<1x8x32xf32, #tpu.memory_space<vmem>>, %arg2: memref<1x8x1xf32, #tpu.memory_space<vmem>>, %arg3: memref<1x1x8xf32, #tpu.memory_space<vmem>>, %arg4: memref<32x96xbf16, #tpu.memory_space<vmem>>, %arg5: memref<32x32xbf16, #tpu.memory_space<vmem>>, %arg6: memref<1x32xf32, #tpu.memory_space<vmem>>, %arg7: memref<32x32xbf16, #tpu.memory_space<vmem>>, %arg8: memref<32x32xbf16, #tpu.memory_space<vmem>>, %arg9: memref<1x32xf32, #tpu.memory_space<vmem>>, %arg10: memref<32x64xbf16, #tpu.memory_space<vmem>>, %arg11: memref<1x64xf32, #tpu.memory_space<vmem>>, %arg12: memref<64x32xbf16, #tpu.memory_space<vmem>>, %arg13: memref<1x32xf32, #tpu.memory_space<vmem>>, %arg14: memref<1x8x32xf32, #tpu.memory_space<vmem>>) attributes {dimension_semantics = [#tpu.dimension_semantics<parallel>], iteration_bounds = array<i64: 2>, scalar_prefetch = 0 : i64, scratch_operands = 0 : i64, tpu.core_type = #tpu.core_type<tc>, window_params = [{transform_indices = @transform_0, window_bounds = array<i64: 1, 8, 32>}, {transform_indices = @transform_1, window_bounds = array<i64: 1, 8, 1>}, {transform_indices = @transform_2, window_bounds = array<i64: 1, 1, 8>}, {pipeline_mode = #tpu.pipeline_mode<synchronous>, transform_indices = @transform_3, window_bounds = array<i64: 32, 96>}, {pipeline_mode = #tpu.pipeline_mode<synchronous>, transform_indices = @transform_4, window_bounds = array<i64: 32, 32>}, {pipeline_mode = #tpu.pipeline_mode<synchronous>, transform_indices = @transform_5, window_bounds = array<i64: 1, 32>}, {pipeline_mode = #tpu.pipeline_mode<synchronous>, transform_indices = @transform_6, window_bounds = array<i64: 32, 32>}, {pipeline_mode = #tpu.pipeline_mode<synchronous>, transform_indices = @transform_7, window_bounds = array<i64: 32, 32>}, {pipeline_mode = #tpu.pipeline_mode<synchronous>, transform_indices = @transform_8, window_bounds = array<i64: 1, 32>}, {pipeline_mode = #tpu.pipeline_mode<synchronous>, transform_indices = @transform_9, window_bounds = array<i64: 32, 64>}, {pipeline_mode = #tpu.pipeline_mode<synchronous>, transform_indices = @transform_10, window_bounds = array<i64: 1, 64>}, {pipeline_mode = #tpu.pipeline_mode<synchronous>, transform_indices = @transform_11, window_bounds = array<i64: 64, 32>}, {pipeline_mode = #tpu.pipeline_mode<synchronous>, transform_indices = @transform_12, window_bounds = array<i64: 1, 32>}, {transform_indices = @transform_13, window_bounds = array<i64: 1, 8, 32>}]} {
    %c0 = arith.constant 0 : index
    %c0_0 = arith.constant 0 : index
    %c0_1 = arith.constant 0 : index
    %0 = vector.load %arg1[%c0, %c0_0, %c0_1] : memref<1x8x32xf32, #tpu.memory_space<vmem>>, vector<1x8x32xf32>
    %1 = vector.shape_cast %0 : vector<1x8x32xf32> to vector<8x32xf32>
    %c0_2 = arith.constant 0 : index
    %c0_3 = arith.constant 0 : index
    %c0_4 = arith.constant 0 : index
    %2 = vector.load %arg2[%c0_2, %c0_3, %c0_4] : memref<1x8x1xf32, #tpu.memory_space<vmem>>, vector<1x8x1xf32>
    %3 = vector.shape_cast %2 : vector<1x8x1xf32> to vector<8x1xf32>
    %c0_5 = arith.constant 0 : index
    %c0_6 = arith.constant 0 : index
    %c0_7 = arith.constant 0 : index
    %4 = vector.load %arg3[%c0_5, %c0_6, %c0_7] : memref<1x1x8xf32, #tpu.memory_space<vmem>>, vector<1x1x8xf32>
    %5 = vector.shape_cast %4 : vector<1x1x8xf32> to vector<1x8xf32>
    %c0_8 = arith.constant 0 : index
    %c0_9 = arith.constant 0 : index
    %6 = vector.load %arg4[%c0_8, %c0_9] : memref<32x96xbf16, #tpu.memory_space<vmem>>, vector<32x96xbf16>
    %7 = arith.truncf %1 : vector<8x32xf32> to vector<8x32xbf16>
    %cst = arith.constant dense<0.000000e+00> : vector<8x96xf32>
    %8 = tpu.matmul %7, %6, %cst {dimension_numbers = #tpu.dot_dimension_numbers<[1], [0], [0], [1], [0, 0, 1, 1], [], []>} : vector<8x32xbf16>, vector<32x96xbf16>, vector<8x96xf32> -> vector<8x96xf32>
    %9 = vector.extract_strided_slice %8 {offsets = [0, 0], sizes = [8, 32], strides = [1, 1]} : vector<8x96xf32> to vector<8x32xf32>
    %10 = vector.extract_strided_slice %8 {offsets = [0, 32], sizes = [8, 32], strides = [1, 1]} : vector<8x96xf32> to vector<8x32xf32>
    %11 = vector.extract_strided_slice %8 {offsets = [0, 64], sizes = [8, 32], strides = [1, 1]} : vector<8x96xf32> to vector<8x32xf32>
    %12 = tpu.iota {dimensions = array<i32: 0>} : vector<8x8xi32>
    %13 = tpu.iota {dimensions = array<i32: 1>} : vector<8x8xi32>
    %14 = arith.cmpi sgt, %13, %12 : vector<8x8xi32>
    %15 = arith.extui %14 : vector<8x8xi1> to vector<8x8xi32>
    %16 = arith.sitofp %15 : vector<8x8xi32> to vector<8x8xf32>
    %17 = vector.broadcast %3 : vector<8x1xf32> to vector<8x8xf32>
    %18 = arith.mulf %16, %17 : vector<8x8xf32>
    %19 = vector.broadcast %5 : vector<1x8xf32> to vector<8x8xf32>
    %20 = arith.mulf %18, %19 : vector<8x8xf32>
    %21 = arith.sitofp %12 : vector<8x8xi32> to vector<8x8xf32>
    %22 = arith.sitofp %13 : vector<8x8xi32> to vector<8x8xf32>
    %23 = arith.subf %21, %22 : vector<8x8xf32>
    %24 = math.absf %23 : vector<8x8xf32>
    %cst_10 = arith.constant -1.500000e+00 : f32
    %25 = vector.broadcast %cst_10 : f32 to vector<8x8xf32>
    %26 = arith.mulf %25, %24 : vector<8x8xf32>
    %27 = vector.extract_strided_slice %9 {offsets = [0, 0], sizes = [8, 8], strides = [1, 1]} : vector<8x32xf32> to vector<8x8xf32>
    %cst_11 = arith.constant dense<0.000000e+00> : vector<8xf32>
    %28 = vector.multi_reduction <add>, %27, %cst_11 [1] : vector<8x8xf32> to vector<8xf32>
    %29 = vector.shape_cast %28 : vector<8xf32> to vector<8x1xf32>
    %cst_12 = arith.constant 8.000000e+00 : f32
    %30 = vector.broadcast %cst_12 : f32 to vector<8x1xf32>
    %31 = arith.divf %29, %30 : vector<8x1xf32>
    %32 = vector.broadcast %31 : vector<8x1xf32> to vector<8x8xf32>
    %33 = arith.subf %27, %32 : vector<8x8xf32>
    %34 = vector.broadcast %31 : vector<8x1xf32> to vector<8x8xf32>
    %35 = arith.subf %27, %34 : vector<8x8xf32>
    %36 = arith.mulf %33, %35 : vector<8x8xf32>
    %cst_13 = arith.constant dense<0.000000e+00> : vector<8xf32>
    %37 = vector.multi_reduction <add>, %36, %cst_13 [1] : vector<8x8xf32> to vector<8xf32>
    %38 = vector.shape_cast %37 : vector<8xf32> to vector<8x1xf32>
    %cst_14 = arith.constant 8.000000e+00 : f32
    %39 = vector.broadcast %cst_14 : f32 to vector<8x1xf32>
    %40 = arith.divf %38, %39 : vector<8x1xf32>
    %41 = vector.broadcast %31 : vector<8x1xf32> to vector<8x8xf32>
    %42 = arith.subf %27, %41 : vector<8x8xf32>
    %cst_15 = arith.constant 9.99999974E-6 : f32
    %43 = vector.broadcast %cst_15 : f32 to vector<8x1xf32>
    %44 = arith.addf %40, %43 : vector<8x1xf32>
    %45 = math.rsqrt %44 : vector<8x1xf32>
    %46 = vector.broadcast %45 : vector<8x1xf32> to vector<8x8xf32>
    %47 = arith.mulf %42, %46 : vector<8x8xf32>
    %48 = vector.extract_strided_slice %10 {offsets = [0, 0], sizes = [8, 8], strides = [1, 1]} : vector<8x32xf32> to vector<8x8xf32>
    %cst_16 = arith.constant dense<0.000000e+00> : vector<8xf32>
    %49 = vector.multi_reduction <add>, %48, %cst_16 [1] : vector<8x8xf32> to vector<8xf32>
    %50 = vector.shape_cast %49 : vector<8xf32> to vector<8x1xf32>
    %cst_17 = arith.constant 8.000000e+00 : f32
    %51 = vector.broadcast %cst_17 : f32 to vector<8x1xf32>
    %52 = arith.divf %50, %51 : vector<8x1xf32>
    %53 = vector.broadcast %52 : vector<8x1xf32> to vector<8x8xf32>
    %54 = arith.subf %48, %53 : vector<8x8xf32>
    %55 = vector.broadcast %52 : vector<8x1xf32> to vector<8x8xf32>
    %56 = arith.subf %48, %55 : vector<8x8xf32>
    %57 = arith.mulf %54, %56 : vector<8x8xf32>
    %cst_18 = arith.constant dense<0.000000e+00> : vector<8xf32>
    %58 = vector.multi_reduction <add>, %57, %cst_18 [1] : vector<8x8xf32> to vector<8xf32>
    %59 = vector.shape_cast %58 : vector<8xf32> to vector<8x1xf32>
    %cst_19 = arith.constant 8.000000e+00 : f32
    %60 = vector.broadcast %cst_19 : f32 to vector<8x1xf32>
    %61 = arith.divf %59, %60 : vector<8x1xf32>
    %62 = vector.broadcast %52 : vector<8x1xf32> to vector<8x8xf32>
    %63 = arith.subf %48, %62 : vector<8x8xf32>
    %cst_20 = arith.constant 9.99999974E-6 : f32
    %64 = vector.broadcast %cst_20 : f32 to vector<8x1xf32>
    %65 = arith.addf %61, %64 : vector<8x1xf32>
    %66 = math.rsqrt %65 : vector<8x1xf32>
    %67 = vector.broadcast %66 : vector<8x1xf32> to vector<8x8xf32>
    %68 = arith.mulf %63, %67 : vector<8x8xf32>
    %69 = vector.extract_strided_slice %11 {offsets = [0, 0], sizes = [8, 8], strides = [1, 1]} : vector<8x32xf32> to vector<8x8xf32>
    %cst_21 = arith.constant dense<0.000000e+00> : vector<8xf32>
    %70 = vector.multi_reduction <add>, %69, %cst_21 [1] : vector<8x8xf32> to vector<8xf32>
    %71 = vector.shape_cast %70 : vector<8xf32> to vector<8x1xf32>
    %cst_22 = arith.constant 8.000000e+00 : f32
    %72 = vector.broadcast %cst_22 : f32 to vector<8x1xf32>
    %73 = arith.divf %71, %72 : vector<8x1xf32>
    %74 = vector.broadcast %73 : vector<8x1xf32> to vector<8x8xf32>
    %75 = arith.subf %69, %74 : vector<8x8xf32>
    %76 = vector.broadcast %73 : vector<8x1xf32> to vector<8x8xf32>
    %77 = arith.subf %69, %76 : vector<8x8xf32>
    %78 = arith.mulf %75, %77 : vector<8x8xf32>
    %cst_23 = arith.constant dense<0.000000e+00> : vector<8xf32>
    %79 = vector.multi_reduction <add>, %78, %cst_23 [1] : vector<8x8xf32> to vector<8xf32>
    %80 = vector.shape_cast %79 : vector<8xf32> to vector<8x1xf32>
    %cst_24 = arith.constant 8.000000e+00 : f32
    %81 = vector.broadcast %cst_24 : f32 to vector<8x1xf32>
    %82 = arith.divf %80, %81 : vector<8x1xf32>
    %83 = vector.broadcast %73 : vector<8x1xf32> to vector<8x8xf32>
    %84 = arith.subf %69, %83 : vector<8x8xf32>
    %cst_25 = arith.constant 9.99999974E-6 : f32
    %85 = vector.broadcast %cst_25 : f32 to vector<8x1xf32>
    %86 = arith.addf %82, %85 : vector<8x1xf32>
    %87 = math.rsqrt %86 : vector<8x1xf32>
    %88 = vector.broadcast %87 : vector<8x1xf32> to vector<8x8xf32>
    %89 = arith.mulf %84, %88 : vector<8x8xf32>
    %90 = arith.truncf %47 : vector<8x8xf32> to vector<8x8xbf16>
    %91 = arith.truncf %68 : vector<8x8xf32> to vector<8x8xbf16>
    %cst_26 = arith.constant dense<0.000000e+00> : vector<8x8xf32>
    %92 = tpu.matmul %90, %91, %cst_26 {dimension_numbers = #tpu.dot_dimension_numbers<[1], [1], [0], [0], [0, 0, 1, 0], [], []>} : vector<8x8xbf16>, vector<8x8xbf16>, vector<8x8xf32> -> vector<8x8xf32>
    %cst_27 = arith.constant 0.176776692 : f32
    %93 = vector.broadcast %cst_27 : f32 to vector<8x8xf32>
    %94 = arith.mulf %92, %93 : vector<8x8xf32>
    %95 = arith.addf %94, %26 : vector<8x8xf32>
    %96 = arith.mulf %95, %20 : vector<8x8xf32>
    %cst_28 = arith.constant dense<0xFF800000> : vector<8xf32>
    %97 = vector.multi_reduction <maximumf>, %96, %cst_28 [1] : vector<8x8xf32> to vector<8xf32>
    %98 = vector.shape_cast %97 : vector<8xf32> to vector<8x1xf32>
    %99 = vector.broadcast %98 : vector<8x1xf32> to vector<8x8xf32>
    %100 = arith.subf %96, %99 : vector<8x8xf32>
    %101 = math.exp %100 : vector<8x8xf32>
    %102 = arith.mulf %101, %20 : vector<8x8xf32>
    %cst_29 = arith.constant dense<0.000000e+00> : vector<8xf32>
    %103 = vector.multi_reduction <add>, %102, %cst_29 [1] : vector<8x8xf32> to vector<8xf32>
    %104 = vector.shape_cast %103 : vector<8xf32> to vector<8x1xf32>
    %cst_30 = arith.constant 0.000000e+00 : f32
    %105 = vector.broadcast %cst_30 : f32 to vector<8x1xf32>
    %106 = arith.cmpf oeq, %104, %105 : vector<8x1xf32>
    %107 = arith.extui %106 : vector<8x1xi1> to vector<8x1xi32>
    %108 = arith.sitofp %107 : vector<8x1xi32> to vector<8x1xf32>
    %109 = arith.addf %104, %108 : vector<8x1xf32>
    %cst_31 = arith.constant 9.99999968E-21 : f32
    %110 = vector.broadcast %cst_31 : f32 to vector<8x1xf32>
    %111 = arith.addf %109, %110 : vector<8x1xf32>
    %112 = tpu.reciprocal %111 {approx = true} : vector<8x1xf32> -> vector<8x1xf32>
    %113 = vector.broadcast %112 : vector<8x1xf32> to vector<8x8xf32>
    %114 = arith.mulf %102, %113 : vector<8x8xf32>
    %115 = arith.truncf %114 : vector<8x8xf32> to vector<8x8xbf16>
    %116 = arith.truncf %89 : vector<8x8xf32> to vector<8x8xbf16>
    %cst_32 = arith.constant dense<0.000000e+00> : vector<8x8xf32>
    %117 = tpu.matmul %115, %116, %cst_32 {dimension_numbers = #tpu.dot_dimension_numbers<[1], [0], [0], [1], [0, 0, 1, 1], [], []>} : vector<8x8xbf16>, vector<8x8xbf16>, vector<8x8xf32> -> vector<8x8xf32>
    %118 = vector.extract_strided_slice %9 {offsets = [0, 8], sizes = [8, 8], strides = [1, 1]} : vector<8x32xf32> to vector<8x8xf32>
    %cst_33 = arith.constant dense<0.000000e+00> : vector<8xf32>
    %119 = vector.multi_reduction <add>, %118, %cst_33 [1] : vector<8x8xf32> to vector<8xf32>
    %120 = vector.shape_cast %119 : vector<8xf32> to vector<8x1xf32>
    %cst_34 = arith.constant 8.000000e+00 : f32
    %121 = vector.broadcast %cst_34 : f32 to vector<8x1xf32>
    %122 = arith.divf %120, %121 : vector<8x1xf32>
    %123 = vector.broadcast %122 : vector<8x1xf32> to vector<8x8xf32>
    %124 = arith.subf %118, %123 : vector<8x8xf32>
    %125 = vector.broadcast %122 : vector<8x1xf32> to vector<8x8xf32>
    %126 = arith.subf %118, %125 : vector<8x8xf32>
    %127 = arith.mulf %124, %126 : vector<8x8xf32>
    %cst_35 = arith.constant dense<0.000000e+00> : vector<8xf32>
    %128 = vector.multi_reduction <add>, %127, %cst_35 [1] : vector<8x8xf32> to vector<8xf32>
    %129 = vector.shape_cast %128 : vector<8xf32> to vector<8x1xf32>
    %cst_36 = arith.constant 8.000000e+00 : f32
    %130 = vector.broadcast %cst_36 : f32 to vector<8x1xf32>
    %131 = arith.divf %129, %130 : vector<8x1xf32>
    %132 = vector.broadcast %122 : vector<8x1xf32> to vector<8x8xf32>
    %133 = arith.subf %118, %132 : vector<8x8xf32>
    %cst_37 = arith.constant 9.99999974E-6 : f32
    %134 = vector.broadcast %cst_37 : f32 to vector<8x1xf32>
    %135 = arith.addf %131, %134 : vector<8x1xf32>
    %136 = math.rsqrt %135 : vector<8x1xf32>
    %137 = vector.broadcast %136 : vector<8x1xf32> to vector<8x8xf32>
    %138 = arith.mulf %133, %137 : vector<8x8xf32>
    %139 = vector.extract_strided_slice %10 {offsets = [0, 8], sizes = [8, 8], strides = [1, 1]} : vector<8x32xf32> to vector<8x8xf32>
    %cst_38 = arith.constant dense<0.000000e+00> : vector<8xf32>
    %140 = vector.multi_reduction <add>, %139, %cst_38 [1] : vector<8x8xf32> to vector<8xf32>
    %141 = vector.shape_cast %140 : vector<8xf32> to vector<8x1xf32>
    %cst_39 = arith.constant 8.000000e+00 : f32
    %142 = vector.broadcast %cst_39 : f32 to vector<8x1xf32>
    %143 = arith.divf %141, %142 : vector<8x1xf32>
    %144 = vector.broadcast %143 : vector<8x1xf32> to vector<8x8xf32>
    %145 = arith.subf %139, %144 : vector<8x8xf32>
    %146 = vector.broadcast %143 : vector<8x1xf32> to vector<8x8xf32>
    %147 = arith.subf %139, %146 : vector<8x8xf32>
    %148 = arith.mulf %145, %147 : vector<8x8xf32>
    %cst_40 = arith.constant dense<0.000000e+00> : vector<8xf32>
    %149 = vector.multi_reduction <add>, %148, %cst_40 [1] : vector<8x8xf32> to vector<8xf32>
    %150 = vector.shape_cast %149 : vector<8xf32> to vector<8x1xf32>
    %cst_41 = arith.constant 8.000000e+00 : f32
    %151 = vector.broadcast %cst_41 : f32 to vector<8x1xf32>
    %152 = arith.divf %150, %151 : vector<8x1xf32>
    %153 = vector.broadcast %143 : vector<8x1xf32> to vector<8x8xf32>
    %154 = arith.subf %139, %153 : vector<8x8xf32>
    %cst_42 = arith.constant 9.99999974E-6 : f32
    %155 = vector.broadcast %cst_42 : f32 to vector<8x1xf32>
    %156 = arith.addf %152, %155 : vector<8x1xf32>
    %157 = math.rsqrt %156 : vector<8x1xf32>
    %158 = vector.broadcast %157 : vector<8x1xf32> to vector<8x8xf32>
    %159 = arith.mulf %154, %158 : vector<8x8xf32>
    %160 = vector.extract_strided_slice %11 {offsets = [0, 8], sizes = [8, 8], strides = [1, 1]} : vector<8x32xf32> to vector<8x8xf32>
    %cst_43 = arith.constant dense<0.000000e+00> : vector<8xf32>
    %161 = vector.multi_reduction <add>, %160, %cst_43 [1] : vector<8x8xf32> to vector<8xf32>
    %162 = vector.shape_cast %161 : vector<8xf32> to vector<8x1xf32>
    %cst_44 = arith.constant 8.000000e+00 : f32
    %163 = vector.broadcast %cst_44 : f32 to vector<8x1xf32>
    %164 = arith.divf %162, %163 : vector<8x1xf32>
    %165 = vector.broadcast %164 : vector<8x1xf32> to vector<8x8xf32>
    %166 = arith.subf %160, %165 : vector<8x8xf32>
    %167 = vector.broadcast %164 : vector<8x1xf32> to vector<8x8xf32>
    %168 = arith.subf %160, %167 : vector<8x8xf32>
    %169 = arith.mulf %166, %168 : vector<8x8xf32>
    %cst_45 = arith.constant dense<0.000000e+00> : vector<8xf32>
    %170 = vector.multi_reduction <add>, %169, %cst_45 [1] : vector<8x8xf32> to vector<8xf32>
    %171 = vector.shape_cast %170 : vector<8xf32> to vector<8x1xf32>
    %cst_46 = arith.constant 8.000000e+00 : f32
    %172 = vector.broadcast %cst_46 : f32 to vector<8x1xf32>
    %173 = arith.divf %171, %172 : vector<8x1xf32>
    %174 = vector.broadcast %164 : vector<8x1xf32> to vector<8x8xf32>
    %175 = arith.subf %160, %174 : vector<8x8xf32>
    %cst_47 = arith.constant 9.99999974E-6 : f32
    %176 = vector.broadcast %cst_47 : f32 to vector<8x1xf32>
    %177 = arith.addf %173, %176 : vector<8x1xf32>
    %178 = math.rsqrt %177 : vector<8x1xf32>
    %179 = vector.broadcast %178 : vector<8x1xf32> to vector<8x8xf32>
    %180 = arith.mulf %175, %179 : vector<8x8xf32>
    %181 = arith.truncf %138 : vector<8x8xf32> to vector<8x8xbf16>
    %182 = arith.truncf %159 : vector<8x8xf32> to vector<8x8xbf16>
    %cst_48 = arith.constant dense<0.000000e+00> : vector<8x8xf32>
    %183 = tpu.matmul %181, %182, %cst_48 {dimension_numbers = #tpu.dot_dimension_numbers<[1], [1], [0], [0], [0, 0, 1, 0], [], []>} : vector<8x8xbf16>, vector<8x8xbf16>, vector<8x8xf32> -> vector<8x8xf32>
    %cst_49 = arith.constant 0.176776692 : f32
    %184 = vector.broadcast %cst_49 : f32 to vector<8x8xf32>
    %185 = arith.mulf %183, %184 : vector<8x8xf32>
    %186 = arith.addf %185, %26 : vector<8x8xf32>
    %187 = arith.mulf %186, %20 : vector<8x8xf32>
    %cst_50 = arith.constant dense<0xFF800000> : vector<8xf32>
    %188 = vector.multi_reduction <maximumf>, %187, %cst_50 [1] : vector<8x8xf32> to vector<8xf32>
    %189 = vector.shape_cast %188 : vector<8xf32> to vector<8x1xf32>
    %190 = vector.broadcast %189 : vector<8x1xf32> to vector<8x8xf32>
    %191 = arith.subf %187, %190 : vector<8x8xf32>
    %192 = math.exp %191 : vector<8x8xf32>
    %193 = arith.mulf %192, %20 : vector<8x8xf32>
    %cst_51 = arith.constant dense<0.000000e+00> : vector<8xf32>
    %194 = vector.multi_reduction <add>, %193, %cst_51 [1] : vector<8x8xf32> to vector<8xf32>
    %195 = vector.shape_cast %194 : vector<8xf32> to vector<8x1xf32>
    %cst_52 = arith.constant 0.000000e+00 : f32
    %196 = vector.broadcast %cst_52 : f32 to vector<8x1xf32>
    %197 = arith.cmpf oeq, %195, %196 : vector<8x1xf32>
    %198 = arith.extui %197 : vector<8x1xi1> to vector<8x1xi32>
    %199 = arith.sitofp %198 : vector<8x1xi32> to vector<8x1xf32>
    %200 = arith.addf %195, %199 : vector<8x1xf32>
    %cst_53 = arith.constant 9.99999968E-21 : f32
    %201 = vector.broadcast %cst_53 : f32 to vector<8x1xf32>
    %202 = arith.addf %200, %201 : vector<8x1xf32>
    %203 = tpu.reciprocal %202 {approx = true} : vector<8x1xf32> -> vector<8x1xf32>
    %204 = vector.broadcast %203 : vector<8x1xf32> to vector<8x8xf32>
    %205 = arith.mulf %193, %204 : vector<8x8xf32>
    %206 = arith.truncf %205 : vector<8x8xf32> to vector<8x8xbf16>
    %207 = arith.truncf %180 : vector<8x8xf32> to vector<8x8xbf16>
    %cst_54 = arith.constant dense<0.000000e+00> : vector<8x8xf32>
    %208 = tpu.matmul %206, %207, %cst_54 {dimension_numbers = #tpu.dot_dimension_numbers<[1], [0], [0], [1], [0, 0, 1, 1], [], []>} : vector<8x8xbf16>, vector<8x8xbf16>, vector<8x8xf32> -> vector<8x8xf32>
    %209 = vector.extract_strided_slice %9 {offsets = [0, 16], sizes = [8, 8], strides = [1, 1]} : vector<8x32xf32> to vector<8x8xf32>
    %cst_55 = arith.constant dense<0.000000e+00> : vector<8xf32>
    %210 = vector.multi_reduction <add>, %209, %cst_55 [1] : vector<8x8xf32> to vector<8xf32>
    %211 = vector.shape_cast %210 : vector<8xf32> to vector<8x1xf32>
    %cst_56 = arith.constant 8.000000e+00 : f32
    %212 = vector.broadcast %cst_56 : f32 to vector<8x1xf32>
    %213 = arith.divf %211, %212 : vector<8x1xf32>
    %214 = vector.broadcast %213 : vector<8x1xf32> to vector<8x8xf32>
    %215 = arith.subf %209, %214 : vector<8x8xf32>
    %216 = vector.broadcast %213 : vector<8x1xf32> to vector<8x8xf32>
    %217 = arith.subf %209, %216 : vector<8x8xf32>
    %218 = arith.mulf %215, %217 : vector<8x8xf32>
    %cst_57 = arith.constant dense<0.000000e+00> : vector<8xf32>
    %219 = vector.multi_reduction <add>, %218, %cst_57 [1] : vector<8x8xf32> to vector<8xf32>
    %220 = vector.shape_cast %219 : vector<8xf32> to vector<8x1xf32>
    %cst_58 = arith.constant 8.000000e+00 : f32
    %221 = vector.broadcast %cst_58 : f32 to vector<8x1xf32>
    %222 = arith.divf %220, %221 : vector<8x1xf32>
    %223 = vector.broadcast %213 : vector<8x1xf32> to vector<8x8xf32>
    %224 = arith.subf %209, %223 : vector<8x8xf32>
    %cst_59 = arith.constant 9.99999974E-6 : f32
    %225 = vector.broadcast %cst_59 : f32 to vector<8x1xf32>
    %226 = arith.addf %222, %225 : vector<8x1xf32>
    %227 = math.rsqrt %226 : vector<8x1xf32>
    %228 = vector.broadcast %227 : vector<8x1xf32> to vector<8x8xf32>
    %229 = arith.mulf %224, %228 : vector<8x8xf32>
    %230 = vector.extract_strided_slice %10 {offsets = [0, 16], sizes = [8, 8], strides = [1, 1]} : vector<8x32xf32> to vector<8x8xf32>
    %cst_60 = arith.constant dense<0.000000e+00> : vector<8xf32>
    %231 = vector.multi_reduction <add>, %230, %cst_60 [1] : vector<8x8xf32> to vector<8xf32>
    %232 = vector.shape_cast %231 : vector<8xf32> to vector<8x1xf32>
    %cst_61 = arith.constant 8.000000e+00 : f32
    %233 = vector.broadcast %cst_61 : f32 to vector<8x1xf32>
    %234 = arith.divf %232, %233 : vector<8x1xf32>
    %235 = vector.broadcast %234 : vector<8x1xf32> to vector<8x8xf32>
    %236 = arith.subf %230, %235 : vector<8x8xf32>
    %237 = vector.broadcast %234 : vector<8x1xf32> to vector<8x8xf32>
    %238 = arith.subf %230, %237 : vector<8x8xf32>
    %239 = arith.mulf %236, %238 : vector<8x8xf32>
    %cst_62 = arith.constant dense<0.000000e+00> : vector<8xf32>
    %240 = vector.multi_reduction <add>, %239, %cst_62 [1] : vector<8x8xf32> to vector<8xf32>
    %241 = vector.shape_cast %240 : vector<8xf32> to vector<8x1xf32>
    %cst_63 = arith.constant 8.000000e+00 : f32
    %242 = vector.broadcast %cst_63 : f32 to vector<8x1xf32>
    %243 = arith.divf %241, %242 : vector<8x1xf32>
    %244 = vector.broadcast %234 : vector<8x1xf32> to vector<8x8xf32>
    %245 = arith.subf %230, %244 : vector<8x8xf32>
    %cst_64 = arith.constant 9.99999974E-6 : f32
    %246 = vector.broadcast %cst_64 : f32 to vector<8x1xf32>
    %247 = arith.addf %243, %246 : vector<8x1xf32>
    %248 = math.rsqrt %247 : vector<8x1xf32>
    %249 = vector.broadcast %248 : vector<8x1xf32> to vector<8x8xf32>
    %250 = arith.mulf %245, %249 : vector<8x8xf32>
    %251 = vector.extract_strided_slice %11 {offsets = [0, 16], sizes = [8, 8], strides = [1, 1]} : vector<8x32xf32> to vector<8x8xf32>
    %cst_65 = arith.constant dense<0.000000e+00> : vector<8xf32>
    %252 = vector.multi_reduction <add>, %251, %cst_65 [1] : vector<8x8xf32> to vector<8xf32>
    %253 = vector.shape_cast %252 : vector<8xf32> to vector<8x1xf32>
    %cst_66 = arith.constant 8.000000e+00 : f32
    %254 = vector.broadcast %cst_66 : f32 to vector<8x1xf32>
    %255 = arith.divf %253, %254 : vector<8x1xf32>
    %256 = vector.broadcast %255 : vector<8x1xf32> to vector<8x8xf32>
    %257 = arith.subf %251, %256 : vector<8x8xf32>
    %258 = vector.broadcast %255 : vector<8x1xf32> to vector<8x8xf32>
    %259 = arith.subf %251, %258 : vector<8x8xf32>
    %260 = arith.mulf %257, %259 : vector<8x8xf32>
    %cst_67 = arith.constant dense<0.000000e+00> : vector<8xf32>
    %261 = vector.multi_reduction <add>, %260, %cst_67 [1] : vector<8x8xf32> to vector<8xf32>
    %262 = vector.shape_cast %261 : vector<8xf32> to vector<8x1xf32>
    %cst_68 = arith.constant 8.000000e+00 : f32
    %263 = vector.broadcast %cst_68 : f32 to vector<8x1xf32>
    %264 = arith.divf %262, %263 : vector<8x1xf32>
    %265 = vector.broadcast %255 : vector<8x1xf32> to vector<8x8xf32>
    %266 = arith.subf %251, %265 : vector<8x8xf32>
    %cst_69 = arith.constant 9.99999974E-6 : f32
    %267 = vector.broadcast %cst_69 : f32 to vector<8x1xf32>
    %268 = arith.addf %264, %267 : vector<8x1xf32>
    %269 = math.rsqrt %268 : vector<8x1xf32>
    %270 = vector.broadcast %269 : vector<8x1xf32> to vector<8x8xf32>
    %271 = arith.mulf %266, %270 : vector<8x8xf32>
    %272 = arith.truncf %229 : vector<8x8xf32> to vector<8x8xbf16>
    %273 = arith.truncf %250 : vector<8x8xf32> to vector<8x8xbf16>
    %cst_70 = arith.constant dense<0.000000e+00> : vector<8x8xf32>
    %274 = tpu.matmul %272, %273, %cst_70 {dimension_numbers = #tpu.dot_dimension_numbers<[1], [1], [0], [0], [0, 0, 1, 0], [], []>} : vector<8x8xbf16>, vector<8x8xbf16>, vector<8x8xf32> -> vector<8x8xf32>
    %cst_71 = arith.constant 0.176776692 : f32
    %275 = vector.broadcast %cst_71 : f32 to vector<8x8xf32>
    %276 = arith.mulf %274, %275 : vector<8x8xf32>
    %277 = arith.addf %276, %26 : vector<8x8xf32>
    %278 = arith.mulf %277, %20 : vector<8x8xf32>
    %cst_72 = arith.constant dense<0xFF800000> : vector<8xf32>
    %279 = vector.multi_reduction <maximumf>, %278, %cst_72 [1] : vector<8x8xf32> to vector<8xf32>
    %280 = vector.shape_cast %279 : vector<8xf32> to vector<8x1xf32>
    %281 = vector.broadcast %280 : vector<8x1xf32> to vector<8x8xf32>
    %282 = arith.subf %278, %281 : vector<8x8xf32>
    %283 = math.exp %282 : vector<8x8xf32>
    %284 = arith.mulf %283, %20 : vector<8x8xf32>
    %cst_73 = arith.constant dense<0.000000e+00> : vector<8xf32>
    %285 = vector.multi_reduction <add>, %284, %cst_73 [1] : vector<8x8xf32> to vector<8xf32>
    %286 = vector.shape_cast %285 : vector<8xf32> to vector<8x1xf32>
    %cst_74 = arith.constant 0.000000e+00 : f32
    %287 = vector.broadcast %cst_74 : f32 to vector<8x1xf32>
    %288 = arith.cmpf oeq, %286, %287 : vector<8x1xf32>
    %289 = arith.extui %288 : vector<8x1xi1> to vector<8x1xi32>
    %290 = arith.sitofp %289 : vector<8x1xi32> to vector<8x1xf32>
    %291 = arith.addf %286, %290 : vector<8x1xf32>
    %cst_75 = arith.constant 9.99999968E-21 : f32
    %292 = vector.broadcast %cst_75 : f32 to vector<8x1xf32>
    %293 = arith.addf %291, %292 : vector<8x1xf32>
    %294 = tpu.reciprocal %293 {approx = true} : vector<8x1xf32> -> vector<8x1xf32>
    %295 = vector.broadcast %294 : vector<8x1xf32> to vector<8x8xf32>
    %296 = arith.mulf %284, %295 : vector<8x8xf32>
    %297 = arith.truncf %296 : vector<8x8xf32> to vector<8x8xbf16>
    %298 = arith.truncf %271 : vector<8x8xf32> to vector<8x8xbf16>
    %cst_76 = arith.constant dense<0.000000e+00> : vector<8x8xf32>
    %299 = tpu.matmul %297, %298, %cst_76 {dimension_numbers = #tpu.dot_dimension_numbers<[1], [0], [0], [1], [0, 0, 1, 1], [], []>} : vector<8x8xbf16>, vector<8x8xbf16>, vector<8x8xf32> -> vector<8x8xf32>
    %300 = vector.extract_strided_slice %9 {offsets = [0, 24], sizes = [8, 8], strides = [1, 1]} : vector<8x32xf32> to vector<8x8xf32>
    %cst_77 = arith.constant dense<0.000000e+00> : vector<8xf32>
    %301 = vector.multi_reduction <add>, %300, %cst_77 [1] : vector<8x8xf32> to vector<8xf32>
    %302 = vector.shape_cast %301 : vector<8xf32> to vector<8x1xf32>
    %cst_78 = arith.constant 8.000000e+00 : f32
    %303 = vector.broadcast %cst_78 : f32 to vector<8x1xf32>
    %304 = arith.divf %302, %303 : vector<8x1xf32>
    %305 = vector.broadcast %304 : vector<8x1xf32> to vector<8x8xf32>
    %306 = arith.subf %300, %305 : vector<8x8xf32>
    %307 = vector.broadcast %304 : vector<8x1xf32> to vector<8x8xf32>
    %308 = arith.subf %300, %307 : vector<8x8xf32>
    %309 = arith.mulf %306, %308 : vector<8x8xf32>
    %cst_79 = arith.constant dense<0.000000e+00> : vector<8xf32>
    %310 = vector.multi_reduction <add>, %309, %cst_79 [1] : vector<8x8xf32> to vector<8xf32>
    %311 = vector.shape_cast %310 : vector<8xf32> to vector<8x1xf32>
    %cst_80 = arith.constant 8.000000e+00 : f32
    %312 = vector.broadcast %cst_80 : f32 to vector<8x1xf32>
    %313 = arith.divf %311, %312 : vector<8x1xf32>
    %314 = vector.broadcast %304 : vector<8x1xf32> to vector<8x8xf32>
    %315 = arith.subf %300, %314 : vector<8x8xf32>
    %cst_81 = arith.constant 9.99999974E-6 : f32
    %316 = vector.broadcast %cst_81 : f32 to vector<8x1xf32>
    %317 = arith.addf %313, %316 : vector<8x1xf32>
    %318 = math.rsqrt %317 : vector<8x1xf32>
    %319 = vector.broadcast %318 : vector<8x1xf32> to vector<8x8xf32>
    %320 = arith.mulf %315, %319 : vector<8x8xf32>
    %321 = vector.extract_strided_slice %10 {offsets = [0, 24], sizes = [8, 8], strides = [1, 1]} : vector<8x32xf32> to vector<8x8xf32>
    %cst_82 = arith.constant dense<0.000000e+00> : vector<8xf32>
    %322 = vector.multi_reduction <add>, %321, %cst_82 [1] : vector<8x8xf32> to vector<8xf32>
    %323 = vector.shape_cast %322 : vector<8xf32> to vector<8x1xf32>
    %cst_83 = arith.constant 8.000000e+00 : f32
    %324 = vector.broadcast %cst_83 : f32 to vector<8x1xf32>
    %325 = arith.divf %323, %324 : vector<8x1xf32>
    %326 = vector.broadcast %325 : vector<8x1xf32> to vector<8x8xf32>
    %327 = arith.subf %321, %326 : vector<8x8xf32>
    %328 = vector.broadcast %325 : vector<8x1xf32> to vector<8x8xf32>
    %329 = arith.subf %321, %328 : vector<8x8xf32>
    %330 = arith.mulf %327, %329 : vector<8x8xf32>
    %cst_84 = arith.constant dense<0.000000e+00> : vector<8xf32>
    %331 = vector.multi_reduction <add>, %330, %cst_84 [1] : vector<8x8xf32> to vector<8xf32>
    %332 = vector.shape_cast %331 : vector<8xf32> to vector<8x1xf32>
    %cst_85 = arith.constant 8.000000e+00 : f32
    %333 = vector.broadcast %cst_85 : f32 to vector<8x1xf32>
    %334 = arith.divf %332, %333 : vector<8x1xf32>
    %335 = vector.broadcast %325 : vector<8x1xf32> to vector<8x8xf32>
    %336 = arith.subf %321, %335 : vector<8x8xf32>
    %cst_86 = arith.constant 9.99999974E-6 : f32
    %337 = vector.broadcast %cst_86 : f32 to vector<8x1xf32>
    %338 = arith.addf %334, %337 : vector<8x1xf32>
    %339 = math.rsqrt %338 : vector<8x1xf32>
    %340 = vector.broadcast %339 : vector<8x1xf32> to vector<8x8xf32>
    %341 = arith.mulf %336, %340 : vector<8x8xf32>
    %342 = vector.extract_strided_slice %11 {offsets = [0, 24], sizes = [8, 8], strides = [1, 1]} : vector<8x32xf32> to vector<8x8xf32>
    %cst_87 = arith.constant dense<0.000000e+00> : vector<8xf32>
    %343 = vector.multi_reduction <add>, %342, %cst_87 [1] : vector<8x8xf32> to vector<8xf32>
    %344 = vector.shape_cast %343 : vector<8xf32> to vector<8x1xf32>
    %cst_88 = arith.constant 8.000000e+00 : f32
    %345 = vector.broadcast %cst_88 : f32 to vector<8x1xf32>
    %346 = arith.divf %344, %345 : vector<8x1xf32>
    %347 = vector.broadcast %346 : vector<8x1xf32> to vector<8x8xf32>
    %348 = arith.subf %342, %347 : vector<8x8xf32>
    %349 = vector.broadcast %346 : vector<8x1xf32> to vector<8x8xf32>
    %350 = arith.subf %342, %349 : vector<8x8xf32>
    %351 = arith.mulf %348, %350 : vector<8x8xf32>
    %cst_89 = arith.constant dense<0.000000e+00> : vector<8xf32>
    %352 = vector.multi_reduction <add>, %351, %cst_89 [1] : vector<8x8xf32> to vector<8xf32>
    %353 = vector.shape_cast %352 : vector<8xf32> to vector<8x1xf32>
    %cst_90 = arith.constant 8.000000e+00 : f32
    %354 = vector.broadcast %cst_90 : f32 to vector<8x1xf32>
    %355 = arith.divf %353, %354 : vector<8x1xf32>
    %356 = vector.broadcast %346 : vector<8x1xf32> to vector<8x8xf32>
    %357 = arith.subf %342, %356 : vector<8x8xf32>
    %cst_91 = arith.constant 9.99999974E-6 : f32
    %358 = vector.broadcast %cst_91 : f32 to vector<8x1xf32>
    %359 = arith.addf %355, %358 : vector<8x1xf32>
    %360 = math.rsqrt %359 : vector<8x1xf32>
    %361 = vector.broadcast %360 : vector<8x1xf32> to vector<8x8xf32>
    %362 = arith.mulf %357, %361 : vector<8x8xf32>
    %363 = arith.truncf %320 : vector<8x8xf32> to vector<8x8xbf16>
    %364 = arith.truncf %341 : vector<8x8xf32> to vector<8x8xbf16>
    %cst_92 = arith.constant dense<0.000000e+00> : vector<8x8xf32>
    %365 = tpu.matmul %363, %364, %cst_92 {dimension_numbers = #tpu.dot_dimension_numbers<[1], [1], [0], [0], [0, 0, 1, 0], [], []>} : vector<8x8xbf16>, vector<8x8xbf16>, vector<8x8xf32> -> vector<8x8xf32>
    %cst_93 = arith.constant 0.176776692 : f32
    %366 = vector.broadcast %cst_93 : f32 to vector<8x8xf32>
    %367 = arith.mulf %365, %366 : vector<8x8xf32>
    %368 = arith.addf %367, %26 : vector<8x8xf32>
    %369 = arith.mulf %368, %20 : vector<8x8xf32>
    %cst_94 = arith.constant dense<0xFF800000> : vector<8xf32>
    %370 = vector.multi_reduction <maximumf>, %369, %cst_94 [1] : vector<8x8xf32> to vector<8xf32>
    %371 = vector.shape_cast %370 : vector<8xf32> to vector<8x1xf32>
    %372 = vector.broadcast %371 : vector<8x1xf32> to vector<8x8xf32>
    %373 = arith.subf %369, %372 : vector<8x8xf32>
    %374 = math.exp %373 : vector<8x8xf32>
    %375 = arith.mulf %374, %20 : vector<8x8xf32>
    %cst_95 = arith.constant dense<0.000000e+00> : vector<8xf32>
    %376 = vector.multi_reduction <add>, %375, %cst_95 [1] : vector<8x8xf32> to vector<8xf32>
    %377 = vector.shape_cast %376 : vector<8xf32> to vector<8x1xf32>
    %cst_96 = arith.constant 0.000000e+00 : f32
    %378 = vector.broadcast %cst_96 : f32 to vector<8x1xf32>
    %379 = arith.cmpf oeq, %377, %378 : vector<8x1xf32>
    %380 = arith.extui %379 : vector<8x1xi1> to vector<8x1xi32>
    %381 = arith.sitofp %380 : vector<8x1xi32> to vector<8x1xf32>
    %382 = arith.addf %377, %381 : vector<8x1xf32>
    %cst_97 = arith.constant 9.99999968E-21 : f32
    %383 = vector.broadcast %cst_97 : f32 to vector<8x1xf32>
    %384 = arith.addf %382, %383 : vector<8x1xf32>
    %385 = tpu.reciprocal %384 {approx = true} : vector<8x1xf32> -> vector<8x1xf32>
    %386 = vector.broadcast %385 : vector<8x1xf32> to vector<8x8xf32>
    %387 = arith.mulf %375, %386 : vector<8x8xf32>
    %388 = arith.truncf %387 : vector<8x8xf32> to vector<8x8xbf16>
    %389 = arith.truncf %362 : vector<8x8xf32> to vector<8x8xbf16>
    %cst_98 = arith.constant dense<0.000000e+00> : vector<8x8xf32>
    %390 = tpu.matmul %388, %389, %cst_98 {dimension_numbers = #tpu.dot_dimension_numbers<[1], [0], [0], [1], [0, 0, 1, 1], [], []>} : vector<8x8xbf16>, vector<8x8xbf16>, vector<8x8xf32> -> vector<8x8xf32>
    %391 = tpu.concatenate %117, %208, %299, %390 in 1 : vector<8x8xf32>, vector<8x8xf32>, vector<8x8xf32>, vector<8x8xf32> -> vector<8x32xf32>
    %c0_99 = arith.constant 0 : index
    %c0_100 = arith.constant 0 : index
    %392 = vector.load %arg5[%c0_99, %c0_100] : memref<32x32xbf16, #tpu.memory_space<vmem>>, vector<32x32xbf16>
    %393 = arith.truncf %391 : vector<8x32xf32> to vector<8x32xbf16>
    %cst_101 = arith.constant dense<0.000000e+00> : vector<8x32xf32>
    %394 = tpu.matmul %393, %392, %cst_101 {dimension_numbers = #tpu.dot_dimension_numbers<[1], [0], [0], [1], [0, 0, 1, 1], [], []>} : vector<8x32xbf16>, vector<32x32xbf16>, vector<8x32xf32> -> vector<8x32xf32>
    %c0_102 = arith.constant 0 : index
    %c0_103 = arith.constant 0 : index
    %395 = vector.load %arg6[%c0_102, %c0_103] : memref<1x32xf32, #tpu.memory_space<vmem>>, vector<1x32xf32>
    %396 = vector.broadcast %395 : vector<1x32xf32> to vector<8x32xf32>
    %397 = arith.addf %394, %396 : vector<8x32xf32>
    %cst_104 = arith.constant dense<0.000000e+00> : vector<8xf32>
    %398 = vector.multi_reduction <add>, %397, %cst_104 [1] : vector<8x32xf32> to vector<8xf32>
    %399 = vector.shape_cast %398 : vector<8xf32> to vector<8x1xf32>
    %cst_105 = arith.constant 3.200000e+01 : f32
    %400 = vector.broadcast %cst_105 : f32 to vector<8x1xf32>
    %401 = arith.divf %399, %400 : vector<8x1xf32>
    %402 = vector.broadcast %401 : vector<8x1xf32> to vector<8x32xf32>
    %403 = arith.subf %397, %402 : vector<8x32xf32>
    %404 = vector.broadcast %401 : vector<8x1xf32> to vector<8x32xf32>
    %405 = arith.subf %397, %404 : vector<8x32xf32>
    %406 = arith.mulf %403, %405 : vector<8x32xf32>
    %cst_106 = arith.constant dense<0.000000e+00> : vector<8xf32>
    %407 = vector.multi_reduction <add>, %406, %cst_106 [1] : vector<8x32xf32> to vector<8xf32>
    %408 = vector.shape_cast %407 : vector<8xf32> to vector<8x1xf32>
    %cst_107 = arith.constant 3.200000e+01 : f32
    %409 = vector.broadcast %cst_107 : f32 to vector<8x1xf32>
    %410 = arith.divf %408, %409 : vector<8x1xf32>
    %411 = vector.broadcast %401 : vector<8x1xf32> to vector<8x32xf32>
    %412 = arith.subf %397, %411 : vector<8x32xf32>
    %cst_108 = arith.constant 9.99999974E-6 : f32
    %413 = vector.broadcast %cst_108 : f32 to vector<8x1xf32>
    %414 = arith.addf %410, %413 : vector<8x1xf32>
    %415 = math.rsqrt %414 : vector<8x1xf32>
    %416 = vector.broadcast %415 : vector<8x1xf32> to vector<8x32xf32>
    %417 = arith.mulf %412, %416 : vector<8x32xf32>
    %c0_109 = arith.constant 0 : index
    %c0_110 = arith.constant 0 : index
    %418 = vector.load %arg7[%c0_109, %c0_110] : memref<32x32xbf16, #tpu.memory_space<vmem>>, vector<32x32xbf16>
    %419 = arith.truncf %1 : vector<8x32xf32> to vector<8x32xbf16>
    %cst_111 = arith.constant dense<0.000000e+00> : vector<8x32xf32>
    %420 = tpu.matmul %419, %418, %cst_111 {dimension_numbers = #tpu.dot_dimension_numbers<[1], [0], [0], [1], [0, 0, 1, 1], [], []>} : vector<8x32xbf16>, vector<32x32xbf16>, vector<8x32xf32> -> vector<8x32xf32>
    %cst_112 = arith.constant dense<0.000000e+00> : vector<8xf32>
    %421 = vector.multi_reduction <add>, %420, %cst_112 [1] : vector<8x32xf32> to vector<8xf32>
    %422 = vector.shape_cast %421 : vector<8xf32> to vector<8x1xf32>
    %cst_113 = arith.constant 3.200000e+01 : f32
    %423 = vector.broadcast %cst_113 : f32 to vector<8x1xf32>
    %424 = arith.divf %422, %423 : vector<8x1xf32>
    %425 = vector.broadcast %424 : vector<8x1xf32> to vector<8x32xf32>
    %426 = arith.subf %420, %425 : vector<8x32xf32>
    %427 = vector.broadcast %424 : vector<8x1xf32> to vector<8x32xf32>
    %428 = arith.subf %420, %427 : vector<8x32xf32>
    %429 = arith.mulf %426, %428 : vector<8x32xf32>
    %cst_114 = arith.constant dense<0.000000e+00> : vector<8xf32>
    %430 = vector.multi_reduction <add>, %429, %cst_114 [1] : vector<8x32xf32> to vector<8xf32>
    %431 = vector.shape_cast %430 : vector<8xf32> to vector<8x1xf32>
    %cst_115 = arith.constant 3.200000e+01 : f32
    %432 = vector.broadcast %cst_115 : f32 to vector<8x1xf32>
    %433 = arith.divf %431, %432 : vector<8x1xf32>
    %434 = vector.broadcast %424 : vector<8x1xf32> to vector<8x32xf32>
    %435 = arith.subf %420, %434 : vector<8x32xf32>
    %cst_116 = arith.constant 9.99999974E-6 : f32
    %436 = vector.broadcast %cst_116 : f32 to vector<8x1xf32>
    %437 = arith.addf %433, %436 : vector<8x1xf32>
    %438 = math.rsqrt %437 : vector<8x1xf32>
    %439 = vector.broadcast %438 : vector<8x1xf32> to vector<8x32xf32>
    %440 = arith.mulf %435, %439 : vector<8x32xf32>
    %c0_117 = arith.constant 0 : index
    %c0_118 = arith.constant 0 : index
    %441 = vector.load %arg8[%c0_117, %c0_118] : memref<32x32xbf16, #tpu.memory_space<vmem>>, vector<32x32xbf16>
    %442 = arith.truncf %417 : vector<8x32xf32> to vector<8x32xbf16>
    %cst_119 = arith.constant dense<0.000000e+00> : vector<8x32xf32>
    %443 = tpu.matmul %442, %441, %cst_119 {dimension_numbers = #tpu.dot_dimension_numbers<[1], [0], [0], [1], [0, 0, 1, 1], [], []>} : vector<8x32xbf16>, vector<32x32xbf16>, vector<8x32xf32> -> vector<8x32xf32>
    %cst_120 = arith.constant dense<0.000000e+00> : vector<8xf32>
    %444 = vector.multi_reduction <add>, %443, %cst_120 [1] : vector<8x32xf32> to vector<8xf32>
    %445 = vector.shape_cast %444 : vector<8xf32> to vector<8x1xf32>
    %cst_121 = arith.constant 3.200000e+01 : f32
    %446 = vector.broadcast %cst_121 : f32 to vector<8x1xf32>
    %447 = arith.divf %445, %446 : vector<8x1xf32>
    %448 = vector.broadcast %447 : vector<8x1xf32> to vector<8x32xf32>
    %449 = arith.subf %443, %448 : vector<8x32xf32>
    %450 = vector.broadcast %447 : vector<8x1xf32> to vector<8x32xf32>
    %451 = arith.subf %443, %450 : vector<8x32xf32>
    %452 = arith.mulf %449, %451 : vector<8x32xf32>
    %cst_122 = arith.constant dense<0.000000e+00> : vector<8xf32>
    %453 = vector.multi_reduction <add>, %452, %cst_122 [1] : vector<8x32xf32> to vector<8xf32>
    %454 = vector.shape_cast %453 : vector<8xf32> to vector<8x1xf32>
    %cst_123 = arith.constant 3.200000e+01 : f32
    %455 = vector.broadcast %cst_123 : f32 to vector<8x1xf32>
    %456 = arith.divf %454, %455 : vector<8x1xf32>
    %457 = vector.broadcast %447 : vector<8x1xf32> to vector<8x32xf32>
    %458 = arith.subf %443, %457 : vector<8x32xf32>
    %cst_124 = arith.constant 9.99999974E-6 : f32
    %459 = vector.broadcast %cst_124 : f32 to vector<8x1xf32>
    %460 = arith.addf %456, %459 : vector<8x1xf32>
    %461 = math.rsqrt %460 : vector<8x1xf32>
    %462 = vector.broadcast %461 : vector<8x1xf32> to vector<8x32xf32>
    %463 = arith.mulf %458, %462 : vector<8x32xf32>
    %464 = arith.addf %440, %463 : vector<8x32xf32>
    %c0_125 = arith.constant 0 : index
    %c0_126 = arith.constant 0 : index
    %465 = vector.load %arg9[%c0_125, %c0_126] : memref<1x32xf32, #tpu.memory_space<vmem>>, vector<1x32xf32>
    %466 = vector.broadcast %465 : vector<1x32xf32> to vector<8x32xf32>
    %467 = arith.addf %464, %466 : vector<8x32xf32>
    %cst_127 = arith.constant 0.000000e+00 : f32
    %468 = vector.broadcast %cst_127 : f32 to vector<8x32xf32>
    %469 = arith.subf %468, %467 : vector<8x32xf32>
    %470 = math.exp %469 : vector<8x32xf32>
    %cst_128 = arith.constant 1.000000e+00 : f32
    %471 = vector.broadcast %cst_128 : f32 to vector<8x32xf32>
    %472 = arith.addf %471, %470 : vector<8x32xf32>
    %cst_129 = arith.constant 1.000000e+00 : f32
    %473 = vector.broadcast %cst_129 : f32 to vector<8x32xf32>
    %474 = arith.divf %473, %472 : vector<8x32xf32>
    %475 = arith.mulf %474, %440 : vector<8x32xf32>
    %cst_130 = arith.constant 1.000000e+00 : f32
    %476 = vector.broadcast %cst_130 : f32 to vector<8x32xf32>
    %477 = arith.subf %476, %474 : vector<8x32xf32>
    %478 = arith.mulf %477, %463 : vector<8x32xf32>
    %479 = arith.addf %475, %478 : vector<8x32xf32>
    %cst_131 = arith.constant dense<0.000000e+00> : vector<8xf32>
    %480 = vector.multi_reduction <add>, %479, %cst_131 [1] : vector<8x32xf32> to vector<8xf32>
    %481 = vector.shape_cast %480 : vector<8xf32> to vector<8x1xf32>
    %cst_132 = arith.constant 3.200000e+01 : f32
    %482 = vector.broadcast %cst_132 : f32 to vector<8x1xf32>
    %483 = arith.divf %481, %482 : vector<8x1xf32>
    %484 = vector.broadcast %483 : vector<8x1xf32> to vector<8x32xf32>
    %485 = arith.subf %479, %484 : vector<8x32xf32>
    %486 = vector.broadcast %483 : vector<8x1xf32> to vector<8x32xf32>
    %487 = arith.subf %479, %486 : vector<8x32xf32>
    %488 = arith.mulf %485, %487 : vector<8x32xf32>
    %cst_133 = arith.constant dense<0.000000e+00> : vector<8xf32>
    %489 = vector.multi_reduction <add>, %488, %cst_133 [1] : vector<8x32xf32> to vector<8xf32>
    %490 = vector.shape_cast %489 : vector<8xf32> to vector<8x1xf32>
    %cst_134 = arith.constant 3.200000e+01 : f32
    %491 = vector.broadcast %cst_134 : f32 to vector<8x1xf32>
    %492 = arith.divf %490, %491 : vector<8x1xf32>
    %493 = vector.broadcast %483 : vector<8x1xf32> to vector<8x32xf32>
    %494 = arith.subf %479, %493 : vector<8x32xf32>
    %cst_135 = arith.constant 9.99999974E-6 : f32
    %495 = vector.broadcast %cst_135 : f32 to vector<8x1xf32>
    %496 = arith.addf %492, %495 : vector<8x1xf32>
    %497 = math.rsqrt %496 : vector<8x1xf32>
    %498 = vector.broadcast %497 : vector<8x1xf32> to vector<8x32xf32>
    %499 = arith.mulf %494, %498 : vector<8x32xf32>
    %c0_136 = arith.constant 0 : index
    %c0_137 = arith.constant 0 : index
    %500 = vector.load %arg10[%c0_136, %c0_137] : memref<32x64xbf16, #tpu.memory_space<vmem>>, vector<32x64xbf16>
    %501 = arith.truncf %499 : vector<8x32xf32> to vector<8x32xbf16>
    %cst_138 = arith.constant dense<0.000000e+00> : vector<8x64xf32>
    %502 = tpu.matmul %501, %500, %cst_138 {dimension_numbers = #tpu.dot_dimension_numbers<[1], [0], [0], [1], [0, 0, 1, 1], [], []>} : vector<8x32xbf16>, vector<32x64xbf16>, vector<8x64xf32> -> vector<8x64xf32>
    %c0_139 = arith.constant 0 : index
    %c0_140 = arith.constant 0 : index
    %503 = vector.load %arg11[%c0_139, %c0_140] : memref<1x64xf32, #tpu.memory_space<vmem>>, vector<1x64xf32>
    %504 = vector.broadcast %503 : vector<1x64xf32> to vector<8x64xf32>
    %505 = arith.addf %502, %504 : vector<8x64xf32>
    %cst_141 = arith.constant 0.000000e+00 : f32
    %506 = vector.broadcast %cst_141 : f32 to vector<8x64xf32>
    %507 = arith.maximumf %505, %506 : vector<8x64xf32>
    %c0_142 = arith.constant 0 : index
    %c0_143 = arith.constant 0 : index
    %508 = vector.load %arg12[%c0_142, %c0_143] : memref<64x32xbf16, #tpu.memory_space<vmem>>, vector<64x32xbf16>
    %509 = arith.truncf %507 : vector<8x64xf32> to vector<8x64xbf16>
    %cst_144 = arith.constant dense<0.000000e+00> : vector<8x32xf32>
    %510 = tpu.matmul %509, %508, %cst_144 {dimension_numbers = #tpu.dot_dimension_numbers<[1], [0], [0], [1], [0, 0, 1, 1], [], []>} : vector<8x64xbf16>, vector<64x32xbf16>, vector<8x32xf32> -> vector<8x32xf32>
    %c0_145 = arith.constant 0 : index
    %c0_146 = arith.constant 0 : index
    %511 = vector.load %arg13[%c0_145, %c0_146] : memref<1x32xf32, #tpu.memory_space<vmem>>, vector<1x32xf32>
    %512 = vector.broadcast %511 : vector<1x32xf32> to vector<8x32xf32>
    %513 = arith.addf %510, %512 : vector<8x32xf32>
    %514 = arith.addf %513, %499 : vector<8x32xf32>
    %cst_147 = arith.constant dense<0.000000e+00> : vector<8xf32>
    %515 = vector.multi_reduction <add>, %514, %cst_147 [1] : vector<8x32xf32> to vector<8xf32>
    %516 = vector.shape_cast %515 : vector<8xf32> to vector<8x1xf32>
    %cst_148 = arith.constant 3.200000e+01 : f32
    %517 = vector.broadcast %cst_148 : f32 to vector<8x1xf32>
    %518 = arith.divf %516, %517 : vector<8x1xf32>
    %519 = vector.broadcast %518 : vector<8x1xf32> to vector<8x32xf32>
    %520 = arith.subf %514, %519 : vector<8x32xf32>
    %521 = vector.broadcast %518 : vector<8x1xf32> to vector<8x32xf32>
    %522 = arith.subf %514, %521 : vector<8x32xf32>
    %523 = arith.mulf %520, %522 : vector<8x32xf32>
    %cst_149 = arith.constant dense<0.000000e+00> : vector<8xf32>
    %524 = vector.multi_reduction <add>, %523, %cst_149 [1] : vector<8x32xf32> to vector<8xf32>
    %525 = vector.shape_cast %524 : vector<8xf32> to vector<8x1xf32>
    %cst_150 = arith.constant 3.200000e+01 : f32
    %526 = vector.broadcast %cst_150 : f32 to vector<8x1xf32>
    %527 = arith.divf %525, %526 : vector<8x1xf32>
    %528 = vector.broadcast %518 : vector<8x1xf32> to vector<8x32xf32>
    %529 = arith.subf %514, %528 : vector<8x32xf32>
    %cst_151 = arith.constant 9.99999974E-6 : f32
    %530 = vector.broadcast %cst_151 : f32 to vector<8x1xf32>
    %531 = arith.addf %527, %530 : vector<8x1xf32>
    %532 = math.rsqrt %531 : vector<8x1xf32>
    %533 = vector.broadcast %532 : vector<8x1xf32> to vector<8x32xf32>
    %534 = arith.mulf %529, %533 : vector<8x32xf32>
    %c0_152 = arith.constant 0 : index
    %c0_153 = arith.constant 0 : index
    %c0_154 = arith.constant 0 : index
    %535 = vector.load %arg14[%c0_152, %c0_153, %c0_154] : memref<1x8x32xf32, #tpu.memory_space<vmem>>, vector<1x8x32xf32>
    %536 = vector.shape_cast %535 : vector<1x8x32xf32> to vector<8x32xf32>
    %537 = vector.shape_cast %534 : vector<8x32xf32> to vector<1x8x32xf32>
    tpu.vector_store %arg14[%c0_152, %c0_153, %c0_154], %537 {strides = array<i32>} : memref<1x8x32xf32, #tpu.memory_space<vmem>>, vector<1x8x32xf32>,
    return
  }
  func.func @transform_0(%arg0: i32) -> (i32, i32, i32) {
    %c0_i32 = arith.constant 0 : i32
    %c0_i32_0 = arith.constant 0 : i32
    %c0_i32_1 = arith.constant 0 : i32
    return %arg0, %c0_i32, %c0_i32_0 : i32, i32, i32
  }
  func.func @transform_1(%arg0: i32) -> (i32, i32, i32) {
    %c0_i32 = arith.constant 0 : i32
    %c0_i32_0 = arith.constant 0 : i32
    %c0_i32_1 = arith.constant 0 : i32
    return %arg0, %c0_i32, %c0_i32_0 : i32, i32, i32
  }
  func.func @transform_2(%arg0: i32) -> (i32, i32, i32) {
    %c0_i32 = arith.constant 0 : i32
    %c0_i32_0 = arith.constant 0 : i32
    %c0_i32_1 = arith.constant 0 : i32
    return %arg0, %c0_i32, %c0_i32_0 : i32, i32, i32
  }
  func.func @transform_3(%arg0: i32) -> (i32, i32) {
    %c0_i32 = arith.constant 0 : i32
    %c0_i32_0 = arith.constant 0 : i32
    %c0_i32_1 = arith.constant 0 : i32
    return %c0_i32, %c0_i32_0 : i32, i32
  }
  func.func @transform_4(%arg0: i32) -> (i32, i32) {
    %c0_i32 = arith.constant 0 : i32
    %c0_i32_0 = arith.constant 0 : i32
    %c0_i32_1 = arith.constant 0 : i32
    return %c0_i32, %c0_i32_0 : i32, i32
  }
  func.func @transform_5(%arg0: i32) -> (i32, i32) {
    %c0_i32 = arith.constant 0 : i32
    %c0_i32_0 = arith.constant 0 : i32
    %c0_i32_1 = arith.constant 0 : i32
    return %c0_i32, %c0_i32_0 : i32, i32
  }
  func.func @transform_6(%arg0: i32) -> (i32, i32) {
    %c0_i32 = arith.constant 0 : i32
    %c0_i32_0 = arith.constant 0 : i32
    %c0_i32_1 = arith.constant 0 : i32
    return %c0_i32, %c0_i32_0 : i32, i32
  }
  func.func @transform_7(%arg0: i32) -> (i32, i32) {
    %c0_i32 = arith.constant 0 : i32
    %c0_i32_0 = arith.constant 0 : i32
    %c0_i32_1 = arith.constant 0 : i32
    return %c0_i32, %c0_i32_0 : i32, i32
  }
  func.func @transform_8(%arg0: i32) -> (i32, i32) {
    %c0_i32 = arith.constant 0 : i32
    %c0_i32_0 = arith.constant 0 : i32
    %c0_i32_1 = arith.constant 0 : i32
    return %c0_i32, %c0_i32_0 : i32, i32
  }
  func.func @transform_9(%arg0: i32) -> (i32, i32) {
    %c0_i32 = arith.constant 0 : i32
    %c0_i32_0 = arith.constant 0 : i32
    %c0_i32_1 = arith.constant 0 : i32
    return %c0_i32, %c0_i32_0 : i32, i32
  }
  func.func @transform_10(%arg0: i32) -> (i32, i32) {
    %c0_i32 = arith.constant 0 : i32
    %c0_i32_0 = arith.constant 0 : i32
    %c0_i32_1 = arith.constant 0 : i32
    return %c0_i32, %c0_i32_0 : i32, i32
  }
  func.func @transform_11(%arg0: i32) -> (i32, i32) {
    %c0_i32 = arith.constant 0 : i32
    %c0_i32_0 = arith.constant 0 : i32
    %c0_i32_1 = arith.constant 0 : i32
    return %c0_i32, %c0_i32_0 : i32, i32
  }
  func.func @transform_12(%arg0: i32) -> (i32, i32) {
    %c0_i32 = arith.constant 0 : i32
    %c0_i32_0 = arith.constant 0 : i32
    %c0_i32_1 = arith.constant 0 : i32
    return %c0_i32, %c0_i32_0 : i32, i32
  }
  func.func @transform_13(%arg0: i32) -> (i32, i32, i32) {
    %c0_i32 = arith.constant 0 : i32
    %c0_i32_0 = arith.constant 0 : i32
    %c0_i32_1 = arith.constant 0 : i32
    return %arg0, %c0_i32, %c0_i32_0 : i32, i32, i32
  }
}

module attributes {stable_mosaic.version = 11 : i64} {
  func.func @_layer_kernel(%arg0: i32, %arg1: memref<1x8x32xf32, #tpu.memory_space<vmem>>, %arg2: memref<1x8x1xf32, #tpu.memory_space<vmem>>, %arg3: memref<1x1x8xf32, #tpu.memory_space<vmem>>, %arg4: memref<32x96xbf16, #tpu.memory_space<vmem>>, %arg5: memref<32x32xbf16, #tpu.memory_space<vmem>>, %arg6: memref<1x32xf32, #tpu.memory_space<vmem>>, %arg7: memref<32x32xbf16, #tpu.memory_space<vmem>>, %arg8: memref<32x32xbf16, #tpu.memory_space<vmem>>, %arg9: memref<1x32xf32, #tpu.memory_space<vmem>>, %arg10: memref<32x64xbf16, #tpu.memory_space<vmem>>, %arg11: memref<1x64xf32, #tpu.memory_space<vmem>>, %arg12: memref<64x32xbf16, #tpu.memory_space<vmem>>, %arg13: memref<1x32xf32, #tpu.memory_space<vmem>>, %arg14: memref<1x8x32xf32, #tpu.memory_space<vmem>>) attributes {dimension_semantics = [#tpu.dimension_semantics<parallel>], iteration_bounds = array<i64: 2>, scalar_prefetch = 0 : i64, scratch_operands = 0 : i64, tpu.core_type = #tpu.core_type<tc>, window_params = [{transform_indices = @transform_0, window_bounds = array<i64: 1, 8, 32>}, {transform_indices = @transform_1, window_bounds = array<i64: 1, 8, 1>}, {transform_indices = @transform_2, window_bounds = array<i64: 1, 1, 8>}, {pipeline_mode = #tpu.pipeline_mode<synchronous>, transform_indices = @transform_3, window_bounds = array<i64: 32, 96>}, {pipeline_mode = #tpu.pipeline_mode<synchronous>, transform_indices = @transform_4, window_bounds = array<i64: 32, 32>}, {pipeline_mode = #tpu.pipeline_mode<synchronous>, transform_indices = @transform_5, window_bounds = array<i64: 1, 32>}, {pipeline_mode = #tpu.pipeline_mode<synchronous>, transform_indices = @transform_6, window_bounds = array<i64: 32, 32>}, {pipeline_mode = #tpu.pipeline_mode<synchronous>, transform_indices = @transform_7, window_bounds = array<i64: 32, 32>}, {pipeline_mode = #tpu.pipeline_mode<synchronous>, transform_indices = @transform_8, window_bounds = array<i64: 1, 32>}, {pipeline_mode = #tpu.pipeline_mode<synchronous>, transform_indices = @transform_9, window_bounds = array<i64: 32, 64>}, {pipeline_mode = #tpu.pipeline_mode<synchronous>, transform_indices = @transform_10, window_bounds = array<i64: 1, 64>}, {pipeline_mode = #tpu.pipeline_mode<synchronous>, transform_indices = @transform_11, window_bounds = array<i64: 64, 32>}, {pipeline_mode = #tpu.pipeline_mode<synchronous>, transform_indices = @transform_12, window_bounds = array<i64: 1, 32>}, {transform_indices = @transform_13, window_bounds = array<i64: 1, 8, 32>}]} {
    %c0 = arith.constant 0 : index
    %c0_0 = arith.constant 0 : index
    %c0_1 = arith.constant 0 : index
    %0 = vector.load %arg1[%c0, %c0_0, %c0_1] : memref<1x8x32xf32, #tpu.memory_space<vmem>>, vector<1x8x32xf32>
    %1 = vector.shape_cast %0 : vector<1x8x32xf32> to vector<8x32xf32>
    %c0_2 = arith.constant 0 : index
    %c0_3 = arith.constant 0 : index
    %c0_4 = arith.constant 0 : index
    %2 = vector.load %arg2[%c0_2, %c0_3, %c0_4] : memref<1x8x1xf32, #tpu.memory_space<vmem>>, vector<1x8x1xf32>
    %3 = vector.shape_cast %2 : vector<1x8x1xf32> to vector<8x1xf32>
    %c0_5 = arith.constant 0 : index
    %c0_6 = arith.constant 0 : index
    %c0_7 = arith.constant 0 : index
    %4 = vector.load %arg3[%c0_5, %c0_6, %c0_7] : memref<1x1x8xf32, #tpu.memory_space<vmem>>, vector<1x1x8xf32>
    %5 = vector.shape_cast %4 : vector<1x1x8xf32> to vector<1x8xf32>
    %c0_8 = arith.constant 0 : index
    %c0_9 = arith.constant 0 : index
    %6 = vector.load %arg4[%c0_8, %c0_9] : memref<32x96xbf16, #tpu.memory_space<vmem>>, vector<32x96xbf16>
    %7 = arith.truncf %1 : vector<8x32xf32> to vector<8x32xbf16>
    %cst = arith.constant dense<0.000000e+00> : vector<8x96xf32>
    %8 = tpu.matmul %7, %6, %cst {dimension_numbers = #tpu.dot_dimension_numbers<[1], [0], [0], [1], [0, 0, 1, 1], [], []>} : vector<8x32xbf16>, vector<32x96xbf16>, vector<8x96xf32> -> vector<8x96xf32>
    %9 = vector.extract_strided_slice %8 {offsets = [0, 0], sizes = [8, 32], strides = [1, 1]} : vector<8x96xf32> to vector<8x32xf32>
    %10 = vector.extract_strided_slice %8 {offsets = [0, 32], sizes = [8, 32], strides = [1, 1]} : vector<8x96xf32> to vector<8x32xf32>
    %11 = vector.extract_strided_slice %8 {offsets = [0, 64], sizes = [8, 32], strides = [1, 1]} : vector<8x96xf32> to vector<8x32xf32>
    %12 = tpu.iota {dimensions = array<i32: 0>} : vector<8x8xi32>
    %13 = tpu.iota {dimensions = array<i32: 1>} : vector<8x8xi32>
    %14 = arith.cmpi slt, %13, %12 : vector<8x8xi32>
    %15 = arith.extui %14 : vector<8x8xi1> to vector<8x8xi32>
    %16 = arith.sitofp %15 : vector<8x8xi32> to vector<8x8xf32>
    %17 = vector.broadcast %3 : vector<8x1xf32> to vector<8x8xf32>
    %18 = arith.mulf %16, %17 : vector<8x8xf32>
    %19 = vector.broadcast %5 : vector<1x8xf32> to vector<8x8xf32>
    %20 = arith.mulf %18, %19 : vector<8x8xf32>
    %21 = arith.sitofp %12 : vector<8x8xi32> to vector<8x8xf32>
    %22 = arith.sitofp %13 : vector<8x8xi32> to vector<8x8xf32>
    %23 = arith.subf %21, %22 : vector<8x8xf32>
    %24 = math.absf %23 : vector<8x8xf32>
    %cst_10 = arith.constant -1.500000e+00 : f32
    %25 = vector.broadcast %cst_10 : f32 to vector<8x8xf32>
    %26 = arith.mulf %25, %24 : vector<8x8xf32>
    %27 = vector.extract_strided_slice %9 {offsets = [0, 0], sizes = [8, 8], strides = [1, 1]} : vector<8x32xf32> to vector<8x8xf32>
    %cst_11 = arith.constant dense<0.000000e+00> : vector<8xf32>
    %28 = vector.multi_reduction <add>, %27, %cst_11 [1] : vector<8x8xf32> to vector<8xf32>
    %29 = vector.shape_cast %28 : vector<8xf32> to vector<8x1xf32>
    %cst_12 = arith.constant 8.000000e+00 : f32
    %30 = vector.broadcast %cst_12 : f32 to vector<8x1xf32>
    %31 = arith.divf %29, %30 : vector<8x1xf32>
    %32 = vector.broadcast %31 : vector<8x1xf32> to vector<8x8xf32>
    %33 = arith.subf %27, %32 : vector<8x8xf32>
    %34 = vector.broadcast %31 : vector<8x1xf32> to vector<8x8xf32>
    %35 = arith.subf %27, %34 : vector<8x8xf32>
    %36 = arith.mulf %33, %35 : vector<8x8xf32>
    %cst_13 = arith.constant dense<0.000000e+00> : vector<8xf32>
    %37 = vector.multi_reduction <add>, %36, %cst_13 [1] : vector<8x8xf32> to vector<8xf32>
    %38 = vector.shape_cast %37 : vector<8xf32> to vector<8x1xf32>
    %cst_14 = arith.constant 8.000000e+00 : f32
    %39 = vector.broadcast %cst_14 : f32 to vector<8x1xf32>
    %40 = arith.divf %38, %39 : vector<8x1xf32>
    %41 = vector.broadcast %31 : vector<8x1xf32> to vector<8x8xf32>
    %42 = arith.subf %27, %41 : vector<8x8xf32>
    %cst_15 = arith.constant 9.99999974E-6 : f32
    %43 = vector.broadcast %cst_15 : f32 to vector<8x1xf32>
    %44 = arith.addf %40, %43 : vector<8x1xf32>
    %45 = math.rsqrt %44 : vector<8x1xf32>
    %46 = vector.broadcast %45 : vector<8x1xf32> to vector<8x8xf32>
    %47 = arith.mulf %42, %46 : vector<8x8xf32>
    %48 = vector.extract_strided_slice %10 {offsets = [0, 0], sizes = [8, 8], strides = [1, 1]} : vector<8x32xf32> to vector<8x8xf32>
    %cst_16 = arith.constant dense<0.000000e+00> : vector<8xf32>
    %49 = vector.multi_reduction <add>, %48, %cst_16 [1] : vector<8x8xf32> to vector<8xf32>
    %50 = vector.shape_cast %49 : vector<8xf32> to vector<8x1xf32>
    %cst_17 = arith.constant 8.000000e+00 : f32
    %51 = vector.broadcast %cst_17 : f32 to vector<8x1xf32>
    %52 = arith.divf %50, %51 : vector<8x1xf32>
    %53 = vector.broadcast %52 : vector<8x1xf32> to vector<8x8xf32>
    %54 = arith.subf %48, %53 : vector<8x8xf32>
    %55 = vector.broadcast %52 : vector<8x1xf32> to vector<8x8xf32>
    %56 = arith.subf %48, %55 : vector<8x8xf32>
    %57 = arith.mulf %54, %56 : vector<8x8xf32>
    %cst_18 = arith.constant dense<0.000000e+00> : vector<8xf32>
    %58 = vector.multi_reduction <add>, %57, %cst_18 [1] : vector<8x8xf32> to vector<8xf32>
    %59 = vector.shape_cast %58 : vector<8xf32> to vector<8x1xf32>
    %cst_19 = arith.constant 8.000000e+00 : f32
    %60 = vector.broadcast %cst_19 : f32 to vector<8x1xf32>
    %61 = arith.divf %59, %60 : vector<8x1xf32>
    %62 = vector.broadcast %52 : vector<8x1xf32> to vector<8x8xf32>
    %63 = arith.subf %48, %62 : vector<8x8xf32>
    %cst_20 = arith.constant 9.99999974E-6 : f32
    %64 = vector.broadcast %cst_20 : f32 to vector<8x1xf32>
    %65 = arith.addf %61, %64 : vector<8x1xf32>
    %66 = math.rsqrt %65 : vector<8x1xf32>
    %67 = vector.broadcast %66 : vector<8x1xf32> to vector<8x8xf32>
    %68 = arith.mulf %63, %67 : vector<8x8xf32>
    %69 = vector.extract_strided_slice %11 {offsets = [0, 0], sizes = [8, 8], strides = [1, 1]} : vector<8x32xf32> to vector<8x8xf32>
    %cst_21 = arith.constant dense<0.000000e+00> : vector<8xf32>
    %70 = vector.multi_reduction <add>, %69, %cst_21 [1] : vector<8x8xf32> to vector<8xf32>
    %71 = vector.shape_cast %70 : vector<8xf32> to vector<8x1xf32>
    %cst_22 = arith.constant 8.000000e+00 : f32
    %72 = vector.broadcast %cst_22 : f32 to vector<8x1xf32>
    %73 = arith.divf %71, %72 : vector<8x1xf32>
    %74 = vector.broadcast %73 : vector<8x1xf32> to vector<8x8xf32>
    %75 = arith.subf %69, %74 : vector<8x8xf32>
    %76 = vector.broadcast %73 : vector<8x1xf32> to vector<8x8xf32>
    %77 = arith.subf %69, %76 : vector<8x8xf32>
    %78 = arith.mulf %75, %77 : vector<8x8xf32>
    %cst_23 = arith.constant dense<0.000000e+00> : vector<8xf32>
    %79 = vector.multi_reduction <add>, %78, %cst_23 [1] : vector<8x8xf32> to vector<8xf32>
    %80 = vector.shape_cast %79 : vector<8xf32> to vector<8x1xf32>
    %cst_24 = arith.constant 8.000000e+00 : f32
    %81 = vector.broadcast %cst_24 : f32 to vector<8x1xf32>
    %82 = arith.divf %80, %81 : vector<8x1xf32>
    %83 = vector.broadcast %73 : vector<8x1xf32> to vector<8x8xf32>
    %84 = arith.subf %69, %83 : vector<8x8xf32>
    %cst_25 = arith.constant 9.99999974E-6 : f32
    %85 = vector.broadcast %cst_25 : f32 to vector<8x1xf32>
    %86 = arith.addf %82, %85 : vector<8x1xf32>
    %87 = math.rsqrt %86 : vector<8x1xf32>
    %88 = vector.broadcast %87 : vector<8x1xf32> to vector<8x8xf32>
    %89 = arith.mulf %84, %88 : vector<8x8xf32>
    %90 = arith.truncf %47 : vector<8x8xf32> to vector<8x8xbf16>
    %91 = arith.truncf %68 : vector<8x8xf32> to vector<8x8xbf16>
    %cst_26 = arith.constant dense<0.000000e+00> : vector<8x8xf32>
    %92 = tpu.matmul %90, %91, %cst_26 {dimension_numbers = #tpu.dot_dimension_numbers<[1], [1], [0], [0], [0, 0, 1, 0], [], []>} : vector<8x8xbf16>, vector<8x8xbf16>, vector<8x8xf32> -> vector<8x8xf32>
    %cst_27 = arith.constant 0.176776692 : f32
    %93 = vector.broadcast %cst_27 : f32 to vector<8x8xf32>
    %94 = arith.mulf %92, %93 : vector<8x8xf32>
    %95 = arith.addf %94, %26 : vector<8x8xf32>
    %96 = arith.mulf %95, %20 : vector<8x8xf32>
    %cst_28 = arith.constant dense<0xFF800000> : vector<8xf32>
    %97 = vector.multi_reduction <maximumf>, %96, %cst_28 [1] : vector<8x8xf32> to vector<8xf32>
    %98 = vector.shape_cast %97 : vector<8xf32> to vector<8x1xf32>
    %99 = vector.broadcast %98 : vector<8x1xf32> to vector<8x8xf32>
    %100 = arith.subf %96, %99 : vector<8x8xf32>
    %101 = math.exp %100 : vector<8x8xf32>
    %102 = arith.mulf %101, %20 : vector<8x8xf32>
    %cst_29 = arith.constant dense<0.000000e+00> : vector<8xf32>
    %103 = vector.multi_reduction <add>, %102, %cst_29 [1] : vector<8x8xf32> to vector<8xf32>
    %104 = vector.shape_cast %103 : vector<8xf32> to vector<8x1xf32>
    %cst_30 = arith.constant 0.000000e+00 : f32
    %105 = vector.broadcast %cst_30 : f32 to vector<8x1xf32>
    %106 = arith.cmpf oeq, %104, %105 : vector<8x1xf32>
    %107 = arith.extui %106 : vector<8x1xi1> to vector<8x1xi32>
    %108 = arith.sitofp %107 : vector<8x1xi32> to vector<8x1xf32>
    %109 = arith.addf %104, %108 : vector<8x1xf32>
    %cst_31 = arith.constant 9.99999968E-21 : f32
    %110 = vector.broadcast %cst_31 : f32 to vector<8x1xf32>
    %111 = arith.addf %109, %110 : vector<8x1xf32>
    %112 = tpu.reciprocal %111 {approx = true} : vector<8x1xf32> -> vector<8x1xf32>
    %113 = vector.broadcast %112 : vector<8x1xf32> to vector<8x8xf32>
    %114 = arith.mulf %102, %113 : vector<8x8xf32>
    %115 = arith.truncf %114 : vector<8x8xf32> to vector<8x8xbf16>
    %116 = arith.truncf %89 : vector<8x8xf32> to vector<8x8xbf16>
    %cst_32 = arith.constant dense<0.000000e+00> : vector<8x8xf32>
    %117 = tpu.matmul %115, %116, %cst_32 {dimension_numbers = #tpu.dot_dimension_numbers<[1], [0], [0], [1], [0, 0, 1, 1], [], []>} : vector<8x8xbf16>, vector<8x8xbf16>, vector<8x8xf32> -> vector<8x8xf32>
    %118 = vector.extract_strided_slice %9 {offsets = [0, 8], sizes = [8, 8], strides = [1, 1]} : vector<8x32xf32> to vector<8x8xf32>
    %cst_33 = arith.constant dense<0.000000e+00> : vector<8xf32>
    %119 = vector.multi_reduction <add>, %118, %cst_33 [1] : vector<8x8xf32> to vector<8xf32>
    %120 = vector.shape_cast %119 : vector<8xf32> to vector<8x1xf32>
    %cst_34 = arith.constant 8.000000e+00 : f32
    %121 = vector.broadcast %cst_34 : f32 to vector<8x1xf32>
    %122 = arith.divf %120, %121 : vector<8x1xf32>
    %123 = vector.broadcast %122 : vector<8x1xf32> to vector<8x8xf32>
    %124 = arith.subf %118, %123 : vector<8x8xf32>
    %125 = vector.broadcast %122 : vector<8x1xf32> to vector<8x8xf32>
    %126 = arith.subf %118, %125 : vector<8x8xf32>
    %127 = arith.mulf %124, %126 : vector<8x8xf32>
    %cst_35 = arith.constant dense<0.000000e+00> : vector<8xf32>
    %128 = vector.multi_reduction <add>, %127, %cst_35 [1] : vector<8x8xf32> to vector<8xf32>
    %129 = vector.shape_cast %128 : vector<8xf32> to vector<8x1xf32>
    %cst_36 = arith.constant 8.000000e+00 : f32
    %130 = vector.broadcast %cst_36 : f32 to vector<8x1xf32>
    %131 = arith.divf %129, %130 : vector<8x1xf32>
    %132 = vector.broadcast %122 : vector<8x1xf32> to vector<8x8xf32>
    %133 = arith.subf %118, %132 : vector<8x8xf32>
    %cst_37 = arith.constant 9.99999974E-6 : f32
    %134 = vector.broadcast %cst_37 : f32 to vector<8x1xf32>
    %135 = arith.addf %131, %134 : vector<8x1xf32>
    %136 = math.rsqrt %135 : vector<8x1xf32>
    %137 = vector.broadcast %136 : vector<8x1xf32> to vector<8x8xf32>
    %138 = arith.mulf %133, %137 : vector<8x8xf32>
    %139 = vector.extract_strided_slice %10 {offsets = [0, 8], sizes = [8, 8], strides = [1, 1]} : vector<8x32xf32> to vector<8x8xf32>
    %cst_38 = arith.constant dense<0.000000e+00> : vector<8xf32>
    %140 = vector.multi_reduction <add>, %139, %cst_38 [1] : vector<8x8xf32> to vector<8xf32>
    %141 = vector.shape_cast %140 : vector<8xf32> to vector<8x1xf32>
    %cst_39 = arith.constant 8.000000e+00 : f32
    %142 = vector.broadcast %cst_39 : f32 to vector<8x1xf32>
    %143 = arith.divf %141, %142 : vector<8x1xf32>
    %144 = vector.broadcast %143 : vector<8x1xf32> to vector<8x8xf32>
    %145 = arith.subf %139, %144 : vector<8x8xf32>
    %146 = vector.broadcast %143 : vector<8x1xf32> to vector<8x8xf32>
    %147 = arith.subf %139, %146 : vector<8x8xf32>
    %148 = arith.mulf %145, %147 : vector<8x8xf32>
    %cst_40 = arith.constant dense<0.000000e+00> : vector<8xf32>
    %149 = vector.multi_reduction <add>, %148, %cst_40 [1] : vector<8x8xf32> to vector<8xf32>
    %150 = vector.shape_cast %149 : vector<8xf32> to vector<8x1xf32>
    %cst_41 = arith.constant 8.000000e+00 : f32
    %151 = vector.broadcast %cst_41 : f32 to vector<8x1xf32>
    %152 = arith.divf %150, %151 : vector<8x1xf32>
    %153 = vector.broadcast %143 : vector<8x1xf32> to vector<8x8xf32>
    %154 = arith.subf %139, %153 : vector<8x8xf32>
    %cst_42 = arith.constant 9.99999974E-6 : f32
    %155 = vector.broadcast %cst_42 : f32 to vector<8x1xf32>
    %156 = arith.addf %152, %155 : vector<8x1xf32>
    %157 = math.rsqrt %156 : vector<8x1xf32>
    %158 = vector.broadcast %157 : vector<8x1xf32> to vector<8x8xf32>
    %159 = arith.mulf %154, %158 : vector<8x8xf32>
    %160 = vector.extract_strided_slice %11 {offsets = [0, 8], sizes = [8, 8], strides = [1, 1]} : vector<8x32xf32> to vector<8x8xf32>
    %cst_43 = arith.constant dense<0.000000e+00> : vector<8xf32>
    %161 = vector.multi_reduction <add>, %160, %cst_43 [1] : vector<8x8xf32> to vector<8xf32>
    %162 = vector.shape_cast %161 : vector<8xf32> to vector<8x1xf32>
    %cst_44 = arith.constant 8.000000e+00 : f32
    %163 = vector.broadcast %cst_44 : f32 to vector<8x1xf32>
    %164 = arith.divf %162, %163 : vector<8x1xf32>
    %165 = vector.broadcast %164 : vector<8x1xf32> to vector<8x8xf32>
    %166 = arith.subf %160, %165 : vector<8x8xf32>
    %167 = vector.broadcast %164 : vector<8x1xf32> to vector<8x8xf32>
    %168 = arith.subf %160, %167 : vector<8x8xf32>
    %169 = arith.mulf %166, %168 : vector<8x8xf32>
    %cst_45 = arith.constant dense<0.000000e+00> : vector<8xf32>
    %170 = vector.multi_reduction <add>, %169, %cst_45 [1] : vector<8x8xf32> to vector<8xf32>
    %171 = vector.shape_cast %170 : vector<8xf32> to vector<8x1xf32>
    %cst_46 = arith.constant 8.000000e+00 : f32
    %172 = vector.broadcast %cst_46 : f32 to vector<8x1xf32>
    %173 = arith.divf %171, %172 : vector<8x1xf32>
    %174 = vector.broadcast %164 : vector<8x1xf32> to vector<8x8xf32>
    %175 = arith.subf %160, %174 : vector<8x8xf32>
    %cst_47 = arith.constant 9.99999974E-6 : f32
    %176 = vector.broadcast %cst_47 : f32 to vector<8x1xf32>
    %177 = arith.addf %173, %176 : vector<8x1xf32>
    %178 = math.rsqrt %177 : vector<8x1xf32>
    %179 = vector.broadcast %178 : vector<8x1xf32> to vector<8x8xf32>
    %180 = arith.mulf %175, %179 : vector<8x8xf32>
    %181 = arith.truncf %138 : vector<8x8xf32> to vector<8x8xbf16>
    %182 = arith.truncf %159 : vector<8x8xf32> to vector<8x8xbf16>
    %cst_48 = arith.constant dense<0.000000e+00> : vector<8x8xf32>
    %183 = tpu.matmul %181, %182, %cst_48 {dimension_numbers = #tpu.dot_dimension_numbers<[1], [1], [0], [0], [0, 0, 1, 0], [], []>} : vector<8x8xbf16>, vector<8x8xbf16>, vector<8x8xf32> -> vector<8x8xf32>
    %cst_49 = arith.constant 0.176776692 : f32
    %184 = vector.broadcast %cst_49 : f32 to vector<8x8xf32>
    %185 = arith.mulf %183, %184 : vector<8x8xf32>
    %186 = arith.addf %185, %26 : vector<8x8xf32>
    %187 = arith.mulf %186, %20 : vector<8x8xf32>
    %cst_50 = arith.constant dense<0xFF800000> : vector<8xf32>
    %188 = vector.multi_reduction <maximumf>, %187, %cst_50 [1] : vector<8x8xf32> to vector<8xf32>
    %189 = vector.shape_cast %188 : vector<8xf32> to vector<8x1xf32>
    %190 = vector.broadcast %189 : vector<8x1xf32> to vector<8x8xf32>
    %191 = arith.subf %187, %190 : vector<8x8xf32>
    %192 = math.exp %191 : vector<8x8xf32>
    %193 = arith.mulf %192, %20 : vector<8x8xf32>
    %cst_51 = arith.constant dense<0.000000e+00> : vector<8xf32>
    %194 = vector.multi_reduction <add>, %193, %cst_51 [1] : vector<8x8xf32> to vector<8xf32>
    %195 = vector.shape_cast %194 : vector<8xf32> to vector<8x1xf32>
    %cst_52 = arith.constant 0.000000e+00 : f32
    %196 = vector.broadcast %cst_52 : f32 to vector<8x1xf32>
    %197 = arith.cmpf oeq, %195, %196 : vector<8x1xf32>
    %198 = arith.extui %197 : vector<8x1xi1> to vector<8x1xi32>
    %199 = arith.sitofp %198 : vector<8x1xi32> to vector<8x1xf32>
    %200 = arith.addf %195, %199 : vector<8x1xf32>
    %cst_53 = arith.constant 9.99999968E-21 : f32
    %201 = vector.broadcast %cst_53 : f32 to vector<8x1xf32>
    %202 = arith.addf %200, %201 : vector<8x1xf32>
    %203 = tpu.reciprocal %202 {approx = true} : vector<8x1xf32> -> vector<8x1xf32>
    %204 = vector.broadcast %203 : vector<8x1xf32> to vector<8x8xf32>
    %205 = arith.mulf %193, %204 : vector<8x8xf32>
    %206 = arith.truncf %205 : vector<8x8xf32> to vector<8x8xbf16>
    %207 = arith.truncf %180 : vector<8x8xf32> to vector<8x8xbf16>
    %cst_54 = arith.constant dense<0.000000e+00> : vector<8x8xf32>
    %208 = tpu.matmul %206, %207, %cst_54 {dimension_numbers = #tpu.dot_dimension_numbers<[1], [0], [0], [1], [0, 0, 1, 1], [], []>} : vector<8x8xbf16>, vector<8x8xbf16>, vector<8x8xf32> -> vector<8x8xf32>
    %209 = vector.extract_strided_slice %9 {offsets = [0, 16], sizes = [8, 8], strides = [1, 1]} : vector<8x32xf32> to vector<8x8xf32>
    %cst_55 = arith.constant dense<0.000000e+00> : vector<8xf32>
    %210 = vector.multi_reduction <add>, %209, %cst_55 [1] : vector<8x8xf32> to vector<8xf32>
    %211 = vector.shape_cast %210 : vector<8xf32> to vector<8x1xf32>
    %cst_56 = arith.constant 8.000000e+00 : f32
    %212 = vector.broadcast %cst_56 : f32 to vector<8x1xf32>
    %213 = arith.divf %211, %212 : vector<8x1xf32>
    %214 = vector.broadcast %213 : vector<8x1xf32> to vector<8x8xf32>
    %215 = arith.subf %209, %214 : vector<8x8xf32>
    %216 = vector.broadcast %213 : vector<8x1xf32> to vector<8x8xf32>
    %217 = arith.subf %209, %216 : vector<8x8xf32>
    %218 = arith.mulf %215, %217 : vector<8x8xf32>
    %cst_57 = arith.constant dense<0.000000e+00> : vector<8xf32>
    %219 = vector.multi_reduction <add>, %218, %cst_57 [1] : vector<8x8xf32> to vector<8xf32>
    %220 = vector.shape_cast %219 : vector<8xf32> to vector<8x1xf32>
    %cst_58 = arith.constant 8.000000e+00 : f32
    %221 = vector.broadcast %cst_58 : f32 to vector<8x1xf32>
    %222 = arith.divf %220, %221 : vector<8x1xf32>
    %223 = vector.broadcast %213 : vector<8x1xf32> to vector<8x8xf32>
    %224 = arith.subf %209, %223 : vector<8x8xf32>
    %cst_59 = arith.constant 9.99999974E-6 : f32
    %225 = vector.broadcast %cst_59 : f32 to vector<8x1xf32>
    %226 = arith.addf %222, %225 : vector<8x1xf32>
    %227 = math.rsqrt %226 : vector<8x1xf32>
    %228 = vector.broadcast %227 : vector<8x1xf32> to vector<8x8xf32>
    %229 = arith.mulf %224, %228 : vector<8x8xf32>
    %230 = vector.extract_strided_slice %10 {offsets = [0, 16], sizes = [8, 8], strides = [1, 1]} : vector<8x32xf32> to vector<8x8xf32>
    %cst_60 = arith.constant dense<0.000000e+00> : vector<8xf32>
    %231 = vector.multi_reduction <add>, %230, %cst_60 [1] : vector<8x8xf32> to vector<8xf32>
    %232 = vector.shape_cast %231 : vector<8xf32> to vector<8x1xf32>
    %cst_61 = arith.constant 8.000000e+00 : f32
    %233 = vector.broadcast %cst_61 : f32 to vector<8x1xf32>
    %234 = arith.divf %232, %233 : vector<8x1xf32>
    %235 = vector.broadcast %234 : vector<8x1xf32> to vector<8x8xf32>
    %236 = arith.subf %230, %235 : vector<8x8xf32>
    %237 = vector.broadcast %234 : vector<8x1xf32> to vector<8x8xf32>
    %238 = arith.subf %230, %237 : vector<8x8xf32>
    %239 = arith.mulf %236, %238 : vector<8x8xf32>
    %cst_62 = arith.constant dense<0.000000e+00> : vector<8xf32>
    %240 = vector.multi_reduction <add>, %239, %cst_62 [1] : vector<8x8xf32> to vector<8xf32>
    %241 = vector.shape_cast %240 : vector<8xf32> to vector<8x1xf32>
    %cst_63 = arith.constant 8.000000e+00 : f32
    %242 = vector.broadcast %cst_63 : f32 to vector<8x1xf32>
    %243 = arith.divf %241, %242 : vector<8x1xf32>
    %244 = vector.broadcast %234 : vector<8x1xf32> to vector<8x8xf32>
    %245 = arith.subf %230, %244 : vector<8x8xf32>
    %cst_64 = arith.constant 9.99999974E-6 : f32
    %246 = vector.broadcast %cst_64 : f32 to vector<8x1xf32>
    %247 = arith.addf %243, %246 : vector<8x1xf32>
    %248 = math.rsqrt %247 : vector<8x1xf32>
    %249 = vector.broadcast %248 : vector<8x1xf32> to vector<8x8xf32>
    %250 = arith.mulf %245, %249 : vector<8x8xf32>
    %251 = vector.extract_strided_slice %11 {offsets = [0, 16], sizes = [8, 8], strides = [1, 1]} : vector<8x32xf32> to vector<8x8xf32>
    %cst_65 = arith.constant dense<0.000000e+00> : vector<8xf32>
    %252 = vector.multi_reduction <add>, %251, %cst_65 [1] : vector<8x8xf32> to vector<8xf32>
    %253 = vector.shape_cast %252 : vector<8xf32> to vector<8x1xf32>
    %cst_66 = arith.constant 8.000000e+00 : f32
    %254 = vector.broadcast %cst_66 : f32 to vector<8x1xf32>
    %255 = arith.divf %253, %254 : vector<8x1xf32>
    %256 = vector.broadcast %255 : vector<8x1xf32> to vector<8x8xf32>
    %257 = arith.subf %251, %256 : vector<8x8xf32>
    %258 = vector.broadcast %255 : vector<8x1xf32> to vector<8x8xf32>
    %259 = arith.subf %251, %258 : vector<8x8xf32>
    %260 = arith.mulf %257, %259 : vector<8x8xf32>
    %cst_67 = arith.constant dense<0.000000e+00> : vector<8xf32>
    %261 = vector.multi_reduction <add>, %260, %cst_67 [1] : vector<8x8xf32> to vector<8xf32>
    %262 = vector.shape_cast %261 : vector<8xf32> to vector<8x1xf32>
    %cst_68 = arith.constant 8.000000e+00 : f32
    %263 = vector.broadcast %cst_68 : f32 to vector<8x1xf32>
    %264 = arith.divf %262, %263 : vector<8x1xf32>
    %265 = vector.broadcast %255 : vector<8x1xf32> to vector<8x8xf32>
    %266 = arith.subf %251, %265 : vector<8x8xf32>
    %cst_69 = arith.constant 9.99999974E-6 : f32
    %267 = vector.broadcast %cst_69 : f32 to vector<8x1xf32>
    %268 = arith.addf %264, %267 : vector<8x1xf32>
    %269 = math.rsqrt %268 : vector<8x1xf32>
    %270 = vector.broadcast %269 : vector<8x1xf32> to vector<8x8xf32>
    %271 = arith.mulf %266, %270 : vector<8x8xf32>
    %272 = arith.truncf %229 : vector<8x8xf32> to vector<8x8xbf16>
    %273 = arith.truncf %250 : vector<8x8xf32> to vector<8x8xbf16>
    %cst_70 = arith.constant dense<0.000000e+00> : vector<8x8xf32>
    %274 = tpu.matmul %272, %273, %cst_70 {dimension_numbers = #tpu.dot_dimension_numbers<[1], [1], [0], [0], [0, 0, 1, 0], [], []>} : vector<8x8xbf16>, vector<8x8xbf16>, vector<8x8xf32> -> vector<8x8xf32>
    %cst_71 = arith.constant 0.176776692 : f32
    %275 = vector.broadcast %cst_71 : f32 to vector<8x8xf32>
    %276 = arith.mulf %274, %275 : vector<8x8xf32>
    %277 = arith.addf %276, %26 : vector<8x8xf32>
    %278 = arith.mulf %277, %20 : vector<8x8xf32>
    %cst_72 = arith.constant dense<0xFF800000> : vector<8xf32>
    %279 = vector.multi_reduction <maximumf>, %278, %cst_72 [1] : vector<8x8xf32> to vector<8xf32>
    %280 = vector.shape_cast %279 : vector<8xf32> to vector<8x1xf32>
    %281 = vector.broadcast %280 : vector<8x1xf32> to vector<8x8xf32>
    %282 = arith.subf %278, %281 : vector<8x8xf32>
    %283 = math.exp %282 : vector<8x8xf32>
    %284 = arith.mulf %283, %20 : vector<8x8xf32>
    %cst_73 = arith.constant dense<0.000000e+00> : vector<8xf32>
    %285 = vector.multi_reduction <add>, %284, %cst_73 [1] : vector<8x8xf32> to vector<8xf32>
    %286 = vector.shape_cast %285 : vector<8xf32> to vector<8x1xf32>
    %cst_74 = arith.constant 0.000000e+00 : f32
    %287 = vector.broadcast %cst_74 : f32 to vector<8x1xf32>
    %288 = arith.cmpf oeq, %286, %287 : vector<8x1xf32>
    %289 = arith.extui %288 : vector<8x1xi1> to vector<8x1xi32>
    %290 = arith.sitofp %289 : vector<8x1xi32> to vector<8x1xf32>
    %291 = arith.addf %286, %290 : vector<8x1xf32>
    %cst_75 = arith.constant 9.99999968E-21 : f32
    %292 = vector.broadcast %cst_75 : f32 to vector<8x1xf32>
    %293 = arith.addf %291, %292 : vector<8x1xf32>
    %294 = tpu.reciprocal %293 {approx = true} : vector<8x1xf32> -> vector<8x1xf32>
    %295 = vector.broadcast %294 : vector<8x1xf32> to vector<8x8xf32>
    %296 = arith.mulf %284, %295 : vector<8x8xf32>
    %297 = arith.truncf %296 : vector<8x8xf32> to vector<8x8xbf16>
    %298 = arith.truncf %271 : vector<8x8xf32> to vector<8x8xbf16>
    %cst_76 = arith.constant dense<0.000000e+00> : vector<8x8xf32>
    %299 = tpu.matmul %297, %298, %cst_76 {dimension_numbers = #tpu.dot_dimension_numbers<[1], [0], [0], [1], [0, 0, 1, 1], [], []>} : vector<8x8xbf16>, vector<8x8xbf16>, vector<8x8xf32> -> vector<8x8xf32>
    %300 = vector.extract_strided_slice %9 {offsets = [0, 24], sizes = [8, 8], strides = [1, 1]} : vector<8x32xf32> to vector<8x8xf32>
    %cst_77 = arith.constant dense<0.000000e+00> : vector<8xf32>
    %301 = vector.multi_reduction <add>, %300, %cst_77 [1] : vector<8x8xf32> to vector<8xf32>
    %302 = vector.shape_cast %301 : vector<8xf32> to vector<8x1xf32>
    %cst_78 = arith.constant 8.000000e+00 : f32
    %303 = vector.broadcast %cst_78 : f32 to vector<8x1xf32>
    %304 = arith.divf %302, %303 : vector<8x1xf32>
    %305 = vector.broadcast %304 : vector<8x1xf32> to vector<8x8xf32>
    %306 = arith.subf %300, %305 : vector<8x8xf32>
    %307 = vector.broadcast %304 : vector<8x1xf32> to vector<8x8xf32>
    %308 = arith.subf %300, %307 : vector<8x8xf32>
    %309 = arith.mulf %306, %308 : vector<8x8xf32>
    %cst_79 = arith.constant dense<0.000000e+00> : vector<8xf32>
    %310 = vector.multi_reduction <add>, %309, %cst_79 [1] : vector<8x8xf32> to vector<8xf32>
    %311 = vector.shape_cast %310 : vector<8xf32> to vector<8x1xf32>
    %cst_80 = arith.constant 8.000000e+00 : f32
    %312 = vector.broadcast %cst_80 : f32 to vector<8x1xf32>
    %313 = arith.divf %311, %312 : vector<8x1xf32>
    %314 = vector.broadcast %304 : vector<8x1xf32> to vector<8x8xf32>
    %315 = arith.subf %300, %314 : vector<8x8xf32>
    %cst_81 = arith.constant 9.99999974E-6 : f32
    %316 = vector.broadcast %cst_81 : f32 to vector<8x1xf32>
    %317 = arith.addf %313, %316 : vector<8x1xf32>
    %318 = math.rsqrt %317 : vector<8x1xf32>
    %319 = vector.broadcast %318 : vector<8x1xf32> to vector<8x8xf32>
    %320 = arith.mulf %315, %319 : vector<8x8xf32>
    %321 = vector.extract_strided_slice %10 {offsets = [0, 24], sizes = [8, 8], strides = [1, 1]} : vector<8x32xf32> to vector<8x8xf32>
    %cst_82 = arith.constant dense<0.000000e+00> : vector<8xf32>
    %322 = vector.multi_reduction <add>, %321, %cst_82 [1] : vector<8x8xf32> to vector<8xf32>
    %323 = vector.shape_cast %322 : vector<8xf32> to vector<8x1xf32>
    %cst_83 = arith.constant 8.000000e+00 : f32
    %324 = vector.broadcast %cst_83 : f32 to vector<8x1xf32>
    %325 = arith.divf %323, %324 : vector<8x1xf32>
    %326 = vector.broadcast %325 : vector<8x1xf32> to vector<8x8xf32>
    %327 = arith.subf %321, %326 : vector<8x8xf32>
    %328 = vector.broadcast %325 : vector<8x1xf32> to vector<8x8xf32>
    %329 = arith.subf %321, %328 : vector<8x8xf32>
    %330 = arith.mulf %327, %329 : vector<8x8xf32>
    %cst_84 = arith.constant dense<0.000000e+00> : vector<8xf32>
    %331 = vector.multi_reduction <add>, %330, %cst_84 [1] : vector<8x8xf32> to vector<8xf32>
    %332 = vector.shape_cast %331 : vector<8xf32> to vector<8x1xf32>
    %cst_85 = arith.constant 8.000000e+00 : f32
    %333 = vector.broadcast %cst_85 : f32 to vector<8x1xf32>
    %334 = arith.divf %332, %333 : vector<8x1xf32>
    %335 = vector.broadcast %325 : vector<8x1xf32> to vector<8x8xf32>
    %336 = arith.subf %321, %335 : vector<8x8xf32>
    %cst_86 = arith.constant 9.99999974E-6 : f32
    %337 = vector.broadcast %cst_86 : f32 to vector<8x1xf32>
    %338 = arith.addf %334, %337 : vector<8x1xf32>
    %339 = math.rsqrt %338 : vector<8x1xf32>
    %340 = vector.broadcast %339 : vector<8x1xf32> to vector<8x8xf32>
    %341 = arith.mulf %336, %340 : vector<8x8xf32>
    %342 = vector.extract_strided_slice %11 {offsets = [0, 24], sizes = [8, 8], strides = [1, 1]} : vector<8x32xf32> to vector<8x8xf32>
    %cst_87 = arith.constant dense<0.000000e+00> : vector<8xf32>
    %343 = vector.multi_reduction <add>, %342, %cst_87 [1] : vector<8x8xf32> to vector<8xf32>
    %344 = vector.shape_cast %343 : vector<8xf32> to vector<8x1xf32>
    %cst_88 = arith.constant 8.000000e+00 : f32
    %345 = vector.broadcast %cst_88 : f32 to vector<8x1xf32>
    %346 = arith.divf %344, %345 : vector<8x1xf32>
    %347 = vector.broadcast %346 : vector<8x1xf32> to vector<8x8xf32>
    %348 = arith.subf %342, %347 : vector<8x8xf32>
    %349 = vector.broadcast %346 : vector<8x1xf32> to vector<8x8xf32>
    %350 = arith.subf %342, %349 : vector<8x8xf32>
    %351 = arith.mulf %348, %350 : vector<8x8xf32>
    %cst_89 = arith.constant dense<0.000000e+00> : vector<8xf32>
    %352 = vector.multi_reduction <add>, %351, %cst_89 [1] : vector<8x8xf32> to vector<8xf32>
    %353 = vector.shape_cast %352 : vector<8xf32> to vector<8x1xf32>
    %cst_90 = arith.constant 8.000000e+00 : f32
    %354 = vector.broadcast %cst_90 : f32 to vector<8x1xf32>
    %355 = arith.divf %353, %354 : vector<8x1xf32>
    %356 = vector.broadcast %346 : vector<8x1xf32> to vector<8x8xf32>
    %357 = arith.subf %342, %356 : vector<8x8xf32>
    %cst_91 = arith.constant 9.99999974E-6 : f32
    %358 = vector.broadcast %cst_91 : f32 to vector<8x1xf32>
    %359 = arith.addf %355, %358 : vector<8x1xf32>
    %360 = math.rsqrt %359 : vector<8x1xf32>
    %361 = vector.broadcast %360 : vector<8x1xf32> to vector<8x8xf32>
    %362 = arith.mulf %357, %361 : vector<8x8xf32>
    %363 = arith.truncf %320 : vector<8x8xf32> to vector<8x8xbf16>
    %364 = arith.truncf %341 : vector<8x8xf32> to vector<8x8xbf16>
    %cst_92 = arith.constant dense<0.000000e+00> : vector<8x8xf32>
    %365 = tpu.matmul %363, %364, %cst_92 {dimension_numbers = #tpu.dot_dimension_numbers<[1], [1], [0], [0], [0, 0, 1, 0], [], []>} : vector<8x8xbf16>, vector<8x8xbf16>, vector<8x8xf32> -> vector<8x8xf32>
    %cst_93 = arith.constant 0.176776692 : f32
    %366 = vector.broadcast %cst_93 : f32 to vector<8x8xf32>
    %367 = arith.mulf %365, %366 : vector<8x8xf32>
    %368 = arith.addf %367, %26 : vector<8x8xf32>
    %369 = arith.mulf %368, %20 : vector<8x8xf32>
    %cst_94 = arith.constant dense<0xFF800000> : vector<8xf32>
    %370 = vector.multi_reduction <maximumf>, %369, %cst_94 [1] : vector<8x8xf32> to vector<8xf32>
    %371 = vector.shape_cast %370 : vector<8xf32> to vector<8x1xf32>
    %372 = vector.broadcast %371 : vector<8x1xf32> to vector<8x8xf32>
    %373 = arith.subf %369, %372 : vector<8x8xf32>
    %374 = math.exp %373 : vector<8x8xf32>
    %375 = arith.mulf %374, %20 : vector<8x8xf32>
    %cst_95 = arith.constant dense<0.000000e+00> : vector<8xf32>
    %376 = vector.multi_reduction <add>, %375, %cst_95 [1] : vector<8x8xf32> to vector<8xf32>
    %377 = vector.shape_cast %376 : vector<8xf32> to vector<8x1xf32>
    %cst_96 = arith.constant 0.000000e+00 : f32
    %378 = vector.broadcast %cst_96 : f32 to vector<8x1xf32>
    %379 = arith.cmpf oeq, %377, %378 : vector<8x1xf32>
    %380 = arith.extui %379 : vector<8x1xi1> to vector<8x1xi32>
    %381 = arith.sitofp %380 : vector<8x1xi32> to vector<8x1xf32>
    %382 = arith.addf %377, %381 : vector<8x1xf32>
    %cst_97 = arith.constant 9.99999968E-21 : f32
    %383 = vector.broadcast %cst_97 : f32 to vector<8x1xf32>
    %384 = arith.addf %382, %383 : vector<8x1xf32>
    %385 = tpu.reciprocal %384 {approx = true} : vector<8x1xf32> -> vector<8x1xf32>
    %386 = vector.broadcast %385 : vector<8x1xf32> to vector<8x8xf32>
    %387 = arith.mulf %375, %386 : vector<8x8xf32>
    %388 = arith.truncf %387 : vector<8x8xf32> to vector<8x8xbf16>
    %389 = arith.truncf %362 : vector<8x8xf32> to vector<8x8xbf16>
    %cst_98 = arith.constant dense<0.000000e+00> : vector<8x8xf32>
    %390 = tpu.matmul %388, %389, %cst_98 {dimension_numbers = #tpu.dot_dimension_numbers<[1], [0], [0], [1], [0, 0, 1, 1], [], []>} : vector<8x8xbf16>, vector<8x8xbf16>, vector<8x8xf32> -> vector<8x8xf32>
    %391 = tpu.concatenate %117, %208, %299, %390 in 1 : vector<8x8xf32>, vector<8x8xf32>, vector<8x8xf32>, vector<8x8xf32> -> vector<8x32xf32>
    %c0_99 = arith.constant 0 : index
    %c0_100 = arith.constant 0 : index
    %392 = vector.load %arg5[%c0_99, %c0_100] : memref<32x32xbf16, #tpu.memory_space<vmem>>, vector<32x32xbf16>
    %393 = arith.truncf %391 : vector<8x32xf32> to vector<8x32xbf16>
    %cst_101 = arith.constant dense<0.000000e+00> : vector<8x32xf32>
    %394 = tpu.matmul %393, %392, %cst_101 {dimension_numbers = #tpu.dot_dimension_numbers<[1], [0], [0], [1], [0, 0, 1, 1], [], []>} : vector<8x32xbf16>, vector<32x32xbf16>, vector<8x32xf32> -> vector<8x32xf32>
    %c0_102 = arith.constant 0 : index
    %c0_103 = arith.constant 0 : index
    %395 = vector.load %arg6[%c0_102, %c0_103] : memref<1x32xf32, #tpu.memory_space<vmem>>, vector<1x32xf32>
    %396 = vector.broadcast %395 : vector<1x32xf32> to vector<8x32xf32>
    %397 = arith.addf %394, %396 : vector<8x32xf32>
    %cst_104 = arith.constant dense<0.000000e+00> : vector<8xf32>
    %398 = vector.multi_reduction <add>, %397, %cst_104 [1] : vector<8x32xf32> to vector<8xf32>
    %399 = vector.shape_cast %398 : vector<8xf32> to vector<8x1xf32>
    %cst_105 = arith.constant 3.200000e+01 : f32
    %400 = vector.broadcast %cst_105 : f32 to vector<8x1xf32>
    %401 = arith.divf %399, %400 : vector<8x1xf32>
    %402 = vector.broadcast %401 : vector<8x1xf32> to vector<8x32xf32>
    %403 = arith.subf %397, %402 : vector<8x32xf32>
    %404 = vector.broadcast %401 : vector<8x1xf32> to vector<8x32xf32>
    %405 = arith.subf %397, %404 : vector<8x32xf32>
    %406 = arith.mulf %403, %405 : vector<8x32xf32>
    %cst_106 = arith.constant dense<0.000000e+00> : vector<8xf32>
    %407 = vector.multi_reduction <add>, %406, %cst_106 [1] : vector<8x32xf32> to vector<8xf32>
    %408 = vector.shape_cast %407 : vector<8xf32> to vector<8x1xf32>
    %cst_107 = arith.constant 3.200000e+01 : f32
    %409 = vector.broadcast %cst_107 : f32 to vector<8x1xf32>
    %410 = arith.divf %408, %409 : vector<8x1xf32>
    %411 = vector.broadcast %401 : vector<8x1xf32> to vector<8x32xf32>
    %412 = arith.subf %397, %411 : vector<8x32xf32>
    %cst_108 = arith.constant 9.99999974E-6 : f32
    %413 = vector.broadcast %cst_108 : f32 to vector<8x1xf32>
    %414 = arith.addf %410, %413 : vector<8x1xf32>
    %415 = math.rsqrt %414 : vector<8x1xf32>
    %416 = vector.broadcast %415 : vector<8x1xf32> to vector<8x32xf32>
    %417 = arith.mulf %412, %416 : vector<8x32xf32>
    %c0_109 = arith.constant 0 : index
    %c0_110 = arith.constant 0 : index
    %418 = vector.load %arg7[%c0_109, %c0_110] : memref<32x32xbf16, #tpu.memory_space<vmem>>, vector<32x32xbf16>
    %419 = arith.truncf %1 : vector<8x32xf32> to vector<8x32xbf16>
    %cst_111 = arith.constant dense<0.000000e+00> : vector<8x32xf32>
    %420 = tpu.matmul %419, %418, %cst_111 {dimension_numbers = #tpu.dot_dimension_numbers<[1], [0], [0], [1], [0, 0, 1, 1], [], []>} : vector<8x32xbf16>, vector<32x32xbf16>, vector<8x32xf32> -> vector<8x32xf32>
    %cst_112 = arith.constant dense<0.000000e+00> : vector<8xf32>
    %421 = vector.multi_reduction <add>, %420, %cst_112 [1] : vector<8x32xf32> to vector<8xf32>
    %422 = vector.shape_cast %421 : vector<8xf32> to vector<8x1xf32>
    %cst_113 = arith.constant 3.200000e+01 : f32
    %423 = vector.broadcast %cst_113 : f32 to vector<8x1xf32>
    %424 = arith.divf %422, %423 : vector<8x1xf32>
    %425 = vector.broadcast %424 : vector<8x1xf32> to vector<8x32xf32>
    %426 = arith.subf %420, %425 : vector<8x32xf32>
    %427 = vector.broadcast %424 : vector<8x1xf32> to vector<8x32xf32>
    %428 = arith.subf %420, %427 : vector<8x32xf32>
    %429 = arith.mulf %426, %428 : vector<8x32xf32>
    %cst_114 = arith.constant dense<0.000000e+00> : vector<8xf32>
    %430 = vector.multi_reduction <add>, %429, %cst_114 [1] : vector<8x32xf32> to vector<8xf32>
    %431 = vector.shape_cast %430 : vector<8xf32> to vector<8x1xf32>
    %cst_115 = arith.constant 3.200000e+01 : f32
    %432 = vector.broadcast %cst_115 : f32 to vector<8x1xf32>
    %433 = arith.divf %431, %432 : vector<8x1xf32>
    %434 = vector.broadcast %424 : vector<8x1xf32> to vector<8x32xf32>
    %435 = arith.subf %420, %434 : vector<8x32xf32>
    %cst_116 = arith.constant 9.99999974E-6 : f32
    %436 = vector.broadcast %cst_116 : f32 to vector<8x1xf32>
    %437 = arith.addf %433, %436 : vector<8x1xf32>
    %438 = math.rsqrt %437 : vector<8x1xf32>
    %439 = vector.broadcast %438 : vector<8x1xf32> to vector<8x32xf32>
    %440 = arith.mulf %435, %439 : vector<8x32xf32>
    %c0_117 = arith.constant 0 : index
    %c0_118 = arith.constant 0 : index
    %441 = vector.load %arg8[%c0_117, %c0_118] : memref<32x32xbf16, #tpu.memory_space<vmem>>, vector<32x32xbf16>
    %442 = arith.truncf %417 : vector<8x32xf32> to vector<8x32xbf16>
    %cst_119 = arith.constant dense<0.000000e+00> : vector<8x32xf32>
    %443 = tpu.matmul %442, %441, %cst_119 {dimension_numbers = #tpu.dot_dimension_numbers<[1], [0], [0], [1], [0, 0, 1, 1], [], []>} : vector<8x32xbf16>, vector<32x32xbf16>, vector<8x32xf32> -> vector<8x32xf32>
    %cst_120 = arith.constant dense<0.000000e+00> : vector<8xf32>
    %444 = vector.multi_reduction <add>, %443, %cst_120 [1] : vector<8x32xf32> to vector<8xf32>
    %445 = vector.shape_cast %444 : vector<8xf32> to vector<8x1xf32>
    %cst_121 = arith.constant 3.200000e+01 : f32
    %446 = vector.broadcast %cst_121 : f32 to vector<8x1xf32>
    %447 = arith.divf %445, %446 : vector<8x1xf32>
    %448 = vector.broadcast %447 : vector<8x1xf32> to vector<8x32xf32>
    %449 = arith.subf %443, %448 : vector<8x32xf32>
    %450 = vector.broadcast %447 : vector<8x1xf32> to vector<8x32xf32>
    %451 = arith.subf %443, %450 : vector<8x32xf32>
    %452 = arith.mulf %449, %451 : vector<8x32xf32>
    %cst_122 = arith.constant dense<0.000000e+00> : vector<8xf32>
    %453 = vector.multi_reduction <add>, %452, %cst_122 [1] : vector<8x32xf32> to vector<8xf32>
    %454 = vector.shape_cast %453 : vector<8xf32> to vector<8x1xf32>
    %cst_123 = arith.constant 3.200000e+01 : f32
    %455 = vector.broadcast %cst_123 : f32 to vector<8x1xf32>
    %456 = arith.divf %454, %455 : vector<8x1xf32>
    %457 = vector.broadcast %447 : vector<8x1xf32> to vector<8x32xf32>
    %458 = arith.subf %443, %457 : vector<8x32xf32>
    %cst_124 = arith.constant 9.99999974E-6 : f32
    %459 = vector.broadcast %cst_124 : f32 to vector<8x1xf32>
    %460 = arith.addf %456, %459 : vector<8x1xf32>
    %461 = math.rsqrt %460 : vector<8x1xf32>
    %462 = vector.broadcast %461 : vector<8x1xf32> to vector<8x32xf32>
    %463 = arith.mulf %458, %462 : vector<8x32xf32>
    %464 = arith.addf %440, %463 : vector<8x32xf32>
    %c0_125 = arith.constant 0 : index
    %c0_126 = arith.constant 0 : index
    %465 = vector.load %arg9[%c0_125, %c0_126] : memref<1x32xf32, #tpu.memory_space<vmem>>, vector<1x32xf32>
    %466 = vector.broadcast %465 : vector<1x32xf32> to vector<8x32xf32>
    %467 = arith.addf %464, %466 : vector<8x32xf32>
    %cst_127 = arith.constant 0.000000e+00 : f32
    %468 = vector.broadcast %cst_127 : f32 to vector<8x32xf32>
    %469 = arith.subf %468, %467 : vector<8x32xf32>
    %470 = math.exp %469 : vector<8x32xf32>
    %cst_128 = arith.constant 1.000000e+00 : f32
    %471 = vector.broadcast %cst_128 : f32 to vector<8x32xf32>
    %472 = arith.addf %471, %470 : vector<8x32xf32>
    %cst_129 = arith.constant 1.000000e+00 : f32
    %473 = vector.broadcast %cst_129 : f32 to vector<8x32xf32>
    %474 = arith.divf %473, %472 : vector<8x32xf32>
    %475 = arith.mulf %474, %440 : vector<8x32xf32>
    %cst_130 = arith.constant 1.000000e+00 : f32
    %476 = vector.broadcast %cst_130 : f32 to vector<8x32xf32>
    %477 = arith.subf %476, %474 : vector<8x32xf32>
    %478 = arith.mulf %477, %463 : vector<8x32xf32>
    %479 = arith.addf %475, %478 : vector<8x32xf32>
    %cst_131 = arith.constant dense<0.000000e+00> : vector<8xf32>
    %480 = vector.multi_reduction <add>, %479, %cst_131 [1] : vector<8x32xf32> to vector<8xf32>
    %481 = vector.shape_cast %480 : vector<8xf32> to vector<8x1xf32>
    %cst_132 = arith.constant 3.200000e+01 : f32
    %482 = vector.broadcast %cst_132 : f32 to vector<8x1xf32>
    %483 = arith.divf %481, %482 : vector<8x1xf32>
    %484 = vector.broadcast %483 : vector<8x1xf32> to vector<8x32xf32>
    %485 = arith.subf %479, %484 : vector<8x32xf32>
    %486 = vector.broadcast %483 : vector<8x1xf32> to vector<8x32xf32>
    %487 = arith.subf %479, %486 : vector<8x32xf32>
    %488 = arith.mulf %485, %487 : vector<8x32xf32>
    %cst_133 = arith.constant dense<0.000000e+00> : vector<8xf32>
    %489 = vector.multi_reduction <add>, %488, %cst_133 [1] : vector<8x32xf32> to vector<8xf32>
    %490 = vector.shape_cast %489 : vector<8xf32> to vector<8x1xf32>
    %cst_134 = arith.constant 3.200000e+01 : f32
    %491 = vector.broadcast %cst_134 : f32 to vector<8x1xf32>
    %492 = arith.divf %490, %491 : vector<8x1xf32>
    %493 = vector.broadcast %483 : vector<8x1xf32> to vector<8x32xf32>
    %494 = arith.subf %479, %493 : vector<8x32xf32>
    %cst_135 = arith.constant 9.99999974E-6 : f32
    %495 = vector.broadcast %cst_135 : f32 to vector<8x1xf32>
    %496 = arith.addf %492, %495 : vector<8x1xf32>
    %497 = math.rsqrt %496 : vector<8x1xf32>
    %498 = vector.broadcast %497 : vector<8x1xf32> to vector<8x32xf32>
    %499 = arith.mulf %494, %498 : vector<8x32xf32>
    %c0_136 = arith.constant 0 : index
    %c0_137 = arith.constant 0 : index
    %500 = vector.load %arg10[%c0_136, %c0_137] : memref<32x64xbf16, #tpu.memory_space<vmem>>, vector<32x64xbf16>
    %501 = arith.truncf %499 : vector<8x32xf32> to vector<8x32xbf16>
    %cst_138 = arith.constant dense<0.000000e+00> : vector<8x64xf32>
    %502 = tpu.matmul %501, %500, %cst_138 {dimension_numbers = #tpu.dot_dimension_numbers<[1], [0], [0], [1], [0, 0, 1, 1], [], []>} : vector<8x32xbf16>, vector<32x64xbf16>, vector<8x64xf32> -> vector<8x64xf32>
    %c0_139 = arith.constant 0 : index
    %c0_140 = arith.constant 0 : index
    %503 = vector.load %arg11[%c0_139, %c0_140] : memref<1x64xf32, #tpu.memory_space<vmem>>, vector<1x64xf32>
    %504 = vector.broadcast %503 : vector<1x64xf32> to vector<8x64xf32>
    %505 = arith.addf %502, %504 : vector<8x64xf32>
    %cst_141 = arith.constant 0.000000e+00 : f32
    %506 = vector.broadcast %cst_141 : f32 to vector<8x64xf32>
    %507 = arith.maximumf %505, %506 : vector<8x64xf32>
    %c0_142 = arith.constant 0 : index
    %c0_143 = arith.constant 0 : index
    %508 = vector.load %arg12[%c0_142, %c0_143] : memref<64x32xbf16, #tpu.memory_space<vmem>>, vector<64x32xbf16>
    %509 = arith.truncf %507 : vector<8x64xf32> to vector<8x64xbf16>
    %cst_144 = arith.constant dense<0.000000e+00> : vector<8x32xf32>
    %510 = tpu.matmul %509, %508, %cst_144 {dimension_numbers = #tpu.dot_dimension_numbers<[1], [0], [0], [1], [0, 0, 1, 1], [], []>} : vector<8x64xbf16>, vector<64x32xbf16>, vector<8x32xf32> -> vector<8x32xf32>
    %c0_145 = arith.constant 0 : index
    %c0_146 = arith.constant 0 : index
    %511 = vector.load %arg13[%c0_145, %c0_146] : memref<1x32xf32, #tpu.memory_space<vmem>>, vector<1x32xf32>
    %512 = vector.broadcast %511 : vector<1x32xf32> to vector<8x32xf32>
    %513 = arith.addf %510, %512 : vector<8x32xf32>
    %514 = arith.addf %513, %499 : vector<8x32xf32>
    %cst_147 = arith.constant dense<0.000000e+00> : vector<8xf32>
    %515 = vector.multi_reduction <add>, %514, %cst_147 [1] : vector<8x32xf32> to vector<8xf32>
    %516 = vector.shape_cast %515 : vector<8xf32> to vector<8x1xf32>
    %cst_148 = arith.constant 3.200000e+01 : f32
    %517 = vector.broadcast %cst_148 : f32 to vector<8x1xf32>
    %518 = arith.divf %516, %517 : vector<8x1xf32>
    %519 = vector.broadcast %518 : vector<8x1xf32> to vector<8x32xf32>
    %520 = arith.subf %514, %519 : vector<8x32xf32>
    %521 = vector.broadcast %518 : vector<8x1xf32> to vector<8x32xf32>
    %522 = arith.subf %514, %521 : vector<8x32xf32>
    %523 = arith.mulf %520, %522 : vector<8x32xf32>
    %cst_149 = arith.constant dense<0.000000e+00> : vector<8xf32>
    %524 = vector.multi_reduction <add>, %523, %cst_149 [1] : vector<8x32xf32> to vector<8xf32>
    %525 = vector.shape_cast %524 : vector<8xf32> to vector<8x1xf32>
    %cst_150 = arith.constant 3.200000e+01 : f32
    %526 = vector.broadcast %cst_150 : f32 to vector<8x1xf32>
    %527 = arith.divf %525, %526 : vector<8x1xf32>
    %528 = vector.broadcast %518 : vector<8x1xf32> to vector<8x32xf32>
    %529 = arith.subf %514, %528 : vector<8x32xf32>
    %cst_151 = arith.constant 9.99999974E-6 : f32
    %530 = vector.broadcast %cst_151 : f32 to vector<8x1xf32>
    %531 = arith.addf %527, %530 : vector<8x1xf32>
    %532 = math.rsqrt %531 : vector<8x1xf32>
    %533 = vector.broadcast %532 : vector<8x1xf32> to vector<8x32xf32>
    %534 = arith.mulf %529, %533 : vector<8x32xf32>
    %c0_152 = arith.constant 0 : index
    %c0_153 = arith.constant 0 : index
    %c0_154 = arith.constant 0 : index
    %535 = vector.load %arg14[%c0_152, %c0_153, %c0_154] : memref<1x8x32xf32, #tpu.memory_space<vmem>>, vector<1x8x32xf32>
    %536 = vector.shape_cast %535 : vector<1x8x32xf32> to vector<8x32xf32>
    %537 = vector.shape_cast %534 : vector<8x32xf32> to vector<1x8x32xf32>
    tpu.vector_store %arg14[%c0_152, %c0_153, %c0_154], %537 {strides = array<i32>} : memref<1x8x32xf32, #tpu.memory_space<vmem>>, vector<1x8x32xf32>,
    return
  }
  func.func @transform_0(%arg0: i32) -> (i32, i32, i32) {
    %c0_i32 = arith.constant 0 : i32
    %c0_i32_0 = arith.constant 0 : i32
    %c0_i32_1 = arith.constant 0 : i32
    return %arg0, %c0_i32, %c0_i32_0 : i32, i32, i32
  }
  func.func @transform_1(%arg0: i32) -> (i32, i32, i32) {
    %c0_i32 = arith.constant 0 : i32
    %c0_i32_0 = arith.constant 0 : i32
    %c0_i32_1 = arith.constant 0 : i32
    return %arg0, %c0_i32, %c0_i32_0 : i32, i32, i32
  }
  func.func @transform_2(%arg0: i32) -> (i32, i32, i32) {
    %c0_i32 = arith.constant 0 : i32
    %c0_i32_0 = arith.constant 0 : i32
    %c0_i32_1 = arith.constant 0 : i32
    return %arg0, %c0_i32, %c0_i32_0 : i32, i32, i32
  }
  func.func @transform_3(%arg0: i32) -> (i32, i32) {
    %c0_i32 = arith.constant 0 : i32
    %c0_i32_0 = arith.constant 0 : i32
    %c0_i32_1 = arith.constant 0 : i32
    return %c0_i32, %c0_i32_0 : i32, i32
  }
  func.func @transform_4(%arg0: i32) -> (i32, i32) {
    %c0_i32 = arith.constant 0 : i32
    %c0_i32_0 = arith.constant 0 : i32
    %c0_i32_1 = arith.constant 0 : i32
    return %c0_i32, %c0_i32_0 : i32, i32
  }
  func.func @transform_5(%arg0: i32) -> (i32, i32) {
    %c0_i32 = arith.constant 0 : i32
    %c0_i32_0 = arith.constant 0 : i32
    %c0_i32_1 = arith.constant 0 : i32
    return %c0_i32, %c0_i32_0 : i32, i32
  }
  func.func @transform_6(%arg0: i32) -> (i32, i32) {
    %c0_i32 = arith.constant 0 : i32
    %c0_i32_0 = arith.constant 0 : i32
    %c0_i32_1 = arith.constant 0 : i32
    return %c0_i32, %c0_i32_0 : i32, i32
  }
  func.func @transform_7(%arg0: i32) -> (i32, i32) {
    %c0_i32 = arith.constant 0 : i32
    %c0_i32_0 = arith.constant 0 : i32
    %c0_i32_1 = arith.constant 0 : i32
    return %c0_i32, %c0_i32_0 : i32, i32
  }
  func.func @transform_8(%arg0: i32) -> (i32, i32) {
    %c0_i32 = arith.constant 0 : i32
    %c0_i32_0 = arith.constant 0 : i32
    %c0_i32_1 = arith.constant 0 : i32
    return %c0_i32, %c0_i32_0 : i32, i32
  }
  func.func @transform_9(%arg0: i32) -> (i32, i32) {
    %c0_i32 = arith.constant 0 : i32
    %c0_i32_0 = arith.constant 0 : i32
    %c0_i32_1 = arith.constant 0 : i32
    return %c0_i32, %c0_i32_0 : i32, i32
  }
  func.func @transform_10(%arg0: i32) -> (i32, i32) {
    %c0_i32 = arith.constant 0 : i32
    %c0_i32_0 = arith.constant 0 : i32
    %c0_i32_1 = arith.constant 0 : i32
    return %c0_i32, %c0_i32_0 : i32, i32
  }
  func.func @transform_11(%arg0: i32) -> (i32, i32) {
    %c0_i32 = arith.constant 0 : i32
    %c0_i32_0 = arith.constant 0 : i32
    %c0_i32_1 = arith.constant 0 : i32
    return %c0_i32, %c0_i32_0 : i32, i32
  }
  func.func @transform_12(%arg0: i32) -> (i32, i32) {
    %c0_i32 = arith.constant 0 : i32
    %c0_i32_0 = arith.constant 0 : i32
    %c0_i32_1 = arith.constant 0 : i32
    return %c0_i32, %c0_i32_0 : i32, i32
  }
  func.func @transform_13(%arg0: i32) -> (i32, i32, i32) {
    %c0_i32 = arith.constant 0 : i32
    %c0_i32_0 = arith.constant 0 : i32
    %c0_i32_1 = arith.constant 0 : i32
    return %arg0, %c0_i32, %c0_i32_0 : i32, i32, i32
  }
}

</mosaic_0001>

<bundles_post_ra>
// kernel: sentence_encoder.5
= control target key start
LH: loop header
LB: loop body
LE: loop exit
PB: predicated region body
PF: predicated region fallthrough
CT: control target
= control target key end

     0   :  { %11 = vsyncpa [#allocation3], 0  ;;  %s990_s0 = inlined_call_operand.vmem [shape: f32[2,8,64], index: 0, kind: input, shape index: {}]   ;;  %s991_s1 = inlined_call_operand.vmem [shape: f32[2,8,1], index: 1, kind: input, shape index: {}]   ;;  %s992_s2 = inlined_call_operand.vmem [shape: bf16[64,64], index: 2, kind: input, shape index: {}]   ;;  %s993_s3 = inlined_call_operand.vmem [shape: f32[1,64], index: 3, kind: input, shape index: {}]   ;;  %s994_s4 = inlined_call_operand.vmem [shape: bf16[64,64], index: 4, kind: input, shape index: {}]   ;;  %s995_s5 = inlined_call_operand.vmem [shape: f32[1,64], index: 5, kind: input, shape index: {}]   ;;  %s996_s6 = inlined_call_operand.hbm [shape: f32[2,1,128], index: 6, kind: output, shape index: {}]  }
   0x1   :  { %13 = vsyncpa [#allocation3 + $0x1], 0  ;;  %s822_s21 = smov 0   ;;  %s824_s22 = smov 0  }
   0x2   :  { %s826_s23 = smov 0   ;;  %s828_s24 = smov 0  }
   0x3 LB: > { %s843_s25 = sadd.s32 4294967295, %s780_s24   ;;  %s599_s26 = sadd.s32 4294967294, %s780_s24   ;;  %s780_s24 = sphi %s828_s24, %s1002_s24   ;;  %s776_s23 = sphi %s826_s23, %s1001_s23   ;;  %s772_s22 = sphi %s824_s22, %s1000_s22   ;;  %s768_s21 = sphi %s822_s21, %s999_s21  }
   0x4   : > { %s847_s27 = sadd.s32 1, %s780_s24   ;;  %s162_s28 = sadd.s32 1, %s776_s23 }
   0x5   : > { %s159_s29 = ssub.s32 %s780_s24, %s847_s27  ;;  %p172_p0 = scmp.ne.s32.totalorder %s776_s23, %s772_s22 }
   0x6   : > { %p160_p1 = scmp.eq.s32.totalorder %s159_s29, 0  ;;  %p173_p2 = scmp.eq.s32.totalorder %s843_s25, 1 }
   0x7   : > { %p178_p3 = scmp.ne.s32.totalorder %s772_s22, %s768_s21  ;;  %p179_p4 = scmp.eq.s32.totalorder %s599_s26, 1 }
   0x8   : > { %s858_s30 = scalar_select %p160_p1, %s776_s23, %s162_s28  }
   0x9   : > { %p860_p5 = por %p173_p2, %p172_p0  ;;  %p864_p6 = por %p179_p4, %p178_p3 }
   0xa   : > { %p602_p7 = scmp.ge.s32.totalorder %s780_s24, 1  ;;  %p223_p8 = scmp.lt.s32.totalorder %s780_s24, 3 }
   0xc   : > { %p224_p9 = pnand %p602_p7, %p223_p8 }
   0xd   : > { %v700_v0 = vld [vmem:[%s992_s2] sm:$0xff] (!%p224_p9)   ;;  %v782_v1 = vmov (!%p224_p9), 0.0   ;;  %v701_v2 = vld [vmem:[%s992_s2 + $0x8] sm:$0xff] (!%p224_p9)   ;;  %vm783_vm0 = vmmov (!%p224_p9), 0   ;;  %p255_p10 = scmp.lt.s32.totalorder (!%p224_p9), %s843_s25, 1  ;;  %v702_v3 = vld [vmem:[%s992_s2 + $0x10] sm:$0xff] (!%p224_p9)  }
   0xe   : > { %227 = sbr.rel (%p224_p9) target bundleno = 1190 (0x4a6), region = 44  ;;  %632 = vmatprep.subr.bf16.mxu0 (!%p224_p9), %v782_v1  ;;  %644 = vmatprep.subr.bf16.mxu1 (!%p224_p9), %v782_v1  ;;  %v703_v4 = vld [vmem:[%s992_s2 + $0x18] sm:$0xff] (!%p224_p9)   ;;  %vm306_vm1 = vcmask (!%p224_p9), 523264   ;;  %v605_v7 = vld [vmem:[%s993_s3] ss:$0 sm:$0xff] (!%p224_p9)  ;;  %v705_v20 = vld [vmem:[%s994_s4 + $0x8] sm:$0xff] (!%p224_p9)  }
   0xf   : > { %633 = vmatpush3.bf16.msra.mxu0 (!%p224_p9), %v700_v0  ;;  %640 = vmatprep.mubr.msk.bf16.mxu0 (!%p224_p9), %vm783_vm0, %v782_v1  ;;  %v704_v19 = vld [vmem:[%s994_s4] sm:$0xff] (!%p224_p9)   ;;  %v706_v21 = vld [vmem:[%s994_s4 + $0x10] sm:$0xff] (!%p224_p9)   ;;  %v707_v22 = vld [vmem:[%s994_s4 + $0x18] sm:$0xff] (!%p224_p9)   ;;  %v784_v34 = vmov (!%p224_p9), 0   ;;  %s619_s9 = sshll.u32 (!%p224_p9), %s843_s25, 4 }
  0x10   : > { %634 = vmatprep.subr.bf16.mxu0 (!%p224_p9), %v782_v1  ;;  %652 = vmatprep.mubr.msk.bf16.mxu1 (!%p224_p9), %vm783_vm0, %v782_v1  ;;  %v612_v36 = vld [vmem:[%s995_s5] ss:$0 sm:$0xff] (!%p224_p9)  ;;  %s947_s15 = scalar_lea.hbm (!%p224_p9), %s996_s6, %s619_s9 }
  0x11   : > { %645 = vmatpush3.bf16.msra.mxu1 (!%p224_p9), %v704_v19  ;;  %699 = vset.pattern.permute.xlu0 (!%p224_p9), %v784_v34 }
  0x12   : > { %646 = vmatprep.subr.bf16.mxu1 (!%p224_p9), %v782_v1 }
  0x13   : > { %635 = vmatpush3.bf16.msra.mxu0 (!%p224_p9), %v701_v2 }
  0x14   : > { %636 = vmatprep.subr.bf16.mxu0 (!%p224_p9), %v782_v1 }
  0x15   : > { %s883_s13 = scalar_select %p255_p10, %s843_s25, 1  ;;  %647 = vmatpush3.bf16.msra.mxu1 %v705_v20 }
  0x16   : > { %648 = vmatprep.subr.bf16.mxu1 %v782_v1  ;;  %s786_s25 = smov [#allocation2]  }
  0x17   : > { %s603_s16 = sshll.u32 %s883_s13, 3  ;;  %637 = vmatpush3.bf16.msra.mxu0 %v702_v3  ;;  %s785_s13 = smov 64  }
  0x18   : > { %s258_s19 = scalar_lea.vmem %s990_s0, %s603_s16  ;;  %638 = vmatprep.subr.bf16.mxu0 %v782_v1  ;;  %s262_s26 = scalar_lea.vmem %s991_s1, %s603_s16 }
  0x19   : > { %v898_v5 = vld [vmem:[%s258_s19] sm:$0xff]  ;;  %649 = vmatpush3.bf16.msra.mxu1 %v706_v21  ;;  %s253_s16 = sand.u32 1, %s772_s22   ;;  %s722_s19 = sshll.u32 %s786_s25, 4  ;;  %s723_s19 = int_to_ptr.vmem [resolvable:$false] %s722_s19 }
  0x1a   : > { %v274_v6 = vpack.c.bf16 %v898_v5, %v898_v5  ;;  %650 = vmatprep.subr.bf16.mxu1 %v782_v1  ;;  %v265_v35 = vld [vmem:[%s262_s26] sm:$0xff]  ;;  %s254_s10 = scalar_lea.vmem [#allocation2], %s253_s16  ;;  %s520_s17 = scalar_lea.sflag [#allocation3], %s253_s16 }
  0x1b   : > { %639 = vmatpush3.bf16.msra.mxu0 %v703_v4  ;;  %s532_s11 = sshll.u32 %s254_s10, 4  ;;  %s724_s20 = scalar_lea.vmem %s723_s19, 32  ;;  %s949_s11 = int_to_ptr.vmem [resolvable:$true] %s532_s11 }
  0x1c   : > { %s718_s18 = scalar_lea.vmem %s949_s11, 16  ;;  %p725_p0 = scmp.lt.s32.totalorder %s949_s11, %s723_s19 }
  0x1d   : > { %651 = vmatpush3.bf16.msra.mxu1 %v707_v22  ;;  %p719_p11 = scmp.ne.s32.totalorder %s949_s11, %s718_s18  ;;  %p726_p1 = scmp.lt.s32.totalorder %s724_s20, %s718_s18 }
  0x1e   : > { %641 = vmatmul.mubr.msk.bf16.vlgmr.msra.gmra.mrb[0].mxu0 %vm306_vm1, %v274_v6 }
  0x1f   : > { %p720_p12 = pnand %p719_p11, %p860_p5  ;;  %p727_p2 = por %p726_p1, %p725_p0 }
  0x21   : > { %p721_p13 = pneg %p720_p12 }
  0x23   : > { %p728_p3 = pnand %p727_p2, %p721_p13 }
  0xf1   : > { %v344_v8 = vpop.f32.mrb[0].mxu0 }
  0xf2   : > { %v345_v9 = vadd.f32 %v605_v7, %v344_v8  ;;  %v642_v10 = vpop.f32.mrb[1].mxu0 }
  0xf3   : > { %v347_v11 = vpop.f32.mrb[2].mxu0 }
  0xf4   : > { %v643_v12 = vpop.f32.mrb[3].mxu0  ;;  %v350_v13 = vsel %vm306_vm1, %v345_v9, 0.0 }
  0xf5   : > { %351 = vadd.xlane.f32.xlu0 %v350_v13 }
 0x182   : > { %v352_v14 = vpop.xlane.xlu0 %351 }
 0x183   : > { %v354_v15 = vmul.f32 0.015625, %v352_v14 }
 0x185   : > { %v355_v16 = vsub.f32 %v345_v9, %v354_v15 }
 0x187   : > { %v356_v17 = vmul.f32 %v355_v16, %v355_v16 }
 0x189   : > { %v357_v18 = vsel %vm306_vm1, %v356_v17, 0.0 }
 0x18a   : > { %358 = vadd.xlane.f32.xlu0 %v357_v18 }
 0x1a0   : > { %468 = vperm.xlu0 %699, %v265_v35  }
 0x217   : > { %v359_v23 = vpop.xlane.xlu0 %358 }
 0x218   : > { %v360_v24 = vmul.f32 0.015625, %v359_v23 }
 0x21a   : > { %v361_v25 = vadd.f32 1e-05, %v360_v24 }
 0x21c   : > { %708 = vrsqrt.f32 %v361_v25 }
 0x21f   : > { %v469_v43 = vpop.permute.xlu0 %468 }
 0x220   : > { %v505_v44 = vmul.f32 %v469_v43, %v898_v5 }
 0x222   : > { %v506_v45 = vsel %vm306_vm1, %v505_v44, -inf }
 0x223   : > { %v507_v48 = vrot.slane %v506_v45, 4 }
 0x225   : > { %v508_v51 = vmax.f32 %v506_v45, %v507_v48 }
 0x226   : > { %v709_v26 = vpop.eup %708 }
 0x227   : > { %v363_v27 = vmul.f32 %v709_v26, %v355_v16  ;;  %v509_v53 = vrot.slane %v508_v51, 2 }
 0x229   : > { %v365_v28 = vmin.f32 %v363_v27, 0.0  ;;  %vm364_vm2 = vcmp.gt.f32.partialorder %v363_v27, 0.0  ;;  %v510_v54 = vmax.f32 %v508_v51, %v509_v53 }
 0x22b   : > { %v366_v29 = vmul.f32 1.442695, %v365_v28  ;;  %v511_v55 = vrot.slane %v510_v54, 1 }
 0x22d   : > { %710 = vpow2.f32 %v366_v29  ;;  %v512_v56 = vmax.f32 %v510_v54, %v511_v55 }
 0x237   : > { %v711_v30 = vpop.eup %710 }
 0x238   : > { %v611_v31 = vadd.f32 -1.0, %v711_v30 }
 0x23a   : > { %v369_v32 = vsel %vm364_vm2, %v363_v27, %v611_v31 }
 0x23b   : > { %v378_v33 = vpack.c.bf16 %v369_v32, %v369_v32 }
 0x23d   : > { %653 = vmatmul.mubr.msk.bf16.vlgmr.msra.gmra.mrb[0].mxu1 %vm306_vm1, %v378_v33 }
 0x310   : > { %v447_v37 = vpop.f32.mrb[0].mxu1 }
 0x311   : > { %v448_v38 = vadd.f32 %v612_v36, %v447_v37  ;;  %v654_v39 = vpop.f32.mrb[1].mxu1 }
 0x312   : > { %v450_v40 = vpop.f32.mrb[2].mxu1 }
 0x313   : > { %v655_v41 = vpop.f32.mrb[3].mxu1  ;;  %v453_v42 = vsel %vm306_vm1, %v448_v38, 0.0 }
 0x314   : > { %454 = vadd.xlane.f32.xlu1 %v453_v42 }
 0x3a1   : > { %v455_v46 = vpop.xlane.xlu1 %454 }
 0x3a2   : > { %v456_v47 = vmul.f32 0.015625, %v455_v46 }
 0x3a4   : > { %v457_v49 = vsub.f32 %v448_v38, %v456_v47 }
 0x3a6   : > { %v458_v50 = vmul.f32 %v457_v49, %v457_v49 }
 0x3a8   : > { %v459_v52 = vsel %vm306_vm1, %v458_v50, 0.0 }
 0x3a9   : > { %460 = vadd.xlane.f32.xlu1 %v459_v52 }
 0x3ba   : > { %514 = vrot.lane.b32.xlu1 %v512_v56, %s785_s13 }
 0x436   : > { %v461_v57 = vpop.xlane.xlu1 %460 }
 0x437   : > { %v462_v58 = vmul.f32 0.015625, %v461_v57 }
 0x439   : > { %v463_v59 = vadd.f32 1e-05, %v462_v58 }
 0x43a   : > { %v515_v31 = vpop.permute.xlu1 %514 }
 0x43b   : > { %712 = vrsqrt.f32 %v463_v59 }
 0x445   : > { %v713_v60 = vpop.eup %712 }
 0x446   : > { %v465_v61 = vmul.f32 %v713_v60, %v457_v49 }
 0x448   : > { %v471_v62 = vmul.f32 %v469_v43, %v465_v61 }
 0x44a   : > { %v472_v63 = vsel %vm306_vm1, %v471_v62, -inf }
 0x44b   : > { %v473_v0 = vrot.slane %v472_v63, 4 }
 0x44d   : > { %v474_v2 = vmax.f32 %v472_v63, %v473_v0 }
 0x44f   : > { %v475_v3 = vrot.slane %v474_v2, 2 }
 0x451   : > { %v476_v4 = vmax.f32 %v474_v2, %v475_v3 }
 0x453   : > { %v477_v6 = vrot.slane %v476_v4, 1 }
 0x455   : > { %v478_v7 = vmax.f32 %v476_v4, %v477_v6 }
 0x457   : > { %v479_v8 = vsub.f32 %v471_v62, %v478_v7 }
 0x459   : > { %v480_v9 = vmul.f32 1.442695, %v479_v8 }
 0x45b   : > { %714 = vpow2.f32 %v480_v9 }
 0x465   : > { %v715_v10 = vpop.eup %714 }
 0x466   : > { %v482_v11 = vmul.f32 %v715_v10, %v469_v43 }
 0x468   : > { %v483_v12 = vsel %vm306_vm1, %v482_v11, 0.0 }
 0x469   : > { %v484_v13 = vrot.slane %v483_v12, 4 }
 0x46b   : > { %v485_v14 = vadd.f32 %v484_v13, %v483_v12 }
 0x46d   : > { %v486_v15 = vrot.slane %v485_v14, 2 }
 0x46f   : > { %v487_v16 = vadd.f32 %v486_v15, %v485_v14 }
 0x471   : > { %v488_v17 = vrot.slane %v487_v16, 1 }
 0x473   : > { %v489_v18 = vadd.f32 %v488_v17, %v487_v16 }
 0x475   : > { %vm490_vm3 = vcmp.eq.f32.partialorder %v489_v18, 0.0 }
 0x476   : > { %v618_v19 = vsel %vm490_vm3, 1.0, %v782_v1 }
 0x477   : > { %v493_v20 = vadd.f32 %v618_v19, %v489_v18 }
 0x479   : > { %v494_v21 = vadd.f32 1e-20, %v493_v20 }
 0x47b   : > { %716 = vrcp.f32 %v494_v21 }
 0x485   : > { %v717_v22 = vpop.eup %716 }
 0x486   : > { %v496_v23 = vmul.f32 %v717_v22, %v482_v11 }
 0x488   : > { %v497_v24 = vmul.f32 %v496_v23, %v898_v5 }
 0x48a   : > { %v498_v25 = vsel %vm306_vm1, %v497_v24, 0.0 }
 0x48b   : > { %v499_v26 = vrot.slane %v498_v25, 4 }
 0x48d   : > { %v500_v27 = vadd.f32 %v499_v26, %v498_v25 }
 0x48f   : > { %v501_v28 = vrot.slane %v500_v27, 2 }
 0x491   : > { %v502_v29 = vadd.f32 %v501_v28, %v500_v27 }
 0x493   : > { %v503_v30 = vrot.slane %v502_v29, 1 }
 0x495   : > { %v504_v1 = vadd.f32 %v503_v30, %v502_v29 }
 0x497   : > { %v517_v5 = vsel %vm306_vm1, %v504_v1, %v515_v31 }
 0x498   : > { %518 = vst [vmem:[%s254_s10] sm:$0x1] %v517_v5 }
 0x499   : > { %731 = shalt.err (!%p728_p3)
}
 0x49a   : > { %s732_s26 = scalar_lea.hbm %s947_s15, 16  ;;  %s736_s13 = scalar_lea.hbm %s996_s6, 32 }
 0x49b   : > { %p733_p4 = scmp.ne.s32.totalorder %s947_s15, %s732_s26  ;;  %p737_p9 = scmp.lt.u32.totalorder %s947_s15, %s996_s6 }
 0x49c   : > { %p738_p10 = scmp.lt.u32.totalorder %s736_s13, %s732_s26  ;;  %p740_p12 = scmp.lt.u32.totalorder %s732_s26, %s947_s15 }
 0x49d   : > { %p734_p7 = pnand %p733_p4, %p860_p5 }
 0x49e   : > { %p739_p11 = por %p738_p10, %p737_p9 }
 0x49f   : > { %p735_p8 = pneg %p734_p7 }
 0x4a0   : > { %p741_p13 = por %p740_p12, %p739_p11 }
 0x4a2   : > { %p742_p0 = pnand %p741_p13, %p735_p8 }
 0x4a4   : > { %745 = shalt.err (!%p742_p0)
}
 0x4a5   : > { %656 = dma.vmem_to_hbm [thread:$0]  (%p860_p5), %s949_s11, 16, %s947_s15, %s520_s17  }
 0x4a6 PF: > { %p662_p1 = scmp.ge.s32.totalorder %s780_s24, 2  ;;  %s544_s10 = sand.u32 1, %s768_s21  }
 0x4a7   : > { %s545_s12 = scalar_lea.sflag [#allocation3], %s544_s10 }
 0x4a8   : > { %p659_p2 = pnand %p662_p1, %p864_p6 }
 0x4aa   : > { %763 = dma.done.wait (!%p659_p2), %s545_s12, 16  }
 0x4ab   : > { %765 = vsyncadd (!%p659_p2), %s545_s12, 4294967280  ;;  %p16_p3 = scmp.ge.s32.totalorder %s847_s27, 4   ;;  %s999_s21 = smov %s772_s22 }
 0x4ac   : > { %s1000_s22 = smov %s776_s23  ;;  %s1001_s23 = smov %s858_s30 }
 0x4ad   : > { %s1002_s24 = smov %s847_s27  ;;  %18 = sbr.rel (!%p16_p3) target bundleno = 3 (0x3), region = 82 }
 0x4b4   :  { %549 = vsyncpa [#allocation3], 1 }
 0x4b5   :  { %551 = vsyncpa [#allocation3 + $0x1], 1 }

// kernel: sentence_encoder.3
= control target key start
LH: loop header
LB: loop body
LE: loop exit
PB: predicated region body
PF: predicated region fallthrough
CT: control target
= control target key end

     0   :  { %s2177_s25 = smov 0   ;;  %s2532_s0 = inlined_call_operand.vmem [shape: f32[2,8,32], index: 0, kind: input, shape index: {}]   ;;  %s2533_s1 = inlined_call_operand.vmem [shape: f32[2,8,1], index: 1, kind: input, shape index: {}]   ;;  %s2534_s2 = inlined_call_operand.vmem [shape: f32[2,1,8], index: 2, kind: input, shape index: {}]   ;;  %s2535_s3 = inlined_call_operand.vmem [shape: bf16[32,96], index: 3, kind: input, shape index: {}]   ;;  %s2536_s4 = inlined_call_operand.vmem [shape: bf16[32,32], index: 4, kind: input, shape index: {}]   ;;  %s2537_s5 = inlined_call_operand.vmem [shape: f32[1,32], index: 5, kind: input, shape index: {}]   ;;  %s2538_s6 = inlined_call_operand.vmem [shape: bf16[32,32], index: 6, kind: input, shape index: {}]   ;;  %s2539_s7 = inlined_call_operand.vmem [shape: bf16[32,32], index: 7, kind: input, shape index: {}]   ;;  %s2540_s8 = inlined_call_operand.vmem [shape: f32[1,32], index: 8, kind: input, shape index: {}]   ;;  %s2541_s9 = inlined_call_operand.vmem [shape: bf16[32,64], index: 9, kind: input, shape index: {}]   ;;  %s2542_s10 = inlined_call_operand.vmem [shape: f32[1,64], index: 10, kind: input, shape index: {}]   ;;  %s2543_s11 = inlined_call_operand.vmem [shape: bf16[64,32], index: 11, kind: input, shape index: {}]   ;;  %s2544_s12 = inlined_call_operand.vmem [shape: f32[1,32], index: 12, kind: input, shape index: {}]   ;;  %s2545_s13 = inlined_call_operand.vmem [shape: f32[2,8,32], index: 13, kind: output, shape index: {}]  }
   0x1 LB: > { %s1804_s26 = sadd.s32 4294967295, %s2088_s25   ;;  %p1808_p0 = scmp.ge.s32.totalorder %s2088_s25, 1  ;;  %s2088_s25 = sphi %s2177_s25, %s23_s25  }
   0x2   : > { %p403_p1 = scmp.lt.s32.totalorder %s2088_s25, 3 }
   0x4   : > { %p404_p2 = pnand %p1808_p0, %p403_p1 }
   0x5   : > { %v2014_v0 = vld [vmem:[%s2535_s3] sm:$0xff] (!%p404_p2)   ;;  %v2090_v1 = vmov (!%p404_p2), 0.0   ;;  %v2015_v2 = vld [vmem:[%s2535_s3 + $0x8] sm:$0xff] (!%p404_p2)   ;;  %vm2091_vm0 = vmmov (!%p404_p2), 0   ;;  %p452_p3 = scmp.lt.s32.totalorder (!%p404_p2), %s1804_s26, 1  ;;  %vm488_vm1 = vcmask (!%p404_p2), 261120  }
   0x6   : > { %407 = sbr.rel (%p404_p2) target bundleno = 4009 (0xfa9), region = 72  ;;  %1888 = vmatprep.subr.bf16.mxu0 (!%p404_p2), %v2090_v1  ;;  %1896 = vmatprep.subr.bf16.mxu1 (!%p404_p2), %v2090_v1  ;;  %s2092_s18 = smov (!%p404_p2), 120   ;;  %vm557_vm2 = vcmask (!%p404_p2), 64512   ;;  %vm692_vm6 = vcmask (!%p404_p2), 1043456   ;;  %vm1304_vm9 = vcmask (!%p404_p2), 130048   ;;  %vm1306_vm10 = vcmask (!%p404_p2), 195584  }
   0x7   : > { %1889 = vmatpush3.bf16.msra.mxu0 (!%p404_p2), %v2014_v0  ;;  %1892 = vmatprep.mubr.msk.bf16.mxu0 (!%p404_p2), %vm2091_vm0, %v2090_v1  ;;  %s2093_s19 = smov (!%p404_p2), 96   ;;  %s2094_s20 = smov (!%p404_p2), 80   ;;  %vm1671_vm11 = vcmask (!%p404_p2), 523264  }
   0x8   : > { %1890 = vmatprep.subr.bf16.mxu0 (!%p404_p2), %v2090_v1  ;;  %1898 = vmatprep.mubr.msk.bf16.mxu1 (!%p404_p2), %vm2091_vm0, %v2090_v1  ;;  %s2095_s21 = smov (!%p404_p2), 88   ;;  %s2096_s22 = smov (!%p404_p2), 72  }
   0x9   : > { %s2097_s23 = smov (!%p404_p2), 112   ;;  %s2098_s24 = smov (!%p404_p2), 104  }
   0xa   : > { %s2099_s27 = smov (!%p404_p2), 64   ;;  %s2101_s28 = smov (!%p404_p2), 56  }
   0xb   : > { %1891 = vmatpush3.bf16.msra.mxu0 (!%p404_p2), %v2015_v2  ;;  %s2102_s29 = smov (!%p404_p2), 48   ;;  %s2103_s30 = smov (!%p404_p2), 40  }
   0xc   : > { %1902 = vmatprep.subr.bf16.mxu0 (!%p404_p2), %v2090_v1 }
   0xd   : > { %s2547_s26 = smov (!%p452_p3, %s1804_s26), 1 }
   0xe   : > { %s2201_s14 = sshll.u32 %s2547_s26, 3 }
   0xf   : > { %s455_s17 = scalar_lea.vmem %s2532_s0, %s2201_s14 }
  0x10   : > { %v468_v3 = vld [vmem:[%s455_s17] sm:$0xff]  ;;  %s459_s17 = scalar_lea.vmem %s2533_s1, %s2201_s14 }
  0x11   : > { %v2208_v4 = vpack.c.bf16 %v468_v3, %v468_v3 }
  0x13   : > { %1893 = vmatmul.mubr.msk.bf16.vlgmr.msra.gmra.mrb[0].mxu0 %vm488_vm1, %v2208_v4 }
  0x14   : > { %1904 = vmatprep.mubr.msk.bf16.mxu0 %vm2091_vm0, %v2090_v1 }
  0xe6   : > { %v2214_v5 = vpop.f32.mrb[0].mxu0 }
  0xe7   : > { %736 = vrot.lane.b32.xlu1 %v2214_v5, %s2092_s18  ;;  %573 = vrot.lane.b32.xlu0 %v2214_v5, %s2093_s19  ;;  %v1894_v6 = vpop.f32.mrb[1].mxu0  ;;  %v558_v51 = vsel %vm557_vm2, %v2214_v5, 0.0 }
  0xe8   : > { %v529_v7 = vpop.f32.mrb[2].mxu0 }
  0xe9   : > { %v1895_v8 = vpop.f32.mrb[3].mxu0 }
  0xeb   : > { %941 = vrot.lane.b32.xlu1 %v2214_v5, %s2094_s20  ;;  %756 = vrot.lane.b32.xlu0 %v2214_v5, %s2095_s21 }
  0xef   : > { %1126 = vrot.lane.b32.xlu1 %v2214_v5, %s2096_s22  ;;  %921 = vrot.lane.b32.xlu0 %v2214_v5, %s2097_s23 }
  0xf3   : > { %1106 = vrot.lane.b32.xlu0 %v2214_v5, %s2098_s24 }
 0x159   : > { %v737_v9 = vpop.permute.xlu1 %736  ;;  %v574_v10 = vpop.permute.xlu0 %573 }
 0x15a   : > { %v576_v11 = vsel %vm557_vm2, %v574_v10, 0.0  ;;  %v739_v19 = vsel %vm557_vm2, %v737_v9, 0.0 }
 0x15b   : > { %577 = vadd.xlane.f32.xlu1 %v576_v11 }
 0x15d   : > { %v942_v12 = vpop.permute.xlu1 %941  ;;  %v757_v13 = vpop.permute.xlu0 %756 }
 0x15e   : > { %v944_v14 = vsel %vm557_vm2, %v942_v12, 0.0  ;;  %v759_v15 = vsel %vm557_vm2, %v757_v13, 0.0 }
 0x15f   : > { %945 = vadd.xlane.f32.xlu1 %v944_v14  ;;  %760 = vadd.xlane.f32.xlu0 %v759_v15 }
 0x161   : > { %v1127_v16 = vpop.permute.xlu1 %1126  ;;  %v922_v17 = vpop.permute.xlu0 %921 }
 0x162   : > { %v1129_v18 = vsel %vm557_vm2, %v1127_v16, 0.0  ;;  %v924_v20 = vsel %vm557_vm2, %v922_v17, 0.0 }
 0x163   : > { %1130 = vadd.xlane.f32.xlu1 %v1129_v18  ;;  %740 = vadd.xlane.f32.xlu0 %v739_v19 }
 0x165   : > { %v1107_v21 = vpop.permute.xlu0 %1106 }
 0x166   : > { %v1109_v22 = vsel %vm557_vm2, %v1107_v21, 0.0 }
 0x167   : > { %925 = vadd.xlane.f32.xlu0 %v924_v20 }
 0x16b   : > { %1110 = vadd.xlane.f32.xlu0 %v1109_v22 }
 0x1e8   : > { %v578_v23 = vpop.xlane.xlu1 %577 }
 0x1e9   : > { %v579_v24 = vmul.f32 0.125, %v578_v23 }
 0x1eb   : > { %v2238_v25 = vsub.f32 %v2214_v5, %v579_v24 }
 0x1ec   : > { %v946_v26 = vpop.xlane.xlu1 %945  ;;  %v761_v27 = vpop.xlane.xlu0 %760 }
 0x1ed   : > { %v762_v28 = vmul.f32 0.125, %v761_v27  ;;  %v581_v29 = vmul.f32 %v2238_v25, %v2238_v25  ;;  %v947_v32 = vmul.f32 0.125, %v946_v26 }
 0x1ef   : > { %v2243_v30 = vsub.f32 %v2214_v5, %v762_v28  ;;  %583 = vrot.lane.b32.xlu1 %v581_v29, %s2093_s19  ;;  %v2253_v38 = vsub.f32 %v2214_v5, %v947_v32 }
 0x1f0   : > { %v741_v31 = vpop.xlane.xlu0 %740  ;;  %v1131_v35 = vpop.xlane.xlu1 %1130 }
 0x1f1   : > { %v742_v33 = vmul.f32 0.125, %v741_v31  ;;  %v764_v34 = vmul.f32 %v2243_v30, %v2243_v30  ;;  %v1132_v39 = vmul.f32 0.125, %v1131_v35  ;;  %v949_v46 = vmul.f32 %v2253_v38, %v2253_v38 }
 0x1f3   : > { %v2249_v36 = vsub.f32 %v2214_v5, %v742_v33  ;;  %766 = vrot.lane.b32.xlu0 %v764_v34, %s2095_s21  ;;  %v2262_v44 = vsub.f32 %v2214_v5, %v1132_v39 }
 0x1f4   : > { %v926_v37 = vpop.xlane.xlu0 %925 }
 0x1f5   : > { %v927_v40 = vmul.f32 0.125, %v926_v37  ;;  %v744_v41 = vmul.f32 %v2249_v36, %v2249_v36  ;;  %v1134_v49 = vmul.f32 %v2262_v44, %v2262_v44 }
 0x1f7   : > { %v2258_v42 = vsub.f32 %v2214_v5, %v927_v40  ;;  %746 = vrot.lane.b32.xlu1 %v744_v41, %s2092_s18 }
 0x1f8   : > { %v1111_v43 = vpop.xlane.xlu0 %1110 }
 0x1f9   : > { %v1112_v45 = vmul.f32 0.125, %v1111_v43  ;;  %v929_v47 = vmul.f32 %v2258_v42, %v2258_v42 }
 0x1fb   : > { %v2269_v48 = vsub.f32 %v2214_v5, %v1112_v45  ;;  %951 = vrot.lane.b32.xlu1 %v949_v46, %s2094_s20  ;;  %931 = vrot.lane.b32.xlu0 %v929_v47, %s2097_s23 }
 0x1fd   : > { %v1114_v50 = vmul.f32 %v2269_v48, %v2269_v48 }
 0x1ff   : > { %1136 = vrot.lane.b32.xlu1 %v1134_v49, %s2096_s22  ;;  %1116 = vrot.lane.b32.xlu0 %v1114_v50, %s2098_s24 }
 0x223   : > { %559 = vadd.xlane.f32.xlu1 %v558_v51 }
 0x261   : > { %v584_v52 = vpop.permute.xlu1 %583 }
 0x262   : > { %v586_v53 = vsel %vm557_vm2, %v584_v52, 0.0 }
 0x263   : > { %587 = vadd.xlane.f32.xlu0 %v586_v53 }
 0x265   : > { %v767_v54 = vpop.permute.xlu0 %766 }
 0x266   : > { %v769_v55 = vsel %vm557_vm2, %v767_v54, 0.0 }
 0x267   : > { %770 = vadd.xlane.f32.xlu0 %v769_v55 }
 0x269   : > { %v747_v56 = vpop.permute.xlu1 %746 }
 0x26a   : > { %v749_v57 = vsel %vm557_vm2, %v747_v56, 0.0 }
 0x26b   : > { %750 = vadd.xlane.f32.xlu1 %v749_v57 }
 0x26d   : > { %v952_v58 = vpop.permute.xlu1 %951  ;;  %v932_v59 = vpop.permute.xlu0 %931 }
 0x26e   : > { %v954_v60 = vsel %vm557_vm2, %v952_v58, 0.0  ;;  %v934_v61 = vsel %vm557_vm2, %v932_v59, 0.0 }
 0x26f   : > { %955 = vadd.xlane.f32.xlu0 %v954_v60  ;;  %935 = vadd.xlane.f32.xlu1 %v934_v61 }
 0x271   : > { %v1137_v62 = vpop.permute.xlu1 %1136  ;;  %v1117_v63 = vpop.permute.xlu0 %1116 }
 0x272   : > { %v1139_v0 = vsel %vm557_vm2, %v1137_v62, 0.0  ;;  %v1119_v2 = vsel %vm557_vm2, %v1117_v63, 0.0 }
 0x273   : > { %1140 = vadd.xlane.f32.xlu0 %v1139_v0  ;;  %1120 = vadd.xlane.f32.xlu1 %v1119_v2 }
 0x2b0   : > { %v560_v3 = vpop.xlane.xlu1 %559 }
 0x2b1   : > { %v562_v6 = vmul.f32 0.125, %v560_v3 }
 0x2b3   : > { %v2289_v7 = vsub.f32 %v2214_v5, %v562_v6 }
 0x2b5   : > { %v564_v8 = vmul.f32 %v2289_v7, %v2289_v7 }
 0x2b7   : > { %v565_v9 = vsel %vm557_vm2, %v564_v8, 0.0 }
 0x2b8   : > { %566 = vadd.xlane.f32.xlu0 %v565_v9 }
 0x2f0   : > { %v588_v10 = vpop.xlane.xlu0 %587 }
 0x2f1   : > { %v589_v11 = vmul.f32 0.125, %v588_v10 }
 0x2f3   : > { %v590_v12 = vadd.f32 1e-05, %v589_v11 }
 0x2f4   : > { %v771_v13 = vpop.xlane.xlu0 %770 }
 0x2f5   : > { %2028 = vrsqrt.f32 %v590_v12  ;;  %v772_v14 = vmul.f32 0.125, %v771_v13 }
 0x2f7   : > { %v773_v15 = vadd.f32 1e-05, %v772_v14 }
 0x2f8   : > { %v751_v16 = vpop.xlane.xlu1 %750 }
 0x2f9   : > { %2030 = vrsqrt.f32 %v773_v15  ;;  %v752_v17 = vmul.f32 0.125, %v751_v16 }
 0x2fb   : > { %v753_v18 = vadd.f32 1e-05, %v752_v17  ;;  %v469_v17 = vld [vmem:[%s459_s17] sm:$0xff] }
 0x2fc   : > { %v956_v19 = vpop.xlane.xlu0 %955  ;;  %v936_v20 = vpop.xlane.xlu1 %935 }
 0x2fd   : > { %2032 = vrsqrt.f32 %v753_v18  ;;  %v957_v21 = vmul.f32 0.125, %v956_v19  ;;  %v937_v22 = vmul.f32 0.125, %v936_v20 }
 0x2ff   : > { %v2029_v23 = vpop.eup %2028  ;;  %v958_v24 = vadd.f32 1e-05, %v957_v21  ;;  %v938_v26 = vadd.f32 1e-05, %v937_v22 }
 0x300   : > { %v1141_v27 = vpop.xlane.xlu0 %1140  ;;  %v1121_v28 = vpop.xlane.xlu1 %1120  ;;  %v592_v29 = vmul.f32 %v2029_v23, %v2238_v25 }
 0x301   : > { %2034 = vrsqrt.f32 %v958_v24  ;;  %v1142_v31 = vmul.f32 0.125, %v1141_v27  ;;  %v1122_v32 = vmul.f32 0.125, %v1121_v28 }
 0x302   : > { %2036 = vrsqrt.f32 %v938_v26  ;;  %v614_v33 = vpack.c.bf16 %v592_v29, %v592_v29 }
 0x303   : > { %v2031_v34 = vpop.eup %2030  ;;  %v1143_v35 = vadd.f32 1e-05, %v1142_v31  ;;  %v1123_v37 = vadd.f32 1e-05, %v1122_v32 }
 0x304   : > { %616 = vrot.lane.b32.xlu1 %v614_v33, %s2093_s19  ;;  %v775_v39 = vmul.f32 %v2031_v34, %v2243_v30 }
 0x305   : > { %2038 = vrsqrt.f32 %v1143_v35 }
 0x306   : > { %2040 = vrsqrt.f32 %v1123_v37  ;;  %v797_v40 = vpack.c.bf16 %v775_v39, %v775_v39  ;;  %v532_v37 = vlaneseq }
 0x307   : > { %v2033_v41 = vpop.eup %2032 }
 0x308   : > { %802 = vrot.lane.b32.xlu0 %v797_v40, %s2095_s21  ;;  %v755_v25 = vmul.f32 %v2033_v41, %v2249_v36  ;;  %v533_v39 = vshrl.u32 %v532_v37, 7  ;;  %v535_v40 = vand.u32 127, %v532_v37 }
 0x30a   : > { %v796_v43 = vpack.c.bf16 %v755_v25, %v755_v25  ;;  %v552_v41 = vcvt.s32.f32 %v533_v39  ;;  %v553_v25 = vcvt.s32.f32 %v535_v40  ;;  %vm536_vm3 = vcmp.lt.s32.totalorder %v535_v40, %v533_v39 }
 0x30b   : > { %v2035_v45 = vpop.eup %2034 }
 0x30c   : > { %v2037_v46 = vpop.eup %2036  ;;  %799 = vrot.lane.b32.xlu1 %v796_v43, %s2092_s18  ;;  %v960_v47 = vmul.f32 %v2035_v45, %v2253_v38  ;;  %v2100_v38 = vmov 0   ;;  %v554_v43 = vsub.f32 %v552_v41, %v553_v25 }
 0x30d   : > { %v940_v49 = vmul.f32 %v2037_v46, %v2258_v42  ;;  %2013 = vset.pattern.permute.xlu0 %v2100_v38 }
 0x30e   : > { %v982_v50 = vpack.c.bf16 %v960_v47, %v960_v47  ;;  %v555_v46 = vand.u32 2147483647, %v554_v43 }
 0x30f   : > { %v2039_v51 = vpop.eup %2038  ;;  %v981_v30 = vpack.c.bf16 %v940_v49, %v940_v49 }
 0x310   : > { %v2041_v52 = vpop.eup %2040  ;;  %987 = vrot.lane.b32.xlu1 %v982_v50, %s2094_s20  ;;  %v1145_v53 = vmul.f32 %v2039_v51, %v2262_v44  ;;  %s462_s20 = scalar_lea.vmem %s2534_s2, %s2547_s26  ;;  %v556_v50 = vmul.f32 -1.5, %v555_v46  ;;  %s2104_s26 = smov 8  }
 0x311   : > { %984 = vrot.lane.b32.xlu0 %v981_v30, %s2097_s23  ;;  %v1125_v36 = vmul.f32 %v2041_v52, %v2269_v48  ;;  %v1816_v49 = vld [vmem:[%s462_s20] ss:$0 sm:$0xff] }
 0x312   : > { %v1167_v54 = vpack.c.bf16 %v1145_v53, %v1145_v53 }
 0x313   : > { %v1166_v55 = vpack.c.bf16 %v1125_v36, %v1125_v36 }
 0x314   : > { %1172 = vrot.lane.b32.xlu1 %v1167_v54, %s2096_s22 }
 0x315   : > { %1169 = vrot.lane.b32.xlu0 %v1166_v55, %s2098_s24 }
 0x318   : > { %593 = vrot.lane.b32.xlu1 %v2214_v5, %s2099_s27 }
 0x319   : > { %776 = vrot.lane.b32.xlu0 %v2214_v5, %s2101_s28 }
 0x31c   : > { %961 = vrot.lane.b32.xlu1 %v2214_v5, %s2102_s29 }
 0x31d   : > { %1146 = vrot.lane.b32.xlu0 %v2214_v5, %s2103_s30 }
 0x345   : > { %v567_v42 = vpop.xlane.xlu0 %566 }
 0x346   : > { %v568_v44 = vmul.f32 0.125, %v567_v42 }
 0x348   : > { %v569_v48 = vadd.f32 1e-05, %v568_v44 }
 0x34a   : > { %2042 = vrsqrt.f32 %v569_v48 }
 0x354   : > { %v2043_v56 = vpop.eup %2042 }
 0x355   : > { %v571_v59 = vmul.f32 %v2043_v56, %v2289_v7 }
 0x357   : > { %v613_v61 = vpack.c.bf16 %v571_v59, %v571_v59 }
 0x376   : > { %v617_v57 = vpop.permute.xlu1 %616 }
 0x377   : > { %v622_v58 = vsel %vm557_vm2, %v617_v57, 0 }
 0x378   : > { %1897 = vmatpush3.bf16.xpose.msra.mxu1 %v622_v58 }
 0x379   : > { %1908 = vmatprep.subr.bf16.mxu1 %v2090_v1 }
 0x37a   : > { %v803_v60 = vpop.permute.xlu0 %802 }
 0x37b   : > { %v808_v63 = vsel %vm557_vm2, %v803_v60, 0 }
 0x37e   : > { %v800_v62 = vpop.permute.xlu1 %799 }
 0x37f   : > { %1899 = vmatmul.mubr.msk.bf16.vlgmr.msra.gmra.mrb[0].mxu1 %vm557_vm2, %v613_v61 }
 0x380   : > { %1909 = vmatpush3.bf16.xpose.msra.mxu1 %v808_v63  ;;  %1910 = vmatprep.mubr.msk.bf16.mxu1 %vm2091_vm0, %v2090_v1 }
 0x381   : > { %1920 = vmatprep.subr.bf16.mxu1 %v2090_v1 }
 0x382   : > { %v988_v0 = vpop.permute.xlu1 %987 }
 0x383   : > { %v985_v2 = vpop.permute.xlu0 %984  ;;  %v993_v6 = vsel %vm557_vm2, %v988_v0, 0 }
 0x386   : > { %v1173_v3 = vpop.permute.xlu1 %1172 }
 0x387   : > { %v1170_v7 = vpop.permute.xlu0 %1169  ;;  %1911 = vmatmul.mubr.msk.bf16.vlgmr.msra.gmra.mrb[4].mxu1 %vm557_vm2, %v800_v62  ;;  %v1178_v13 = vsel %vm557_vm2, %v1173_v3, 0 }
 0x388   : > { %1921 = vmatpush3.bf16.xpose.msra.mxu1 %v993_v6  ;;  %1922 = vmatprep.mubr.msk.bf16.mxu1 %vm2091_vm0, %v2090_v1 }
 0x389   : > { %1932 = vmatprep.subr.bf16.mxu1 %v2090_v1 }
 0x38a   : > { %v594_v8 = vpop.permute.xlu1 %593 }
 0x38b   : > { %v777_v9 = vpop.permute.xlu0 %776  ;;  %v596_v10 = vsel %vm557_vm2, %v594_v8, 0.0 }
 0x38c   : > { %v779_v11 = vsel %vm557_vm2, %v777_v9, 0.0  ;;  %597 = vadd.xlane.f32.xlu1 %v596_v10 }
 0x38d   : > { %780 = vadd.xlane.f32.xlu0 %v779_v11 }
 0x38e   : > { %v962_v12 = vpop.permute.xlu1 %961 }
 0x38f   : > { %v1147_v14 = vpop.permute.xlu0 %1146  ;;  %1923 = vmatmul.mubr.msk.bf16.vlgmr.msra.gmra.mrb[8].mxu1 %vm557_vm2, %v985_v2  ;;  %v964_v15 = vsel %vm557_vm2, %v962_v12, 0.0 }
 0x390   : > { %1933 = vmatpush3.bf16.xpose.msra.mxu1 %v1178_v13  ;;  %v1149_v16 = vsel %vm557_vm2, %v1147_v14, 0.0  ;;  %1934 = vmatprep.mubr.msk.bf16.mxu1 %vm2091_vm0, %v2090_v1 }
 0x391   : > { %1150 = vadd.xlane.f32.xlu1 %v1149_v16  ;;  %965 = vadd.xlane.f32.xlu0 %v964_v15 }
 0x392   : > { %1944 = vmatprep.subr.bf16.mxu1 %v2090_v1 }
 0x397   : > { %1935 = vmatmul.mubr.msk.bf16.vlgmr.msra.gmra.mrb[12].mxu1 %vm557_vm2, %v1170_v7 }
 0x398   : > { %1948 = vmatprep.mubr.msk.bf16.mxu1 %vm2091_vm0, %v2090_v1 }
 0x3a7   : > { %541 = vperm.xlu0 %2013, %v469_v17  }
 0x419   : > { %v598_v18 = vpop.xlane.xlu1 %597 }
 0x41a   : > { %v781_v19 = vpop.xlane.xlu0 %780  ;;  %v599_v20 = vmul.f32 0.125, %v598_v18 }
 0x41b   : > { %v782_v21 = vmul.f32 0.125, %v781_v19 }
 0x41c   : > { %v2346_v22 = vsub.f32 %v2214_v5, %v599_v20 }
 0x41d   : > { %v2349_v23 = vsub.f32 %v2214_v5, %v782_v21 }
 0x41e   : > { %v966_v24 = vpop.xlane.xlu0 %965  ;;  %v601_v26 = vmul.f32 %v2346_v22, %v2346_v22  ;;  %v1151_v28 = vpop.xlane.xlu1 %1150 }
 0x41f   : > { %v967_v27 = vmul.f32 0.125, %v966_v24  ;;  %v1152_v31 = vmul.f32 0.125, %v1151_v28  ;;  %v784_v32 = vmul.f32 %v2349_v23, %v2349_v23 }
 0x420   : > { %603 = vrot.lane.b32.xlu1 %v601_v26, %s2099_s27 }
 0x421   : > { %v2355_v29 = vsub.f32 %v2214_v5, %v967_v27  ;;  %v2361_v33 = vsub.f32 %v2214_v5, %v1152_v31  ;;  %v1815_v5 = vsel %vm536_vm3, 1.0, %v2090_v1 }
 0x423   : > { %v969_v34 = vmul.f32 %v2355_v29, %v2355_v29  ;;  %v1154_v35 = vmul.f32 %v2361_v33, %v2361_v33 }
 0x424   : > { %786 = vrot.lane.b32.xlu1 %v784_v32, %s2101_s28 }
 0x426   : > { %v542_v45 = vpop.permute.xlu0 %541 }
 0x427   : > { %v544_v47 = vmul.f32 %v1815_v5, %v542_v45 }
 0x428   : > { %971 = vrot.lane.b32.xlu1 %v969_v34, %s2102_s29 }
 0x429   : > { %v2374_v52 = vmul.f32 %v1816_v49, %v544_v47 }
 0x42c   : > { %1156 = vrot.lane.b32.xlu1 %v1154_v35, %s2103_s30 }
 0x452   : > { %v658_v51 = vpop.f32.mrb[0].mxu1 }
 0x453   : > { %v664_v30 = vmul.f32 0.17677669, %v658_v51  ;;  %v1900_v53 = vpop.f32.mrb[1].mxu1 }
 0x454   : > { %v661_v36 = vpop.f32.mrb[2].mxu1 }
 0x455   : > { %v665_v54 = vadd.f32 %v664_v30, %v556_v50  ;;  %v1901_v55 = vpop.f32.mrb[3].mxu1 }
 0x457   : > { %v666_v38 = vmul.f32 %v665_v54, %v2374_v52 }
 0x459   : > { %v667_v42 = vsel %vm557_vm2, %v666_v38, -inf }
 0x45a   : > { %v844_v44 = vpop.f32.mrb[4].mxu1  ;;  %668 = vmax.xlane.f32.xlu1 %v667_v42 }
 0x45b   : > { %v850_v48 = vmul.f32 0.17677669, %v844_v44  ;;  %v1912_v56 = vpop.f32.mrb[5].mxu1 }
 0x45c   : > { %v847_v57 = vpop.f32.mrb[6].mxu1 }
 0x45d   : > { %v851_v58 = vadd.f32 %v850_v48, %v556_v50  ;;  %v1913_v59 = vpop.f32.mrb[7].mxu1 }
 0x45f   : > { %v852_v60 = vmul.f32 %v851_v58, %v2374_v52 }
 0x461   : > { %v853_v61 = vsel %vm557_vm2, %v852_v60, -inf }
 0x462   : > { %v1029_v62 = vpop.f32.mrb[8].mxu1  ;;  %854 = vmax.xlane.f32.xlu0 %v853_v61 }
 0x463   : > { %v1035_v63 = vmul.f32 0.17677669, %v1029_v62  ;;  %v1924_v0 = vpop.f32.mrb[9].mxu1 }
 0x464   : > { %v1032_v2 = vpop.f32.mrb[10].mxu1 }
 0x465   : > { %v1036_v3 = vadd.f32 %v1035_v63, %v556_v50  ;;  %v1925_v6 = vpop.f32.mrb[11].mxu1 }
 0x467   : > { %v2381_v7 = vmul.f32 %v1036_v3, %v2374_v52 }
 0x469   : > { %v1038_v8 = vsel %vm557_vm2, %v2381_v7, -inf }
 0x46a   : > { %v1214_v9 = vpop.f32.mrb[12].mxu1  ;;  %1039 = vmax.xlane.f32.xlu1 %v1038_v8 }
 0x46b   : > { %v1220_v10 = vmul.f32 0.17677669, %v1214_v9  ;;  %v1936_v11 = vpop.f32.mrb[13].mxu1 }
 0x46c   : > { %v1217_v12 = vpop.f32.mrb[14].mxu1 }
 0x46d   : > { %v1221_v13 = vadd.f32 %v1220_v10, %v556_v50  ;;  %v1937_v14 = vpop.f32.mrb[15].mxu1 }
 0x46f   : > { %v1222_v15 = vmul.f32 %v1221_v13, %v2374_v52 }
 0x471   : > { %v1223_v16 = vsel %vm557_vm2, %v1222_v15, -inf }
 0x472   : > { %1224 = vmax.xlane.f32.xlu1 %v1223_v16 }
 0x492   : > { %v604_v17 = vpop.permute.xlu1 %603 }
 0x493   : > { %v606_v18 = vsel %vm557_vm2, %v604_v17, 0.0 }
 0x494   : > { %607 = vadd.xlane.f32.xlu1 %v606_v18 }
 0x496   : > { %v787_v19 = vpop.permute.xlu1 %786 }
 0x497   : > { %v789_v20 = vsel %vm557_vm2, %v787_v19, 0.0 }
 0x498   : > { %790 = vadd.xlane.f32.xlu0 %v789_v20 }
 0x49a   : > { %v972_v21 = vpop.permute.xlu1 %971 }
 0x49b   : > { %v974_v24 = vsel %vm557_vm2, %v972_v21, 0.0 }
 0x49c   : > { %975 = vadd.xlane.f32.xlu1 %v974_v24 }
 0x49e   : > { %v1157_v26 = vpop.permute.xlu1 %1156 }
 0x49f   : > { %v1159_v27 = vsel %vm557_vm2, %v1157_v26, 0.0 }
 0x4a0   : > { %1160 = vadd.xlane.f32.xlu0 %v1159_v27 }
 0x4e7   : > { %v669_v28 = vpop.xlane.xlu1 %668 }
 0x4e8   : > { %v670_v31 = vsub.f32 %v666_v38, %v669_v28 }
 0x4ea   : > { %v671_v32 = vmul.f32 1.442695, %v670_v31 }
 0x4ec   : > { %2044 = vpow2.f32 %v671_v32 }
 0x4ef   : > { %v855_v34 = vpop.xlane.xlu0 %854 }
 0x4f0   : > { %v856_v35 = vsub.f32 %v852_v60, %v855_v34 }
 0x4f2   : > { %v857_v37 = vmul.f32 1.442695, %v856_v35 }
 0x4f4   : > { %2046 = vpow2.f32 %v857_v37 }
 0x4f6   : > { %v2045_v39 = vpop.eup %2044 }
 0x4f7   : > { %v2392_v40 = vmul.f32 %v2045_v39, %v2374_v52  ;;  %v1040_v25 = vpop.xlane.xlu1 %1039 }
 0x4f8   : > { %v1041_v60 = vsub.f32 %v2381_v7, %v1040_v25 }
 0x4f9   : > { %v674_v41 = vsel %vm557_vm2, %v2392_v40, 0.0 }
 0x4fa   : > { %675 = vadd.xlane.f32.xlu1 %v674_v41  ;;  %v1042_v61 = vmul.f32 1.442695, %v1041_v60  ;;  %v2017_v60 = vld [vmem:[%s2536_s4 + $0x8] sm:$0xff]  }
 0x4fe   : > { %v2047_v43 = vpop.eup %2046 }
 0x4ff   : > { %v1225_v5 = vpop.xlane.xlu1 %1224  ;;  %v2397_v45 = vmul.f32 %v2047_v43, %v2374_v52 }
 0x500   : > { %v1226_v46 = vsub.f32 %v1222_v15, %v1225_v5 }
 0x501   : > { %v860_v47 = vsel %vm557_vm2, %v2397_v45, 0.0 }
 0x502   : > { %v1227_v49 = vmul.f32 1.442695, %v1226_v46  ;;  %861 = vadd.xlane.f32.xlu0 %v860_v47 }
 0x504   : > { %2048 = vpow2.f32 %v1227_v49 }
 0x50e   : > { %v2049_v50 = vpop.eup %2048 }
 0x50f   : > { %v2402_v51 = vmul.f32 %v2049_v50, %v2374_v52 }
 0x511   : > { %v1230_v30 = vsel %vm557_vm2, %v2402_v51, 0.0 }
 0x512   : > { %1231 = vadd.xlane.f32.xlu0 %v1230_v30 }
 0x521   : > { %v608_v53 = vpop.xlane.xlu1 %607 }
 0x522   : > { %v609_v36 = vmul.f32 0.125, %v608_v53 }
 0x524   : > { %v610_v54 = vadd.f32 1e-05, %v609_v36 }
 0x525   : > { %v791_v55 = vpop.xlane.xlu0 %790 }
 0x526   : > { %2050 = vrsqrt.f32 %v610_v54  ;;  %v792_v38 = vmul.f32 0.125, %v791_v55 }
 0x528   : > { %v793_v42 = vadd.f32 1e-05, %v792_v38 }
 0x529   : > { %v976_v62 = vpop.xlane.xlu1 %975 }
 0x52a   : > { %2052 = vrsqrt.f32 %v793_v42  ;;  %v977_v63 = vmul.f32 0.125, %v976_v62 }
 0x52b   : > { %2054 = vpow2.f32 %v1042_v61 }
 0x52c   : > { %v978_v3 = vadd.f32 1e-05, %v977_v63 }
 0x52d   : > { %v1161_v0 = vpop.xlane.xlu0 %1160 }
 0x52e   : > { %v1162_v6 = vmul.f32 0.125, %v1161_v0  ;;  %2056 = vrsqrt.f32 %v978_v3 }
 0x530   : > { %v2051_v44 = vpop.eup %2050  ;;  %v1163_v8 = vadd.f32 1e-05, %v1162_v6 }
 0x531   : > { %v612_v48 = vmul.f32 %v2051_v44, %v2346_v22 }
 0x532   : > { %2058 = vrsqrt.f32 %v1163_v8 }
 0x533   : > { %v685_v56 = vpack.c.bf16 %v612_v48, %v612_v48 }
 0x534   : > { %v2053_v57 = vpop.eup %2052 }
 0x535   : > { %687 = vrot.lane.b32.xlu1 %v685_v56, %s2099_s27  ;;  %v795_v58 = vmul.f32 %v2053_v57, %v2349_v23  ;;  %v2055_v2 = vpop.eup %2054  ;;  %s2105_s27 = smov 16  }
 0x536   : > { %v1044_v22 = vmul.f32 %v2055_v2, %v2374_v52 }
 0x537   : > { %v871_v59 = vpack.c.bf16 %v795_v58, %v795_v58 }
 0x538   : > { %v1045_v9 = vsel %vm557_vm2, %v1044_v22, 0.0  ;;  %v2057_v23 = vpop.eup %2056 }
 0x539   : > { %873 = vrot.lane.b32.xlu0 %v871_v59, %s2101_s28  ;;  %v980_v10 = vmul.f32 %v2057_v23, %v2355_v29  ;;  %s2106_s28 = smov 24  }
 0x53b   : > { %v1056_v11 = vpack.c.bf16 %v980_v10, %v980_v10 }
 0x53c   : > { %v2059_v7 = vpop.eup %2058 }
 0x53d   : > { %v1165_v12 = vmul.f32 %v2059_v7, %v2361_v33 }
 0x53f   : > { %v1241_v13 = vpack.c.bf16 %v1165_v12, %v1165_v12 }
 0x559   : > { %1046 = vadd.xlane.f32.xlu1 %v1045_v9 }
 0x56a   : > { %1058 = vrot.lane.b32.xlu1 %v1056_v11, %s2102_s29  ;;  %s466_s29 = scalar_lea.vmem %s2545_s13, %s2201_s14 }
 0x56e   : > { %1243 = vrot.lane.b32.xlu1 %v1241_v13, %s2103_s30  ;;  %v2018_v13 = vld [vmem:[%s2538_s6] sm:$0xff]  }
 0x587   : > { %v676_v14 = vpop.xlane.xlu1 %675 }
 0x588   : > { %vm677_vm4 = vcmp.eq.f32.partialorder %v676_v14, 0.0 }
 0x589   : > { %v1818_v52 = vsel %vm677_vm4, 1.0, %v2090_v1 }
 0x58a   : > { %v680_v16 = vadd.f32 %v1818_v52, %v676_v14  ;;  %v2019_v14 = vld [vmem:[%s2538_s6 + $0x8] sm:$0xff]   ;;  %v1829_v52 = vld [vmem:[%s2537_s5] ss:$0 sm:$0xff] }
 0x58c   : > { %v681_v17 = vadd.f32 1e-20, %v680_v16 }
 0x58e   : > { %2060 = vrcp.f32 %v681_v17 }
 0x58f   : > { %v862_v15 = vpop.xlane.xlu0 %861 }
 0x590   : > { %vm863_vm5 = vcmp.eq.f32.partialorder %v862_v15, 0.0 }
 0x591   : > { %v1821_v18 = vsel %vm863_vm5, 1.0, %v2090_v1 }
 0x592   : > { %v866_v29 = vadd.f32 %v1821_v18, %v862_v15 }
 0x594   : > { %v867_v19 = vadd.f32 1e-20, %v866_v29 }
 0x596   : > { %2062 = vrcp.f32 %v867_v19 }
 0x598   : > { %v2061_v33 = vpop.eup %2060 }
 0x599   : > { %v683_v20 = vmul.f32 %v2061_v33, %v2392_v40 }
 0x59b   : > { %v684_v27 = vpack.c.bf16 %v683_v20, %v683_v20 }
 0x59f   : > { %v1232_v21 = vpop.xlane.xlu0 %1231 }
 0x5a0   : > { %v2063_v28 = vpop.eup %2062  ;;  %vm1233_vm7 = vcmp.eq.f32.partialorder %v1232_v21, 0.0 }
 0x5a1   : > { %v869_v34 = vmul.f32 %v2063_v28, %v2397_v45  ;;  %v1827_v37 = vsel %vm1233_vm7, 1.0, %v2090_v1 }
 0x5a2   : > { %v1236_v41 = vadd.f32 %v1827_v37, %v1232_v21 }
 0x5a3   : > { %v870_v35 = vpack.c.bf16 %v869_v34, %v869_v34  ;;  %v2020_v34 = vld [vmem:[%s2539_s7] sm:$0xff]  }
 0x5a4   : > { %v1237_v46 = vadd.f32 1e-20, %v1236_v41 }
 0x5a7   : > { %v688_v24 = vpop.permute.xlu1 %687 }
 0x5a8   : > { %v694_v26 = vsel %vm692_vm6, %v688_v24, 0 }
 0x5a9   : > { %1903 = vmatpush3.bf16.msra.mxu0 %v694_v26 }
 0x5aa   : > { %1914 = vmatprep.subr.bf16.mxu0 %v2090_v1 }
 0x5ab   : > { %v874_v31 = vpop.permute.xlu0 %873 }
 0x5ac   : > { %v879_v32 = vsel %vm692_vm6, %v874_v31, 0  ;;  %1905 = vmatmul.mubr.msk.bf16.vlgmr.msra.gmra.mrb[4].mxu0 %vm557_vm2, %v684_v27 }
 0x5ad   : > { %1915 = vmatpush3.bf16.msra.mxu0 %v879_v32  ;;  %1916 = vmatprep.mubr.msk.bf16.mxu0 %vm2091_vm0, %v2090_v1 }
 0x5ae   : > { %1926 = vmatprep.subr.bf16.mxu0 %v2090_v1 }
 0x5b4   : > { %1917 = vmatmul.mubr.msk.bf16.vlgmr.msra.gmra.mrb[8].mxu0 %vm557_vm2, %v870_v35  ;;  %v2021_v35 = vld [vmem:[%s2539_s7 + $0x8] sm:$0xff]  }
 0x5b5   : > { %1928 = vmatprep.mubr.msk.bf16.mxu0 %vm2091_vm0, %v2090_v1 }
 0x5e6   : > { %v1047_v39 = vpop.xlane.xlu1 %1046 }
 0x5e7   : > { %vm1048_vm8 = vcmp.eq.f32.partialorder %v1047_v39, 0.0 }
 0x5e8   : > { %v1824_v40 = vsel %vm1048_vm8, 1.0, %v2090_v1 }
 0x5e9   : > { %v1051_v25 = vadd.f32 %v1824_v40, %v1047_v39 }
 0x5ea   : > { %v1059_v43 = vpop.permute.xlu1 %1058 }
 0x5eb   : > { %v1052_v5 = vadd.f32 1e-20, %v1051_v25  ;;  %v1064_v45 = vsel %vm692_vm6, %v1059_v43, 0 }
 0x5ec   : > { %1927 = vmatpush3.bf16.msra.mxu0 %v1064_v45 }
 0x5ed   : > { %2064 = vrcp.f32 %v1052_v5  ;;  %1938 = vmatprep.subr.bf16.mxu0 %v2090_v1 }
 0x5ee   : > { %2066 = vrcp.f32 %v1237_v46  ;;  %v1244_v50 = vpop.permute.xlu1 %1243 }
 0x5ef   : > { %v1249_v36 = vsel %vm692_vm6, %v1244_v50, 0 }
 0x5f7   : > { %v2065_v47 = vpop.eup %2064 }
 0x5f8   : > { %v1054_v49 = vmul.f32 %v2065_v47, %v1044_v22  ;;  %v2067_v53 = vpop.eup %2066 }
 0x5f9   : > { %v1239_v54 = vmul.f32 %v2067_v53, %v2402_v51  ;;  %v2016_v51 = vld [vmem:[%s2536_s4] sm:$0xff]  }
 0x5fa   : > { %v1055_v30 = vpack.c.bf16 %v1054_v49, %v1054_v49  ;;  %1945 = vmatpush3.bf16.msra.mxu1 %v2016_v51 }
 0x5fb   : > { %v1240_v55 = vpack.c.bf16 %v1239_v54, %v1239_v54  ;;  %1946 = vmatprep.subr.bf16.mxu1 %v2090_v1 }
 0x5fc   : > { %1929 = vmatmul.mubr.msk.bf16.vlgmr.msra.gmra.mrb[12].mxu0 %vm557_vm2, %v1055_v30 }
 0x5fd   : > { %1939 = vmatpush3.bf16.msra.mxu0 %v1249_v36  ;;  %1940 = vmatprep.mubr.msk.bf16.mxu0 %vm2091_vm0, %v2090_v1 }
 0x5fe   : > { %1952 = vmatprep.subr.bf16.mxu0 %v2090_v1  ;;  %1947 = vmatpush3.bf16.msra.mxu1 %v2017_v60 }
 0x5ff   : > { %1960 = vmatprep.subr.bf16.mxu1 %v2090_v1 }
 0x604   : > { %1941 = vmatmul.mubr.msk.bf16.vlgmr.msra.gmra.mrb[16].mxu0 %vm557_vm2, %v1240_v55 }
 0x605   : > { %1956 = vmatprep.mubr.msk.bf16.mxu0 %vm2091_vm0, %v2090_v1  ;;  %1953 = vmatpush3.bf16.msra.mxu0 %v2018_v13 }
 0x606   : > { %1954 = vmatprep.subr.bf16.mxu0 %v2090_v1 }
 0x609   : > { %1955 = vmatpush3.bf16.msra.mxu0 %v2019_v14 }
 0x60a   : > { %1968 = vmatprep.subr.bf16.mxu0 %v2090_v1 }
 0x60c   : > { %1957 = vmatmul.mubr.msk.bf16.vlgmr.msra.gmra.mrb[20].mxu0 %vm488_vm1, %v2208_v4 }
 0x60d   : > { %1972 = vmatprep.mubr.msk.bf16.mxu0 %vm2091_vm0, %v2090_v1 }
 0x67f   : > { %v730_v38 = vpop.f32.mrb[4].mxu0 }
 0x680   : > { %v1906_v42 = vpop.f32.mrb[5].mxu0 }
 0x681   : > { %v733_v44 = vpop.f32.mrb[6].mxu0 }
 0x682   : > { %v1907_v48 = vpop.f32.mrb[7].mxu0 }
 0x687   : > { %v915_v56 = vpop.f32.mrb[8].mxu0 }
 0x688   : > { %1292 = vrot.lane.b32.xlu0 %v915_v56, %s2104_s26  ;;  %v1918_v57 = vpop.f32.mrb[9].mxu0 }
 0x689   : > { %v918_v58 = vpop.f32.mrb[10].mxu0 }
 0x68a   : > { %v1919_v59 = vpop.f32.mrb[11].mxu0 }
 0x6cf   : > { %v1100_v61 = vpop.f32.mrb[12].mxu0 }
 0x6d0   : > { %1296 = vrot.lane.b32.xlu1 %v1100_v61, %s2105_s27  ;;  %v1930_v62 = vpop.f32.mrb[13].mxu0 }
 0x6d1   : > { %v1103_v63 = vpop.f32.mrb[14].mxu0 }
 0x6d2   : > { %v1931_v0 = vpop.f32.mrb[15].mxu0 }
 0x6d7   : > { %v1285_v2 = vpop.f32.mrb[16].mxu0 }
 0x6d8   : > { %1300 = vrot.lane.b32.xlu0 %v1285_v2, %s2106_s28  ;;  %v1942_v3 = vpop.f32.mrb[17].mxu0  ;;  %v1839_v2 = vld [vmem:[%s2540_s8] ss:$0 sm:$0xff] }
 0x6d9   : > { %v1288_v6 = vpop.f32.mrb[18].mxu0 }
 0x6da   : > { %v1943_v22 = vpop.f32.mrb[19].mxu0 }
 0x6df   : > { %v1439_v33 = vpop.f32.mrb[20].mxu0 }
 0x6e0   : > { %v1958_v20 = vpop.f32.mrb[21].mxu0  ;;  %v1445_v32 = vsel %vm488_vm1, %v1439_v33, 0.0 }
 0x6e1   : > { %v1442_v21 = vpop.f32.mrb[22].mxu0  ;;  %v2025_v20 = vld [vmem:[%s2543_s11 + $0x8] sm:$0xff]  }
 0x6e2   : > { %v1959_v24 = vpop.f32.mrb[23].mxu0 }
 0x6fa   : > { %v1293_v8 = vpop.permute.xlu0 %1292 }
 0x6fb   : > { %v1303_v23 = vsel %vm557_vm2, %v730_v38, %v1293_v8 }
 0x742   : > { %v1297_v9 = vpop.permute.xlu1 %1296 }
 0x743   : > { %v1305_v10 = vsel %vm1304_vm9, %v1303_v23, %v1297_v9 }
 0x74a   : > { %v1301_v7 = vpop.permute.xlu0 %1300 }
 0x74b   : > { %v1307_v11 = vsel %vm1306_vm10, %v1305_v10, %v1301_v7 }
 0x74c   : > { %v1312_v12 = vpack.c.bf16 %v1307_v11, %v1307_v11 }
 0x74e   : > { %1949 = vmatmul.mubr.msk.bf16.vlgmr.msra.gmra.mrb[16].mxu1 %vm488_vm1, %v1312_v12 }
 0x74f   : > { %1964 = vmatprep.mubr.msk.bf16.mxu1 %vm2091_vm0, %v2090_v1  ;;  %1961 = vmatpush3.bf16.msra.mxu1 %v2020_v34  ;;  %v1840_v34 = vld [vmem:[%s2542_s10] ss:$0 sm:$0xff] }
 0x750   : > { %1962 = vmatprep.subr.bf16.mxu1 %v2090_v1 }
 0x753   : > { %1963 = vmatpush3.bf16.msra.mxu1 %v2021_v35 }
 0x754   : > { %1976 = vmatprep.subr.bf16.mxu1 %v2090_v1 }
 0x821   : > { %v1369_v15 = vpop.f32.mrb[16].mxu1 }
 0x822   : > { %v1370_v16 = vadd.f32 %v1829_v52, %v1369_v15  ;;  %v1950_v17 = vpop.f32.mrb[17].mxu1 }
 0x823   : > { %v1372_v18 = vpop.f32.mrb[18].mxu1 }
 0x824   : > { %v1951_v29 = vpop.f32.mrb[19].mxu1  ;;  %v1375_v19 = vsel %vm488_vm1, %v1370_v16, 0.0 }
 0x825   : > { %1376 = vadd.xlane.f32.xlu1 %v1375_v19  ;;  %v2022_v29 = vld [vmem:[%s2541_s9] sm:$0xff]   ;;  %v2023_v19 = vld [vmem:[%s2541_s9 + $0x8] sm:$0xff]  }
 0x826   : > { %1969 = vmatpush3.bf16.msra.mxu0 %v2022_v29 }
 0x827   : > { %1970 = vmatprep.subr.bf16.mxu0 %v2090_v1 }
 0x82a   : > { %1971 = vmatpush3.bf16.msra.mxu0 %v2023_v19 }
 0x8b2   : > { %v1377_v4 = vpop.xlane.xlu1 %1376 }
 0x8b3   : > { %v1379_v26 = vmul.f32 0.03125, %v1377_v4 }
 0x8b5   : > { %v1380_v27 = vsub.f32 %v1370_v16, %v1379_v26 }
 0x8b7   : > { %v1381_v28 = vmul.f32 %v1380_v27, %v1380_v27 }
 0x8b9   : > { %v1382_v31 = vsel %vm488_vm1, %v1381_v28, 0.0 }
 0x8ba   : > { %1383 = vadd.xlane.f32.xlu0 %v1382_v31  ;;  %v2026_v31 = vld [vmem:[%s2543_s11 + $0x10] sm:$0xff]  }
 0x8be   : > { %1446 = vadd.xlane.f32.xlu0 %v1445_v32  ;;  %v2027_v32 = vld [vmem:[%s2543_s11 + $0x18] sm:$0xff]  }
 0x947   : > { %v1384_v37 = vpop.xlane.xlu0 %1383 }
 0x948   : > { %v1385_v39 = vmul.f32 0.03125, %v1384_v37 }
 0x94a   : > { %v1386_v40 = vadd.f32 1e-05, %v1385_v39 }
 0x94b   : > { %v1447_v41 = vpop.xlane.xlu0 %1446 }
 0x94c   : > { %2068 = vrsqrt.f32 %v1386_v40  ;;  %v1448_v25 = vmul.f32 0.03125, %v1447_v41 }
 0x94e   : > { %v1449_v43 = vsub.f32 %v1439_v33, %v1448_v25  ;;  %v2024_v33 = vld [vmem:[%s2543_s11] sm:$0xff]  }
 0x950   : > { %v1450_v5 = vmul.f32 %v1449_v43, %v1449_v43 }
 0x952   : > { %v1451_v45 = vsel %vm488_vm1, %v1450_v5, 0.0 }
 0x953   : > { %1452 = vadd.xlane.f32.xlu0 %v1451_v45 }
 0x956   : > { %v2069_v46 = vpop.eup %2068 }
 0x957   : > { %v1388_v47 = vmul.f32 %v2069_v46, %v1380_v27 }
 0x959   : > { %v1462_v49 = vpack.c.bf16 %v1388_v47, %v1388_v47 }
 0x95b   : > { %1965 = vmatmul.mubr.msk.bf16.vlgmr.msra.gmra.mrb[20].mxu1 %vm488_vm1, %v1462_v49 }
 0x95c   : > { %1984 = vmatprep.mubr.msk.bf16.mxu1 %vm2091_vm0, %v2090_v1  ;;  %1977 = vmatpush3.bf16.msra.mxu1 %v2024_v33 }
 0x95d   : > { %1978 = vmatprep.subr.bf16.mxu1 %v2090_v1 }
 0x960   : > { %1979 = vmatpush3.bf16.msra.mxu1 %v2025_v20 }
 0x961   : > { %1980 = vmatprep.subr.bf16.mxu1 %v2090_v1 }
 0x964   : > { %1981 = vmatpush3.bf16.msra.mxu1 %v2026_v31 }
 0x965   : > { %1982 = vmatprep.subr.bf16.mxu1 %v2090_v1  ;;  %v1844_v1 = vld [vmem:[%s2544_s12] ss:$0 sm:$0xff] }
 0x968   : > { %1983 = vmatpush3.bf16.msra.mxu1 %v2027_v32 }
 0x9e0   : > { %v1453_v56 = vpop.xlane.xlu0 %1452 }
 0x9e1   : > { %v1454_v57 = vmul.f32 0.03125, %v1453_v56 }
 0x9e3   : > { %v1455_v58 = vadd.f32 1e-05, %v1454_v57 }
 0x9e5   : > { %2070 = vrsqrt.f32 %v1455_v58 }
 0x9ef   : > { %v2071_v61 = vpop.eup %2070 }
 0x9f0   : > { %v1457_v63 = vmul.f32 %v2071_v61, %v1449_v43 }
 0xa2e   : > { %v1512_v50 = vpop.f32.mrb[20].mxu1 }
 0xa2f   : > { %v1966_v30 = vpop.f32.mrb[21].mxu1  ;;  %v1518_v53 = vsel %vm488_vm1, %v1512_v50, 0.0 }
 0xa30   : > { %1519 = vadd.xlane.f32.xlu1 %v1518_v53  ;;  %v1515_v36 = vpop.f32.mrb[22].mxu1 }
 0xa31   : > { %v1967_v54 = vpop.f32.mrb[23].mxu1 }
 0xabd   : > { %v1520_v55 = vpop.xlane.xlu1 %1519 }
 0xabe   : > { %v1521_v38 = vmul.f32 0.03125, %v1520_v55 }
 0xac0   : > { %v1522_v42 = vsub.f32 %v1512_v50, %v1521_v38 }
 0xac2   : > { %v1523_v44 = vmul.f32 %v1522_v42, %v1522_v42 }
 0xac4   : > { %v1524_v48 = vsel %vm488_vm1, %v1523_v44, 0.0 }
 0xac5   : > { %1525 = vadd.xlane.f32.xlu1 %v1524_v48 }
 0xb52   : > { %v1526_v59 = vpop.xlane.xlu1 %1525 }
 0xb53   : > { %v1527_v51 = vmul.f32 0.03125, %v1526_v59 }
 0xb55   : > { %v1528_v60 = vadd.f32 1e-05, %v1527_v51 }
 0xb57   : > { %2072 = vrsqrt.f32 %v1528_v60 }
 0xb61   : > { %v2073_v62 = vpop.eup %2072 }
 0xb62   : > { %v1530_v0 = vmul.f32 %v2073_v62, %v1522_v42 }
 0xb64   : > { %v1531_v3 = vadd.f32 %v1530_v0, %v1457_v63 }
 0xb66   : > { %v1539_v6 = vadd.f32 %v1839_v2, %v1531_v3 }
 0xb68   : > { %v1540_v22 = vsub.f32 0.0, %v1539_v6 }
 0xb6a   : > { %v1541_v8 = vmul.f32 1.442695, %v1540_v22 }
 0xb6c   : > { %2074 = vpow2.f32 %v1541_v8 }
 0xb76   : > { %v2075_v9 = vpop.eup %2074 }
 0xb77   : > { %v1543_v23 = vadd.f32 1.0, %v2075_v9 }
 0xb79   : > { %2076 = vrcp.f32 %v1543_v23 }
 0xb83   : > { %v2077_v10 = vpop.eup %2076 }
 0xb84   : > { %v1547_v7 = vsub.f32 1.0, %v2077_v10  ;;  %v1546_v11 = vmul.f32 %v2077_v10, %v1457_v63 }
 0xb86   : > { %v1548_v12 = vmul.f32 %v1547_v7, %v1530_v0 }
 0xb88   : > { %v1549_v13 = vadd.f32 %v1548_v12, %v1546_v11 }
 0xb8a   : > { %v1550_v14 = vsel %vm488_vm1, %v1549_v13, 0.0 }
 0xb8b   : > { %1551 = vadd.xlane.f32.xlu0 %v1550_v14 }
 0xc18   : > { %v1552_v52 = vpop.xlane.xlu0 %1551 }
 0xc19   : > { %v1553_v15 = vmul.f32 0.03125, %v1552_v52 }
 0xc1b   : > { %v1554_v16 = vsub.f32 %v1549_v13, %v1553_v15 }
 0xc1d   : > { %v1555_v17 = vmul.f32 %v1554_v16, %v1554_v16 }
 0xc1f   : > { %v1556_v18 = vsel %vm488_vm1, %v1555_v17, 0.0 }
 0xc20   : > { %1557 = vadd.xlane.f32.xlu1 %v1556_v18 }
 0xcad   : > { %v1558_v21 = vpop.xlane.xlu1 %1557 }
 0xcae   : > { %v1559_v24 = vmul.f32 0.03125, %v1558_v21 }
 0xcb0   : > { %v1560_v4 = vadd.f32 1e-05, %v1559_v24 }
 0xcb2   : > { %2078 = vrsqrt.f32 %v1560_v4 }
 0xcbc   : > { %v2079_v26 = vpop.eup %2078 }
 0xcbd   : > { %v1562_v27 = vmul.f32 %v2079_v26, %v1554_v16 }
 0xcbf   : > { %v1567_v28 = vpack.c.bf16 %v1562_v27, %v1562_v27 }
 0xcc1   : > { %1973 = vmatmul.mubr.msk.bf16.vlgmr.msra.gmra.mrb[24].mxu0 %vm488_vm1, %v1567_v28 }
 0xd94   : > { %v1624_v35 = vpop.f32.mrb[24].mxu0 }
 0xd95   : > { %v1625_v37 = vadd.f32 %v1840_v34, %v1624_v35  ;;  %v1974_v39 = vpop.f32.mrb[25].mxu0 }
 0xd96   : > { %v1627_v40 = vpop.f32.mrb[26].mxu0 }
 0xd97   : > { %v1630_v41 = vmax.f32 %v1625_v37, 0.0  ;;  %v1975_v25 = vpop.f32.mrb[27].mxu0 }
 0xd99   : > { %v1639_v43 = vpack.c.bf16 %v1630_v41, %v1630_v41 }
 0xd9b   : > { %1985 = vmatmul.mubr.msk.bf16.vlgmr.msra.gmra.mrb[24].mxu1 %vm1671_vm11, %v1639_v43 }
 0xe6e   : > { %v1709_v5 = vpop.f32.mrb[24].mxu1 }
 0xe6f   : > { %v1710_v45 = vadd.f32 %v1844_v1, %v1709_v5  ;;  %v1986_v46 = vpop.f32.mrb[25].mxu1 }
 0xe70   : > { %v1712_v47 = vpop.f32.mrb[26].mxu1 }
 0xe71   : > { %v1987_v49 = vpop.f32.mrb[27].mxu1  ;;  %v1715_v50 = vadd.f32 %v1710_v45, %v1562_v27 }
 0xe73   : > { %v1716_v30 = vsel %vm488_vm1, %v1715_v50, 0.0 }
 0xe74   : > { %1717 = vadd.xlane.f32.xlu0 %v1716_v30 }
 0xf01   : > { %v1718_v53 = vpop.xlane.xlu0 %1717 }
 0xf02   : > { %v1719_v36 = vmul.f32 0.03125, %v1718_v53 }
 0xf04   : > { %v1720_v54 = vsub.f32 %v1715_v50, %v1719_v36 }
 0xf06   : > { %v1721_v55 = vmul.f32 %v1720_v54, %v1720_v54 }
 0xf08   : > { %v1722_v38 = vsel %vm488_vm1, %v1721_v55, 0.0 }
 0xf09   : > { %1723 = vadd.xlane.f32.xlu1 %v1722_v38 }
 0xf96   : > { %v1724_v42 = vpop.xlane.xlu1 %1723 }
 0xf97   : > { %v1725_v44 = vmul.f32 0.03125, %v1724_v42 }
 0xf99   : > { %v1726_v48 = vadd.f32 1e-05, %v1725_v44 }
 0xf9b   : > { %2080 = vrsqrt.f32 %v1726_v48 }
 0xfa5   : > { %v2081_v56 = vpop.eup %2080 }
 0xfa6   : > { %v1728_v57 = vmul.f32 %v2081_v56, %v1720_v54 }
 0xfa8   : > { %1729 = vst.msk [vmem:[%s466_s29] sm:$0xff] %vm488_vm1, %v1728_v57 }
 0xfa9 PF: > { %s23_s25 = sadd.s32 1, %s2088_s25  }
 0xfaa   : > { %p20_p4 = scmp.ge.s32.totalorder %s23_s25, 4  }
 0xfac   :  { %22 = sbr.rel (!%p20_p4) target bundleno = 1 (0x1), region = 108 }

// kernel: sentence_encoder.4
= control target key start
LH: loop header
LB: loop body
LE: loop exit
PB: predicated region body
PF: predicated region fallthrough
CT: control target
= control target key end

     0   :  { %s2177_s25 = smov 0   ;;  %s2532_s0 = inlined_call_operand.vmem [shape: f32[2,8,32], index: 0, kind: input, shape index: {}]   ;;  %s2533_s1 = inlined_call_operand.vmem [shape: f32[2,8,1], index: 1, kind: input, shape index: {}]   ;;  %s2534_s2 = inlined_call_operand.vmem [shape: f32[2,1,8], index: 2, kind: input, shape index: {}]   ;;  %s2535_s3 = inlined_call_operand.vmem [shape: bf16[32,96], index: 3, kind: input, shape index: {}]   ;;  %s2536_s4 = inlined_call_operand.vmem [shape: bf16[32,32], index: 4, kind: input, shape index: {}]   ;;  %s2537_s5 = inlined_call_operand.vmem [shape: f32[1,32], index: 5, kind: input, shape index: {}]   ;;  %s2538_s6 = inlined_call_operand.vmem [shape: bf16[32,32], index: 6, kind: input, shape index: {}]   ;;  %s2539_s7 = inlined_call_operand.vmem [shape: bf16[32,32], index: 7, kind: input, shape index: {}]   ;;  %s2540_s8 = inlined_call_operand.vmem [shape: f32[1,32], index: 8, kind: input, shape index: {}]   ;;  %s2541_s9 = inlined_call_operand.vmem [shape: bf16[32,64], index: 9, kind: input, shape index: {}]   ;;  %s2542_s10 = inlined_call_operand.vmem [shape: f32[1,64], index: 10, kind: input, shape index: {}]   ;;  %s2543_s11 = inlined_call_operand.vmem [shape: bf16[64,32], index: 11, kind: input, shape index: {}]   ;;  %s2544_s12 = inlined_call_operand.vmem [shape: f32[1,32], index: 12, kind: input, shape index: {}]   ;;  %s2545_s13 = inlined_call_operand.vmem [shape: f32[2,8,32], index: 13, kind: output, shape index: {}]  }
   0x1 LB: > { %s1804_s26 = sadd.s32 4294967295, %s2088_s25   ;;  %p1808_p0 = scmp.ge.s32.totalorder %s2088_s25, 1  ;;  %s2088_s25 = sphi %s2177_s25, %s23_s25  }
   0x2   : > { %p403_p1 = scmp.lt.s32.totalorder %s2088_s25, 3 }
   0x4   : > { %p404_p2 = pnand %p1808_p0, %p403_p1 }
   0x5   : > { %v2014_v0 = vld [vmem:[%s2535_s3] sm:$0xff] (!%p404_p2)   ;;  %v2090_v1 = vmov (!%p404_p2), 0.0   ;;  %v2015_v2 = vld [vmem:[%s2535_s3 + $0x8] sm:$0xff] (!%p404_p2)   ;;  %vm2091_vm0 = vmmov (!%p404_p2), 0   ;;  %p452_p3 = scmp.lt.s32.totalorder (!%p404_p2), %s1804_s26, 1  ;;  %vm488_vm1 = vcmask (!%p404_p2), 261120  }
   0x6   : > { %407 = sbr.rel (%p404_p2) target bundleno = 4009 (0xfa9), region = 72  ;;  %1888 = vmatprep.subr.bf16.mxu0 (!%p404_p2), %v2090_v1  ;;  %1896 = vmatprep.subr.bf16.mxu1 (!%p404_p2), %v2090_v1  ;;  %s2092_s18 = smov (!%p404_p2), 120   ;;  %vm557_vm2 = vcmask (!%p404_p2), 64512   ;;  %vm692_vm6 = vcmask (!%p404_p2), 1043456   ;;  %vm1304_vm9 = vcmask (!%p404_p2), 130048   ;;  %vm1306_vm10 = vcmask (!%p404_p2), 195584  }
   0x7   : > { %1889 = vmatpush3.bf16.msra.mxu0 (!%p404_p2), %v2014_v0  ;;  %1892 = vmatprep.mubr.msk.bf16.mxu0 (!%p404_p2), %vm2091_vm0, %v2090_v1  ;;  %s2093_s19 = smov (!%p404_p2), 96   ;;  %s2094_s20 = smov (!%p404_p2), 80   ;;  %vm1671_vm11 = vcmask (!%p404_p2), 523264  }
   0x8   : > { %1890 = vmatprep.subr.bf16.mxu0 (!%p404_p2), %v2090_v1  ;;  %1898 = vmatprep.mubr.msk.bf16.mxu1 (!%p404_p2), %vm2091_vm0, %v2090_v1  ;;  %s2095_s21 = smov (!%p404_p2), 88   ;;  %s2096_s22 = smov (!%p404_p2), 72  }
   0x9   : > { %s2097_s23 = smov (!%p404_p2), 112   ;;  %s2098_s24 = smov (!%p404_p2), 104  }
   0xa   : > { %s2099_s27 = smov (!%p404_p2), 64   ;;  %s2101_s28 = smov (!%p404_p2), 56  }
   0xb   : > { %1891 = vmatpush3.bf16.msra.mxu0 (!%p404_p2), %v2015_v2  ;;  %s2102_s29 = smov (!%p404_p2), 48   ;;  %s2103_s30 = smov (!%p404_p2), 40  }
   0xc   : > { %1902 = vmatprep.subr.bf16.mxu0 (!%p404_p2), %v2090_v1 }
   0xd   : > { %s2547_s26 = smov (!%p452_p3, %s1804_s26), 1 }
   0xe   : > { %s2201_s14 = sshll.u32 %s2547_s26, 3 }
   0xf   : > { %s455_s17 = scalar_lea.vmem %s2532_s0, %s2201_s14 }
  0x10   : > { %v468_v3 = vld [vmem:[%s455_s17] sm:$0xff]  ;;  %s459_s17 = scalar_lea.vmem %s2533_s1, %s2201_s14 }
  0x11   : > { %v2208_v4 = vpack.c.bf16 %v468_v3, %v468_v3 }
  0x13   : > { %1893 = vmatmul.mubr.msk.bf16.vlgmr.msra.gmra.mrb[0].mxu0 %vm488_vm1, %v2208_v4 }
  0x14   : > { %1904 = vmatprep.mubr.msk.bf16.mxu0 %vm2091_vm0, %v2090_v1 }
  0xe6   : > { %v2214_v5 = vpop.f32.mrb[0].mxu0 }
  0xe7   : > { %736 = vrot.lane.b32.xlu1 %v2214_v5, %s2092_s18  ;;  %573 = vrot.lane.b32.xlu0 %v2214_v5, %s2093_s19  ;;  %v1894_v6 = vpop.f32.mrb[1].mxu0  ;;  %v558_v51 = vsel %vm557_vm2, %v2214_v5, 0.0 }
  0xe8   : > { %v529_v7 = vpop.f32.mrb[2].mxu0 }
  0xe9   : > { %v1895_v8 = vpop.f32.mrb[3].mxu0 }
  0xeb   : > { %941 = vrot.lane.b32.xlu1 %v2214_v5, %s2094_s20  ;;  %756 = vrot.lane.b32.xlu0 %v2214_v5, %s2095_s21 }
  0xef   : > { %1126 = vrot.lane.b32.xlu1 %v2214_v5, %s2096_s22  ;;  %921 = vrot.lane.b32.xlu0 %v2214_v5, %s2097_s23 }
  0xf3   : > { %1106 = vrot.lane.b32.xlu0 %v2214_v5, %s2098_s24 }
 0x159   : > { %v737_v9 = vpop.permute.xlu1 %736  ;;  %v574_v10 = vpop.permute.xlu0 %573 }
 0x15a   : > { %v576_v11 = vsel %vm557_vm2, %v574_v10, 0.0  ;;  %v739_v19 = vsel %vm557_vm2, %v737_v9, 0.0 }
 0x15b   : > { %577 = vadd.xlane.f32.xlu1 %v576_v11 }
 0x15d   : > { %v942_v12 = vpop.permute.xlu1 %941  ;;  %v757_v13 = vpop.permute.xlu0 %756 }
 0x15e   : > { %v944_v14 = vsel %vm557_vm2, %v942_v12, 0.0  ;;  %v759_v15 = vsel %vm557_vm2, %v757_v13, 0.0 }
 0x15f   : > { %945 = vadd.xlane.f32.xlu1 %v944_v14  ;;  %760 = vadd.xlane.f32.xlu0 %v759_v15 }
 0x161   : > { %v1127_v16 = vpop.permute.xlu1 %1126  ;;  %v922_v17 = vpop.permute.xlu0 %921 }
 0x162   : > { %v1129_v18 = vsel %vm557_vm2, %v1127_v16, 0.0  ;;  %v924_v20 = vsel %vm557_vm2, %v922_v17, 0.0 }
 0x163   : > { %1130 = vadd.xlane.f32.xlu1 %v1129_v18  ;;  %740 = vadd.xlane.f32.xlu0 %v739_v19 }
 0x165   : > { %v1107_v21 = vpop.permute.xlu0 %1106 }
 0x166   : > { %v1109_v22 = vsel %vm557_vm2, %v1107_v21, 0.0 }
 0x167   : > { %925 = vadd.xlane.f32.xlu0 %v924_v20 }
 0x16b   : > { %1110 = vadd.xlane.f32.xlu0 %v1109_v22 }
 0x1e8   : > { %v578_v23 = vpop.xlane.xlu1 %577 }
 0x1e9   : > { %v579_v24 = vmul.f32 0.125, %v578_v23 }
 0x1eb   : > { %v2238_v25 = vsub.f32 %v2214_v5, %v579_v24 }
 0x1ec   : > { %v946_v26 = vpop.xlane.xlu1 %945  ;;  %v761_v27 = vpop.xlane.xlu0 %760 }
 0x1ed   : > { %v762_v28 = vmul.f32 0.125, %v761_v27  ;;  %v581_v29 = vmul.f32 %v2238_v25, %v2238_v25  ;;  %v947_v32 = vmul.f32 0.125, %v946_v26 }
 0x1ef   : > { %v2243_v30 = vsub.f32 %v2214_v5, %v762_v28  ;;  %583 = vrot.lane.b32.xlu1 %v581_v29, %s2093_s19  ;;  %v2253_v38 = vsub.f32 %v2214_v5, %v947_v32 }
 0x1f0   : > { %v741_v31 = vpop.xlane.xlu0 %740  ;;  %v1131_v35 = vpop.xlane.xlu1 %1130 }
 0x1f1   : > { %v742_v33 = vmul.f32 0.125, %v741_v31  ;;  %v764_v34 = vmul.f32 %v2243_v30, %v2243_v30  ;;  %v1132_v39 = vmul.f32 0.125, %v1131_v35  ;;  %v949_v46 = vmul.f32 %v2253_v38, %v2253_v38 }
 0x1f3   : > { %v2249_v36 = vsub.f32 %v2214_v5, %v742_v33  ;;  %766 = vrot.lane.b32.xlu0 %v764_v34, %s2095_s21  ;;  %v2262_v44 = vsub.f32 %v2214_v5, %v1132_v39 }
 0x1f4   : > { %v926_v37 = vpop.xlane.xlu0 %925 }
 0x1f5   : > { %v927_v40 = vmul.f32 0.125, %v926_v37  ;;  %v744_v41 = vmul.f32 %v2249_v36, %v2249_v36  ;;  %v1134_v49 = vmul.f32 %v2262_v44, %v2262_v44 }
 0x1f7   : > { %v2258_v42 = vsub.f32 %v2214_v5, %v927_v40  ;;  %746 = vrot.lane.b32.xlu1 %v744_v41, %s2092_s18 }
 0x1f8   : > { %v1111_v43 = vpop.xlane.xlu0 %1110 }
 0x1f9   : > { %v1112_v45 = vmul.f32 0.125, %v1111_v43  ;;  %v929_v47 = vmul.f32 %v2258_v42, %v2258_v42 }
 0x1fb   : > { %v2269_v48 = vsub.f32 %v2214_v5, %v1112_v45  ;;  %951 = vrot.lane.b32.xlu1 %v949_v46, %s2094_s20  ;;  %931 = vrot.lane.b32.xlu0 %v929_v47, %s2097_s23 }
 0x1fd   : > { %v1114_v50 = vmul.f32 %v2269_v48, %v2269_v48 }
 0x1ff   : > { %1136 = vrot.lane.b32.xlu1 %v1134_v49, %s2096_s22  ;;  %1116 = vrot.lane.b32.xlu0 %v1114_v50, %s2098_s24 }
 0x223   : > { %559 = vadd.xlane.f32.xlu1 %v558_v51 }
 0x261   : > { %v584_v52 = vpop.permute.xlu1 %583 }
 0x262   : > { %v586_v53 = vsel %vm557_vm2, %v584_v52, 0.0 }
 0x263   : > { %587 = vadd.xlane.f32.xlu0 %v586_v53 }
 0x265   : > { %v767_v54 = vpop.permute.xlu0 %766 }
 0x266   : > { %v769_v55 = vsel %vm557_vm2, %v767_v54, 0.0 }
 0x267   : > { %770 = vadd.xlane.f32.xlu0 %v769_v55 }
 0x269   : > { %v747_v56 = vpop.permute.xlu1 %746 }
 0x26a   : > { %v749_v57 = vsel %vm557_vm2, %v747_v56, 0.0 }
 0x26b   : > { %750 = vadd.xlane.f32.xlu1 %v749_v57 }
 0x26d   : > { %v952_v58 = vpop.permute.xlu1 %951  ;;  %v932_v59 = vpop.permute.xlu0 %931 }
 0x26e   : > { %v954_v60 = vsel %vm557_vm2, %v952_v58, 0.0  ;;  %v934_v61 = vsel %vm557_vm2, %v932_v59, 0.0 }
 0x26f   : > { %955 = vadd.xlane.f32.xlu0 %v954_v60  ;;  %935 = vadd.xlane.f32.xlu1 %v934_v61 }
 0x271   : > { %v1137_v62 = vpop.permute.xlu1 %1136  ;;  %v1117_v63 = vpop.permute.xlu0 %1116 }
 0x272   : > { %v1139_v0 = vsel %vm557_vm2, %v1137_v62, 0.0  ;;  %v1119_v2 = vsel %vm557_vm2, %v1117_v63, 0.0 }
 0x273   : > { %1140 = vadd.xlane.f32.xlu0 %v1139_v0  ;;  %1120 = vadd.xlane.f32.xlu1 %v1119_v2 }
 0x2b0   : > { %v560_v3 = vpop.xlane.xlu1 %559 }
 0x2b1   : > { %v562_v6 = vmul.f32 0.125, %v560_v3 }
 0x2b3   : > { %v2289_v7 = vsub.f32 %v2214_v5, %v562_v6 }
 0x2b5   : > { %v564_v8 = vmul.f32 %v2289_v7, %v2289_v7 }
 0x2b7   : > { %v565_v9 = vsel %vm557_vm2, %v564_v8, 0.0 }
 0x2b8   : > { %566 = vadd.xlane.f32.xlu0 %v565_v9 }
 0x2f0   : > { %v588_v10 = vpop.xlane.xlu0 %587 }
 0x2f1   : > { %v589_v11 = vmul.f32 0.125, %v588_v10 }
 0x2f3   : > { %v590_v12 = vadd.f32 1e-05, %v589_v11 }
 0x2f4   : > { %v771_v13 = vpop.xlane.xlu0 %770 }
 0x2f5   : > { %2028 = vrsqrt.f32 %v590_v12  ;;  %v772_v14 = vmul.f32 0.125, %v771_v13 }
 0x2f7   : > { %v773_v15 = vadd.f32 1e-05, %v772_v14 }
 0x2f8   : > { %v751_v16 = vpop.xlane.xlu1 %750 }
 0x2f9   : > { %2030 = vrsqrt.f32 %v773_v15  ;;  %v752_v17 = vmul.f32 0.125, %v751_v16 }
 0x2fb   : > { %v753_v18 = vadd.f32 1e-05, %v752_v17  ;;  %v469_v17 = vld [vmem:[%s459_s17] sm:$0xff] }
 0x2fc   : > { %v956_v19 = vpop.xlane.xlu0 %955  ;;  %v936_v20 = vpop.xlane.xlu1 %935 }
 0x2fd   : > { %2032 = vrsqrt.f32 %v753_v18  ;;  %v957_v21 = vmul.f32 0.125, %v956_v19  ;;  %v937_v22 = vmul.f32 0.125, %v936_v20 }
 0x2ff   : > { %v2029_v23 = vpop.eup %2028  ;;  %v958_v24 = vadd.f32 1e-05, %v957_v21  ;;  %v938_v26 = vadd.f32 1e-05, %v937_v22 }
 0x300   : > { %v1141_v27 = vpop.xlane.xlu0 %1140  ;;  %v1121_v28 = vpop.xlane.xlu1 %1120  ;;  %v592_v29 = vmul.f32 %v2029_v23, %v2238_v25 }
 0x301   : > { %2034 = vrsqrt.f32 %v958_v24  ;;  %v1142_v31 = vmul.f32 0.125, %v1141_v27  ;;  %v1122_v32 = vmul.f32 0.125, %v1121_v28 }
 0x302   : > { %2036 = vrsqrt.f32 %v938_v26  ;;  %v614_v33 = vpack.c.bf16 %v592_v29, %v592_v29 }
 0x303   : > { %v2031_v34 = vpop.eup %2030  ;;  %v1143_v35 = vadd.f32 1e-05, %v1142_v31  ;;  %v1123_v37 = vadd.f32 1e-05, %v1122_v32 }
 0x304   : > { %616 = vrot.lane.b32.xlu1 %v614_v33, %s2093_s19  ;;  %v775_v39 = vmul.f32 %v2031_v34, %v2243_v30 }
 0x305   : > { %2038 = vrsqrt.f32 %v1143_v35 }
 0x306   : > { %2040 = vrsqrt.f32 %v1123_v37  ;;  %v797_v40 = vpack.c.bf16 %v775_v39, %v775_v39  ;;  %v532_v37 = vlaneseq }
 0x307   : > { %v2033_v41 = vpop.eup %2032 }
 0x308   : > { %802 = vrot.lane.b32.xlu0 %v797_v40, %s2095_s21  ;;  %v755_v25 = vmul.f32 %v2033_v41, %v2249_v36  ;;  %v533_v39 = vshrl.u32 %v532_v37, 7  ;;  %v535_v40 = vand.u32 127, %v532_v37 }
 0x30a   : > { %v796_v43 = vpack.c.bf16 %v755_v25, %v755_v25  ;;  %v552_v41 = vcvt.s32.f32 %v533_v39  ;;  %v553_v25 = vcvt.s32.f32 %v535_v40  ;;  %vm536_vm3 = vcmp.gt.s32.totalorder %v535_v40, %v533_v39 }
 0x30b   : > { %v2035_v45 = vpop.eup %2034 }
 0x30c   : > { %v2037_v46 = vpop.eup %2036  ;;  %799 = vrot.lane.b32.xlu1 %v796_v43, %s2092_s18  ;;  %v960_v47 = vmul.f32 %v2035_v45, %v2253_v38  ;;  %v2100_v38 = vmov 0   ;;  %v554_v43 = vsub.f32 %v552_v41, %v553_v25 }
 0x30d   : > { %v940_v49 = vmul.f32 %v2037_v46, %v2258_v42  ;;  %2013 = vset.pattern.permute.xlu0 %v2100_v38 }
 0x30e   : > { %v982_v50 = vpack.c.bf16 %v960_v47, %v960_v47  ;;  %v555_v46 = vand.u32 2147483647, %v554_v43 }
 0x30f   : > { %v2039_v51 = vpop.eup %2038  ;;  %v981_v30 = vpack.c.bf16 %v940_v49, %v940_v49 }
 0x310   : > { %v2041_v52 = vpop.eup %2040  ;;  %987 = vrot.lane.b32.xlu1 %v982_v50, %s2094_s20  ;;  %v1145_v53 = vmul.f32 %v2039_v51, %v2262_v44  ;;  %s462_s20 = scalar_lea.vmem %s2534_s2, %s2547_s26  ;;  %v556_v50 = vmul.f32 -1.5, %v555_v46  ;;  %s2104_s26 = smov 8  }
 0x311   : > { %984 = vrot.lane.b32.xlu0 %v981_v30, %s2097_s23  ;;  %v1125_v36 = vmul.f32 %v2041_v52, %v2269_v48  ;;  %v1816_v49 = vld [vmem:[%s462_s20] ss:$0 sm:$0xff] }
 0x312   : > { %v1167_v54 = vpack.c.bf16 %v1145_v53, %v1145_v53 }
 0x313   : > { %v1166_v55 = vpack.c.bf16 %v1125_v36, %v1125_v36 }
 0x314   : > { %1172 = vrot.lane.b32.xlu1 %v1167_v54, %s2096_s22 }
 0x315   : > { %1169 = vrot.lane.b32.xlu0 %v1166_v55, %s2098_s24 }
 0x318   : > { %593 = vrot.lane.b32.xlu1 %v2214_v5, %s2099_s27 }
 0x319   : > { %776 = vrot.lane.b32.xlu0 %v2214_v5, %s2101_s28 }
 0x31c   : > { %961 = vrot.lane.b32.xlu1 %v2214_v5, %s2102_s29 }
 0x31d   : > { %1146 = vrot.lane.b32.xlu0 %v2214_v5, %s2103_s30 }
 0x345   : > { %v567_v42 = vpop.xlane.xlu0 %566 }
 0x346   : > { %v568_v44 = vmul.f32 0.125, %v567_v42 }
 0x348   : > { %v569_v48 = vadd.f32 1e-05, %v568_v44 }
 0x34a   : > { %2042 = vrsqrt.f32 %v569_v48 }
 0x354   : > { %v2043_v56 = vpop.eup %2042 }
 0x355   : > { %v571_v59 = vmul.f32 %v2043_v56, %v2289_v7 }
 0x357   : > { %v613_v61 = vpack.c.bf16 %v571_v59, %v571_v59 }
 0x376   : > { %v617_v57 = vpop.permute.xlu1 %616 }
 0x377   : > { %v622_v58 = vsel %vm557_vm2, %v617_v57, 0 }
 0x378   : > { %1897 = vmatpush3.bf16.xpose.msra.mxu1 %v622_v58 }
 0x379   : > { %1908 = vmatprep.subr.bf16.mxu1 %v2090_v1 }
 0x37a   : > { %v803_v60 = vpop.permute.xlu0 %802 }
 0x37b   : > { %v808_v63 = vsel %vm557_vm2, %v803_v60, 0 }
 0x37e   : > { %v800_v62 = vpop.permute.xlu1 %799 }
 0x37f   : > { %1899 = vmatmul.mubr.msk.bf16.vlgmr.msra.gmra.mrb[0].mxu1 %vm557_vm2, %v613_v61 }
 0x380   : > { %1909 = vmatpush3.bf16.xpose.msra.mxu1 %v808_v63  ;;  %1910 = vmatprep.mubr.msk.bf16.mxu1 %vm2091_vm0, %v2090_v1 }
 0x381   : > { %1920 = vmatprep.subr.bf16.mxu1 %v2090_v1 }
 0x382   : > { %v988_v0 = vpop.permute.xlu1 %987 }
 0x383   : > { %v985_v2 = vpop.permute.xlu0 %984  ;;  %v993_v6 = vsel %vm557_vm2, %v988_v0, 0 }
 0x386   : > { %v1173_v3 = vpop.permute.xlu1 %1172 }
 0x387   : > { %v1170_v7 = vpop.permute.xlu0 %1169  ;;  %1911 = vmatmul.mubr.msk.bf16.vlgmr.msra.gmra.mrb[4].mxu1 %vm557_vm2, %v800_v62  ;;  %v1178_v13 = vsel %vm557_vm2, %v1173_v3, 0 }
 0x388   : > { %1921 = vmatpush3.bf16.xpose.msra.mxu1 %v993_v6  ;;  %1922 = vmatprep.mubr.msk.bf16.mxu1 %vm2091_vm0, %v2090_v1 }
 0x389   : > { %1932 = vmatprep.subr.bf16.mxu1 %v2090_v1 }
 0x38a   : > { %v594_v8 = vpop.permute.xlu1 %593 }
 0x38b   : > { %v777_v9 = vpop.permute.xlu0 %776  ;;  %v596_v10 = vsel %vm557_vm2, %v594_v8, 0.0 }
 0x38c   : > { %v779_v11 = vsel %vm557_vm2, %v777_v9, 0.0  ;;  %597 = vadd.xlane.f32.xlu1 %v596_v10 }
 0x38d   : > { %780 = vadd.xlane.f32.xlu0 %v779_v11 }
 0x38e   : > { %v962_v12 = vpop.permute.xlu1 %961 }
 0x38f   : > { %v1147_v14 = vpop.permute.xlu0 %1146  ;;  %1923 = vmatmul.mubr.msk.bf16.vlgmr.msra.gmra.mrb[8].mxu1 %vm557_vm2, %v985_v2  ;;  %v964_v15 = vsel %vm557_vm2, %v962_v12, 0.0 }
 0x390   : > { %1933 = vmatpush3.bf16.xpose.msra.mxu1 %v1178_v13  ;;  %v1149_v16 = vsel %vm557_vm2, %v1147_v14, 0.0  ;;  %1934 = vmatprep.mubr.msk.bf16.mxu1 %vm2091_vm0, %v2090_v1 }
 0x391   : > { %1150 = vadd.xlane.f32.xlu1 %v1149_v16  ;;  %965 = vadd.xlane.f32.xlu0 %v964_v15 }
 0x392   : > { %1944 = vmatprep.subr.bf16.mxu1 %v2090_v1 }
 0x397   : > { %1935 = vmatmul.mubr.msk.bf16.vlgmr.msra.gmra.mrb[12].mxu1 %vm557_vm2, %v1170_v7 }
 0x398   : > { %1948 = vmatprep.mubr.msk.bf16.mxu1 %vm2091_vm0, %v2090_v1 }
 0x3a7   : > { %541 = vperm.xlu0 %2013, %v469_v17  }
 0x419   : > { %v598_v18 = vpop.xlane.xlu1 %597 }
 0x41a   : > { %v781_v19 = vpop.xlane.xlu0 %780  ;;  %v599_v20 = vmul.f32 0.125, %v598_v18 }
 0x41b   : > { %v782_v21 = vmul.f32 0.125, %v781_v19 }
 0x41c   : > { %v2346_v22 = vsub.f32 %v2214_v5, %v599_v20 }
 0x41d   : > { %v2349_v23 = vsub.f32 %v2214_v5, %v782_v21 }
 0x41e   : > { %v966_v24 = vpop.xlane.xlu0 %965  ;;  %v601_v26 = vmul.f32 %v2346_v22, %v2346_v22  ;;  %v1151_v28 = vpop.xlane.xlu1 %1150 }
 0x41f   : > { %v967_v27 = vmul.f32 0.125, %v966_v24  ;;  %v1152_v31 = vmul.f32 0.125, %v1151_v28  ;;  %v784_v32 = vmul.f32 %v2349_v23, %v2349_v23 }
 0x420   : > { %603 = vrot.lane.b32.xlu1 %v601_v26, %s2099_s27 }
 0x421   : > { %v2355_v29 = vsub.f32 %v2214_v5, %v967_v27  ;;  %v2361_v33 = vsub.f32 %v2214_v5, %v1152_v31  ;;  %v1815_v5 = vsel %vm536_vm3, 1.0, %v2090_v1 }
 0x423   : > { %v969_v34 = vmul.f32 %v2355_v29, %v2355_v29  ;;  %v1154_v35 = vmul.f32 %v2361_v33, %v2361_v33 }
 0x424   : > { %786 = vrot.lane.b32.xlu1 %v784_v32, %s2101_s28 }
 0x426   : > { %v542_v45 = vpop.permute.xlu0 %541 }
 0x427   : > { %v544_v47 = vmul.f32 %v1815_v5, %v542_v45 }
 0x428   : > { %971 = vrot.lane.b32.xlu1 %v969_v34, %s2102_s29 }
 0x429   : > { %v2374_v52 = vmul.f32 %v1816_v49, %v544_v47 }
 0x42c   : > { %1156 = vrot.lane.b32.xlu1 %v1154_v35, %s2103_s30 }
 0x452   : > { %v658_v51 = vpop.f32.mrb[0].mxu1 }
 0x453   : > { %v664_v30 = vmul.f32 0.17677669, %v658_v51  ;;  %v1900_v53 = vpop.f32.mrb[1].mxu1 }
 0x454   : > { %v661_v36 = vpop.f32.mrb[2].mxu1 }
 0x455   : > { %v665_v54 = vadd.f32 %v664_v30, %v556_v50  ;;  %v1901_v55 = vpop.f32.mrb[3].mxu1 }
 0x457   : > { %v666_v38 = vmul.f32 %v665_v54, %v2374_v52 }
 0x459   : > { %v667_v42 = vsel %vm557_vm2, %v666_v38, -inf }
 0x45a   : > { %v844_v44 = vpop.f32.mrb[4].mxu1  ;;  %668 = vmax.xlane.f32.xlu1 %v667_v42 }
 0x45b   : > { %v850_v48 = vmul.f32 0.17677669, %v844_v44  ;;  %v1912_v56 = vpop.f32.mrb[5].mxu1 }
 0x45c   : > { %v847_v57 = vpop.f32.mrb[6].mxu1 }
 0x45d   : > { %v851_v58 = vadd.f32 %v850_v48, %v556_v50  ;;  %v1913_v59 = vpop.f32.mrb[7].mxu1 }
 0x45f   : > { %v852_v60 = vmul.f32 %v851_v58, %v2374_v52 }
 0x461   : > { %v853_v61 = vsel %vm557_vm2, %v852_v60, -inf }
 0x462   : > { %v1029_v62 = vpop.f32.mrb[8].mxu1  ;;  %854 = vmax.xlane.f32.xlu0 %v853_v61 }
 0x463   : > { %v1035_v63 = vmul.f32 0.17677669, %v1029_v62  ;;  %v1924_v0 = vpop.f32.mrb[9].mxu1 }
 0x464   : > { %v1032_v2 = vpop.f32.mrb[10].mxu1 }
 0x465   : > { %v1036_v3 = vadd.f32 %v1035_v63, %v556_v50  ;;  %v1925_v6 = vpop.f32.mrb[11].mxu1 }
 0x467   : > { %v2381_v7 = vmul.f32 %v1036_v3, %v2374_v52 }
 0x469   : > { %v1038_v8 = vsel %vm557_vm2, %v2381_v7, -inf }
 0x46a   : > { %v1214_v9 = vpop.f32.mrb[12].mxu1  ;;  %1039 = vmax.xlane.f32.xlu1 %v1038_v8 }
 0x46b   : > { %v1220_v10 = vmul.f32 0.17677669, %v1214_v9  ;;  %v1936_v11 = vpop.f32.mrb[13].mxu1 }
 0x46c   : > { %v1217_v12 = vpop.f32.mrb[14].mxu1 }
 0x46d   : > { %v1221_v13 = vadd.f32 %v1220_v10, %v556_v50  ;;  %v1937_v14 = vpop.f32.mrb[15].mxu1 }
 0x46f   : > { %v1222_v15 = vmul.f32 %v1221_v13, %v2374_v52 }
 0x471   : > { %v1223_v16 = vsel %vm557_vm2, %v1222_v15, -inf }
 0x472   : > { %1224 = vmax.xlane.f32.xlu1 %v1223_v16 }
 0x492   : > { %v604_v17 = vpop.permute.xlu1 %603 }
 0x493   : > { %v606_v18 = vsel %vm557_vm2, %v604_v17, 0.0 }
 0x494   : > { %607 = vadd.xlane.f32.xlu1 %v606_v18 }
 0x496   : > { %v787_v19 = vpop.permute.xlu1 %786 }
 0x497   : > { %v789_v20 = vsel %vm557_vm2, %v787_v19, 0.0 }
 0x498   : > { %790 = vadd.xlane.f32.xlu0 %v789_v20 }
 0x49a   : > { %v972_v21 = vpop.permute.xlu1 %971 }
 0x49b   : > { %v974_v24 = vsel %vm557_vm2, %v972_v21, 0.0 }
 0x49c   : > { %975 = vadd.xlane.f32.xlu1 %v974_v24 }
 0x49e   : > { %v1157_v26 = vpop.permute.xlu1 %1156 }
 0x49f   : > { %v1159_v27 = vsel %vm557_vm2, %v1157_v26, 0.0 }
 0x4a0   : > { %1160 = vadd.xlane.f32.xlu0 %v1159_v27 }
 0x4e7   : > { %v669_v28 = vpop.xlane.xlu1 %668 }
 0x4e8   : > { %v670_v31 = vsub.f32 %v666_v38, %v669_v28 }
 0x4ea   : > { %v671_v32 = vmul.f32 1.442695, %v670_v31 }
 0x4ec   : > { %2044 = vpow2.f32 %v671_v32 }
 0x4ef   : > { %v855_v34 = vpop.xlane.xlu0 %854 }
 0x4f0   : > { %v856_v35 = vsub.f32 %v852_v60, %v855_v34 }
 0x4f2   : > { %v857_v37 = vmul.f32 1.442695, %v856_v35 }
 0x4f4   : > { %2046 = vpow2.f32 %v857_v37 }
 0x4f6   : > { %v2045_v39 = vpop.eup %2044 }
 0x4f7   : > { %v2392_v40 = vmul.f32 %v2045_v39, %v2374_v52  ;;  %v1040_v25 = vpop.xlane.xlu1 %1039 }
 0x4f8   : > { %v1041_v60 = vsub.f32 %v2381_v7, %v1040_v25 }
 0x4f9   : > { %v674_v41 = vsel %vm557_vm2, %v2392_v40, 0.0 }
 0x4fa   : > { %675 = vadd.xlane.f32.xlu1 %v674_v41  ;;  %v1042_v61 = vmul.f32 1.442695, %v1041_v60  ;;  %v2017_v60 = vld [vmem:[%s2536_s4 + $0x8] sm:$0xff]  }
 0x4fe   : > { %v2047_v43 = vpop.eup %2046 }
 0x4ff   : > { %v1225_v5 = vpop.xlane.xlu1 %1224  ;;  %v2397_v45 = vmul.f32 %v2047_v43, %v2374_v52 }
 0x500   : > { %v1226_v46 = vsub.f32 %v1222_v15, %v1225_v5 }
 0x501   : > { %v860_v47 = vsel %vm557_vm2, %v2397_v45, 0.0 }
 0x502   : > { %v1227_v49 = vmul.f32 1.442695, %v1226_v46  ;;  %861 = vadd.xlane.f32.xlu0 %v860_v47 }
 0x504   : > { %2048 = vpow2.f32 %v1227_v49 }
 0x50e   : > { %v2049_v50 = vpop.eup %2048 }
 0x50f   : > { %v2402_v51 = vmul.f32 %v2049_v50, %v2374_v52 }
 0x511   : > { %v1230_v30 = vsel %vm557_vm2, %v2402_v51, 0.0 }
 0x512   : > { %1231 = vadd.xlane.f32.xlu0 %v1230_v30 }
 0x521   : > { %v608_v53 = vpop.xlane.xlu1 %607 }
 0x522   : > { %v609_v36 = vmul.f32 0.125, %v608_v53 }
 0x524   : > { %v610_v54 = vadd.f32 1e-05, %v609_v36 }
 0x525   : > { %v791_v55 = vpop.xlane.xlu0 %790 }
 0x526   : > { %2050 = vrsqrt.f32 %v610_v54  ;;  %v792_v38 = vmul.f32 0.125, %v791_v55 }
 0x528   : > { %v793_v42 = vadd.f32 1e-05, %v792_v38 }
 0x529   : > { %v976_v62 = vpop.xlane.xlu1 %975 }
 0x52a   : > { %2052 = vrsqrt.f32 %v793_v42  ;;  %v977_v63 = vmul.f32 0.125, %v976_v62 }
 0x52b   : > { %2054 = vpow2.f32 %v1042_v61 }
 0x52c   : > { %v978_v3 = vadd.f32 1e-05, %v977_v63 }
 0x52d   : > { %v1161_v0 = vpop.xlane.xlu0 %1160 }
 0x52e   : > { %v1162_v6 = vmul.f32 0.125, %v1161_v0  ;;  %2056 = vrsqrt.f32 %v978_v3 }
 0x530   : > { %v2051_v44 = vpop.eup %2050  ;;  %v1163_v8 = vadd.f32 1e-05, %v1162_v6 }
 0x531   : > { %v612_v48 = vmul.f32 %v2051_v44, %v2346_v22 }
 0x532   : > { %2058 = vrsqrt.f32 %v1163_v8 }
 0x533   : > { %v685_v56 = vpack.c.bf16 %v612_v48, %v612_v48 }
 0x534   : > { %v2053_v57 = vpop.eup %2052 }
 0x535   : > { %687 = vrot.lane.b32.xlu1 %v685_v56, %s2099_s27  ;;  %v795_v58 = vmul.f32 %v2053_v57, %v2349_v23  ;;  %v2055_v2 = vpop.eup %2054  ;;  %s2105_s27 = smov 16  }
 0x536   : > { %v1044_v22 = vmul.f32 %v2055_v2, %v2374_v52 }
 0x537   : > { %v871_v59 = vpack.c.bf16 %v795_v58, %v795_v58 }
 0x538   : > { %v1045_v9 = vsel %vm557_vm2, %v1044_v22, 0.0  ;;  %v2057_v23 = vpop.eup %2056 }
 0x539   : > { %873 = vrot.lane.b32.xlu0 %v871_v59, %s2101_s28  ;;  %v980_v10 = vmul.f32 %v2057_v23, %v2355_v29  ;;  %s2106_s28 = smov 24  }
 0x53b   : > { %v1056_v11 = vpack.c.bf16 %v980_v10, %v980_v10 }
 0x53c   : > { %v2059_v7 = vpop.eup %2058 }
 0x53d   : > { %v1165_v12 = vmul.f32 %v2059_v7, %v2361_v33 }
 0x53f   : > { %v1241_v13 = vpack.c.bf16 %v1165_v12, %v1165_v12 }
 0x559   : > { %1046 = vadd.xlane.f32.xlu1 %v1045_v9 }
 0x56a   : > { %1058 = vrot.lane.b32.xlu1 %v1056_v11, %s2102_s29  ;;  %s466_s29 = scalar_lea.vmem %s2545_s13, %s2201_s14 }
 0x56e   : > { %1243 = vrot.lane.b32.xlu1 %v1241_v13, %s2103_s30  ;;  %v2018_v13 = vld [vmem:[%s2538_s6] sm:$0xff]  }
 0x587   : > { %v676_v14 = vpop.xlane.xlu1 %675 }
 0x588   : > { %vm677_vm4 = vcmp.eq.f32.partialorder %v676_v14, 0.0 }
 0x589   : > { %v1818_v52 = vsel %vm677_vm4, 1.0, %v2090_v1 }
 0x58a   : > { %v680_v16 = vadd.f32 %v1818_v52, %v676_v14  ;;  %v2019_v14 = vld [vmem:[%s2538_s6 + $0x8] sm:$0xff]   ;;  %v1829_v52 = vld [vmem:[%s2537_s5] ss:$0 sm:$0xff] }
 0x58c   : > { %v681_v17 = vadd.f32 1e-20, %v680_v16 }
 0x58e   : > { %2060 = vrcp.f32 %v681_v17 }
 0x58f   : > { %v862_v15 = vpop.xlane.xlu0 %861 }
 0x590   : > { %vm863_vm5 = vcmp.eq.f32.partialorder %v862_v15, 0.0 }
 0x591   : > { %v1821_v18 = vsel %vm863_vm5, 1.0, %v2090_v1 }
 0x592   : > { %v866_v29 = vadd.f32 %v1821_v18, %v862_v15 }
 0x594   : > { %v867_v19 = vadd.f32 1e-20, %v866_v29 }
 0x596   : > { %2062 = vrcp.f32 %v867_v19 }
 0x598   : > { %v2061_v33 = vpop.eup %2060 }
 0x599   : > { %v683_v20 = vmul.f32 %v2061_v33, %v2392_v40 }
 0x59b   : > { %v684_v27 = vpack.c.bf16 %v683_v20, %v683_v20 }
 0x59f   : > { %v1232_v21 = vpop.xlane.xlu0 %1231 }
 0x5a0   : > { %v2063_v28 = vpop.eup %2062  ;;  %vm1233_vm7 = vcmp.eq.f32.partialorder %v1232_v21, 0.0 }
 0x5a1   : > { %v869_v34 = vmul.f32 %v2063_v28, %v2397_v45  ;;  %v1827_v37 = vsel %vm1233_vm7, 1.0, %v2090_v1 }
 0x5a2   : > { %v1236_v41 = vadd.f32 %v1827_v37, %v1232_v21 }
 0x5a3   : > { %v870_v35 = vpack.c.bf16 %v869_v34, %v869_v34  ;;  %v2020_v34 = vld [vmem:[%s2539_s7] sm:$0xff]  }
 0x5a4   : > { %v1237_v46 = vadd.f32 1e-20, %v1236_v41 }
 0x5a7   : > { %v688_v24 = vpop.permute.xlu1 %687 }
 0x5a8   : > { %v694_v26 = vsel %vm692_vm6, %v688_v24, 0 }
 0x5a9   : > { %1903 = vmatpush3.bf16.msra.mxu0 %v694_v26 }
 0x5aa   : > { %1914 = vmatprep.subr.bf16.mxu0 %v2090_v1 }
 0x5ab   : > { %v874_v31 = vpop.permute.xlu0 %873 }
 0x5ac   : > { %v879_v32 = vsel %vm692_vm6, %v874_v31, 0  ;;  %1905 = vmatmul.mubr.msk.bf16.vlgmr.msra.gmra.mrb[4].mxu0 %vm557_vm2, %v684_v27 }
 0x5ad   : > { %1915 = vmatpush3.bf16.msra.mxu0 %v879_v32  ;;  %1916 = vmatprep.mubr.msk.bf16.mxu0 %vm2091_vm0, %v2090_v1 }
 0x5ae   : > { %1926 = vmatprep.subr.bf16.mxu0 %v2090_v1 }
 0x5b4   : > { %1917 = vmatmul.mubr.msk.bf16.vlgmr.msra.gmra.mrb[8].mxu0 %vm557_vm2, %v870_v35  ;;  %v2021_v35 = vld [vmem:[%s2539_s7 + $0x8] sm:$0xff]  }
 0x5b5   : > { %1928 = vmatprep.mubr.msk.bf16.mxu0 %vm2091_vm0, %v2090_v1 }
 0x5e6   : > { %v1047_v39 = vpop.xlane.xlu1 %1046 }
 0x5e7   : > { %vm1048_vm8 = vcmp.eq.f32.partialorder %v1047_v39, 0.0 }
 0x5e8   : > { %v1824_v40 = vsel %vm1048_vm8, 1.0, %v2090_v1 }
 0x5e9   : > { %v1051_v25 = vadd.f32 %v1824_v40, %v1047_v39 }
 0x5ea   : > { %v1059_v43 = vpop.permute.xlu1 %1058 }
 0x5eb   : > { %v1052_v5 = vadd.f32 1e-20, %v1051_v25  ;;  %v1064_v45 = vsel %vm692_vm6, %v1059_v43, 0 }
 0x5ec   : > { %1927 = vmatpush3.bf16.msra.mxu0 %v1064_v45 }
 0x5ed   : > { %2064 = vrcp.f32 %v1052_v5  ;;  %1938 = vmatprep.subr.bf16.mxu0 %v2090_v1 }
 0x5ee   : > { %2066 = vrcp.f32 %v1237_v46  ;;  %v1244_v50 = vpop.permute.xlu1 %1243 }
 0x5ef   : > { %v1249_v36 = vsel %vm692_vm6, %v1244_v50, 0 }
 0x5f7   : > { %v2065_v47 = vpop.eup %2064 }
 0x5f8   : > { %v1054_v49 = vmul.f32 %v2065_v47, %v1044_v22  ;;  %v2067_v53 = vpop.eup %2066 }
 0x5f9   : > { %v1239_v54 = vmul.f32 %v2067_v53, %v2402_v51  ;;  %v2016_v51 = vld [vmem:[%s2536_s4] sm:$0xff]  }
 0x5fa   : > { %v1055_v30 = vpack.c.bf16 %v1054_v49, %v1054_v49  ;;  %1945 = vmatpush3.bf16.msra.mxu1 %v2016_v51 }
 0x5fb   : > { %v1240_v55 = vpack.c.bf16 %v1239_v54, %v1239_v54  ;;  %1946 = vmatprep.subr.bf16.mxu1 %v2090_v1 }
 0x5fc   : > { %1929 = vmatmul.mubr.msk.bf16.vlgmr.msra.gmra.mrb[12].mxu0 %vm557_vm2, %v1055_v30 }
 0x5fd   : > { %1939 = vmatpush3.bf16.msra.mxu0 %v1249_v36  ;;  %1940 = vmatprep.mubr.msk.bf16.mxu0 %vm2091_vm0, %v2090_v1 }
 0x5fe   : > { %1952 = vmatprep.subr.bf16.mxu0 %v2090_v1  ;;  %1947 = vmatpush3.bf16.msra.mxu1 %v2017_v60 }
 0x5ff   : > { %1960 = vmatprep.subr.bf16.mxu1 %v2090_v1 }
 0x604   : > { %1941 = vmatmul.mubr.msk.bf16.vlgmr.msra.gmra.mrb[16].mxu0 %vm557_vm2, %v1240_v55 }
 0x605   : > { %1956 = vmatprep.mubr.msk.bf16.mxu0 %vm2091_vm0, %v2090_v1  ;;  %1953 = vmatpush3.bf16.msra.mxu0 %v2018_v13 }
 0x606   : > { %1954 = vmatprep.subr.bf16.mxu0 %v2090_v1 }
 0x609   : > { %1955 = vmatpush3.bf16.msra.mxu0 %v2019_v14 }
 0x60a   : > { %1968 = vmatprep.subr.bf16.mxu0 %v2090_v1 }
 0x60c   : > { %1957 = vmatmul.mubr.msk.bf16.vlgmr.msra.gmra.mrb[20].mxu0 %vm488_vm1, %v2208_v4 }
 0x60d   : > { %1972 = vmatprep.mubr.msk.bf16.mxu0 %vm2091_vm0, %v2090_v1 }
 0x67f   : > { %v730_v38 = vpop.f32.mrb[4].mxu0 }
 0x680   : > { %v1906_v42 = vpop.f32.mrb[5].mxu0 }
 0x681   : > { %v733_v44 = vpop.f32.mrb[6].mxu0 }
 0x682   : > { %v1907_v48 = vpop.f32.mrb[7].mxu0 }
 0x687   : > { %v915_v56 = vpop.f32.mrb[8].mxu0 }
 0x688   : > { %1292 = vrot.lane.b32.xlu0 %v915_v56, %s2104_s26  ;;  %v1918_v57 = vpop.f32.mrb[9].mxu0 }
 0x689   : > { %v918_v58 = vpop.f32.mrb[10].mxu0 }
 0x68a   : > { %v1919_v59 = vpop.f32.mrb[11].mxu0 }
 0x6cf   : > { %v1100_v61 = vpop.f32.mrb[12].mxu0 }
 0x6d0   : > { %1296 = vrot.lane.b32.xlu1 %v1100_v61, %s2105_s27  ;;  %v1930_v62 = vpop.f32.mrb[13].mxu0 }
 0x6d1   : > { %v1103_v63 = vpop.f32.mrb[14].mxu0 }
 0x6d2   : > { %v1931_v0 = vpop.f32.mrb[15].mxu0 }
 0x6d7   : > { %v1285_v2 = vpop.f32.mrb[16].mxu0 }
 0x6d8   : > { %1300 = vrot.lane.b32.xlu0 %v1285_v2, %s2106_s28  ;;  %v1942_v3 = vpop.f32.mrb[17].mxu0  ;;  %v1839_v2 = vld [vmem:[%s2540_s8] ss:$0 sm:$0xff] }
 0x6d9   : > { %v1288_v6 = vpop.f32.mrb[18].mxu0 }
 0x6da   : > { %v1943_v22 = vpop.f32.mrb[19].mxu0 }
 0x6df   : > { %v1439_v33 = vpop.f32.mrb[20].mxu0 }
 0x6e0   : > { %v1958_v20 = vpop.f32.mrb[21].mxu0  ;;  %v1445_v32 = vsel %vm488_vm1, %v1439_v33, 0.0 }
 0x6e1   : > { %v1442_v21 = vpop.f32.mrb[22].mxu0  ;;  %v2025_v20 = vld [vmem:[%s2543_s11 + $0x8] sm:$0xff]  }
 0x6e2   : > { %v1959_v24 = vpop.f32.mrb[23].mxu0 }
 0x6fa   : > { %v1293_v8 = vpop.permute.xlu0 %1292 }
 0x6fb   : > { %v1303_v23 = vsel %vm557_vm2, %v730_v38, %v1293_v8 }
 0x742   : > { %v1297_v9 = vpop.permute.xlu1 %1296 }
 0x743   : > { %v1305_v10 = vsel %vm1304_vm9, %v1303_v23, %v1297_v9 }
 0x74a   : > { %v1301_v7 = vpop.permute.xlu0 %1300 }
 0x74b   : > { %v1307_v11 = vsel %vm1306_vm10, %v1305_v10, %v1301_v7 }
 0x74c   : > { %v1312_v12 = vpack.c.bf16 %v1307_v11, %v1307_v11 }
 0x74e   : > { %1949 = vmatmul.mubr.msk.bf16.vlgmr.msra.gmra.mrb[16].mxu1 %vm488_vm1, %v1312_v12 }
 0x74f   : > { %1964 = vmatprep.mubr.msk.bf16.mxu1 %vm2091_vm0, %v2090_v1  ;;  %1961 = vmatpush3.bf16.msra.mxu1 %v2020_v34  ;;  %v1840_v34 = vld [vmem:[%s2542_s10] ss:$0 sm:$0xff] }
 0x750   : > { %1962 = vmatprep.subr.bf16.mxu1 %v2090_v1 }
 0x753   : > { %1963 = vmatpush3.bf16.msra.mxu1 %v2021_v35 }
 0x754   : > { %1976 = vmatprep.subr.bf16.mxu1 %v2090_v1 }
 0x821   : > { %v1369_v15 = vpop.f32.mrb[16].mxu1 }
 0x822   : > { %v1370_v16 = vadd.f32 %v1829_v52, %v1369_v15  ;;  %v1950_v17 = vpop.f32.mrb[17].mxu1 }
 0x823   : > { %v1372_v18 = vpop.f32.mrb[18].mxu1 }
 0x824   : > { %v1951_v29 = vpop.f32.mrb[19].mxu1  ;;  %v1375_v19 = vsel %vm488_vm1, %v1370_v16, 0.0 }
 0x825   : > { %1376 = vadd.xlane.f32.xlu1 %v1375_v19  ;;  %v2022_v29 = vld [vmem:[%s2541_s9] sm:$0xff]   ;;  %v2023_v19 = vld [vmem:[%s2541_s9 + $0x8] sm:$0xff]  }
 0x826   : > { %1969 = vmatpush3.bf16.msra.mxu0 %v2022_v29 }
 0x827   : > { %1970 = vmatprep.subr.bf16.mxu0 %v2090_v1 }
 0x82a   : > { %1971 = vmatpush3.bf16.msra.mxu0 %v2023_v19 }
 0x8b2   : > { %v1377_v4 = vpop.xlane.xlu1 %1376 }
 0x8b3   : > { %v1379_v26 = vmul.f32 0.03125, %v1377_v4 }
 0x8b5   : > { %v1380_v27 = vsub.f32 %v1370_v16, %v1379_v26 }
 0x8b7   : > { %v1381_v28 = vmul.f32 %v1380_v27, %v1380_v27 }
 0x8b9   : > { %v1382_v31 = vsel %vm488_vm1, %v1381_v28, 0.0 }
 0x8ba   : > { %1383 = vadd.xlane.f32.xlu0 %v1382_v31  ;;  %v2026_v31 = vld [vmem:[%s2543_s11 + $0x10] sm:$0xff]  }
 0x8be   : > { %1446 = vadd.xlane.f32.xlu0 %v1445_v32  ;;  %v2027_v32 = vld [vmem:[%s2543_s11 + $0x18] sm:$0xff]  }
 0x947   : > { %v1384_v37 = vpop.xlane.xlu0 %1383 }
 0x948   : > { %v1385_v39 = vmul.f32 0.03125, %v1384_v37 }
 0x94a   : > { %v1386_v40 = vadd.f32 1e-05, %v1385_v39 }
 0x94b   : > { %v1447_v41 = vpop.xlane.xlu0 %1446 }
 0x94c   : > { %2068 = vrsqrt.f32 %v1386_v40  ;;  %v1448_v25 = vmul.f32 0.03125, %v1447_v41 }
 0x94e   : > { %v1449_v43 = vsub.f32 %v1439_v33, %v1448_v25  ;;  %v2024_v33 = vld [vmem:[%s2543_s11] sm:$0xff]  }
 0x950   : > { %v1450_v5 = vmul.f32 %v1449_v43, %v1449_v43 }
 0x952   : > { %v1451_v45 = vsel %vm488_vm1, %v1450_v5, 0.0 }
 0x953   : > { %1452 = vadd.xlane.f32.xlu0 %v1451_v45 }
 0x956   : > { %v2069_v46 = vpop.eup %2068 }
 0x957   : > { %v1388_v47 = vmul.f32 %v2069_v46, %v1380_v27 }
 0x959   : > { %v1462_v49 = vpack.c.bf16 %v1388_v47, %v1388_v47 }
 0x95b   : > { %1965 = vmatmul.mubr.msk.bf16.vlgmr.msra.gmra.mrb[20].mxu1 %vm488_vm1, %v1462_v49 }
 0x95c   : > { %1984 = vmatprep.mubr.msk.bf16.mxu1 %vm2091_vm0, %v2090_v1  ;;  %1977 = vmatpush3.bf16.msra.mxu1 %v2024_v33 }
 0x95d   : > { %1978 = vmatprep.subr.bf16.mxu1 %v2090_v1 }
 0x960   : > { %1979 = vmatpush3.bf16.msra.mxu1 %v2025_v20 }
 0x961   : > { %1980 = vmatprep.subr.bf16.mxu1 %v2090_v1 }
 0x964   : > { %1981 = vmatpush3.bf16.msra.mxu1 %v2026_v31 }
 0x965   : > { %1982 = vmatprep.subr.bf16.mxu1 %v2090_v1  ;;  %v1844_v1 = vld [vmem:[%s2544_s12] ss:$0 sm:$0xff] }
 0x968   : > { %1983 = vmatpush3.bf16.msra.mxu1 %v2027_v32 }
 0x9e0   : > { %v1453_v56 = vpop.xlane.xlu0 %1452 }
 0x9e1   : > { %v1454_v57 = vmul.f32 0.03125, %v1453_v56 }
 0x9e3   : > { %v1455_v58 = vadd.f32 1e-05, %v1454_v57 }
 0x9e5   : > { %2070 = vrsqrt.f32 %v1455_v58 }
 0x9ef   : > { %v2071_v61 = vpop.eup %2070 }
 0x9f0   : > { %v1457_v63 = vmul.f32 %v2071_v61, %v1449_v43 }
 0xa2e   : > { %v1512_v50 = vpop.f32.mrb[20].mxu1 }
 0xa2f   : > { %v1966_v30 = vpop.f32.mrb[21].mxu1  ;;  %v1518_v53 = vsel %vm488_vm1, %v1512_v50, 0.0 }
 0xa30   : > { %1519 = vadd.xlane.f32.xlu1 %v1518_v53  ;;  %v1515_v36 = vpop.f32.mrb[22].mxu1 }
 0xa31   : > { %v1967_v54 = vpop.f32.mrb[23].mxu1 }
 0xabd   : > { %v1520_v55 = vpop.xlane.xlu1 %1519 }
 0xabe   : > { %v1521_v38 = vmul.f32 0.03125, %v1520_v55 }
 0xac0   : > { %v1522_v42 = vsub.f32 %v1512_v50, %v1521_v38 }
 0xac2   : > { %v1523_v44 = vmul.f32 %v1522_v42, %v1522_v42 }
 0xac4   : > { %v1524_v48 = vsel %vm488_vm1, %v1523_v44, 0.0 }
 0xac5   : > { %1525 = vadd.xlane.f32.xlu1 %v1524_v48 }
 0xb52   : > { %v1526_v59 = vpop.xlane.xlu1 %1525 }
 0xb53   : > { %v1527_v51 = vmul.f32 0.03125, %v1526_v59 }
 0xb55   : > { %v1528_v60 = vadd.f32 1e-05, %v1527_v51 }
 0xb57   : > { %2072 = vrsqrt.f32 %v1528_v60 }
 0xb61   : > { %v2073_v62 = vpop.eup %2072 }
 0xb62   : > { %v1530_v0 = vmul.f32 %v2073_v62, %v1522_v42 }
 0xb64   : > { %v1531_v3 = vadd.f32 %v1530_v0, %v1457_v63 }
 0xb66   : > { %v1539_v6 = vadd.f32 %v1839_v2, %v1531_v3 }
 0xb68   : > { %v1540_v22 = vsub.f32 0.0, %v1539_v6 }
 0xb6a   : > { %v1541_v8 = vmul.f32 1.442695, %v1540_v22 }
 0xb6c   : > { %2074 = vpow2.f32 %v1541_v8 }
 0xb76   : > { %v2075_v9 = vpop.eup %2074 }
 0xb77   : > { %v1543_v23 = vadd.f32 1.0, %v2075_v9 }
 0xb79   : > { %2076 = vrcp.f32 %v1543_v23 }
 0xb83   : > { %v2077_v10 = vpop.eup %2076 }
 0xb84   : > { %v1547_v7 = vsub.f32 1.0, %v2077_v10  ;;  %v1546_v11 = vmul.f32 %v2077_v10, %v1457_v63 }
 0xb86   : > { %v1548_v12 = vmul.f32 %v1547_v7, %v1530_v0 }
 0xb88   : > { %v1549_v13 = vadd.f32 %v1548_v12, %v1546_v11 }
 0xb8a   : > { %v1550_v14 = vsel %vm488_vm1, %v1549_v13, 0.0 }
 0xb8b   : > { %1551 = vadd.xlane.f32.xlu0 %v1550_v14 }
 0xc18   : > { %v1552_v52 = vpop.xlane.xlu0 %1551 }
 0xc19   : > { %v1553_v15 = vmul.f32 0.03125, %v1552_v52 }
 0xc1b   : > { %v1554_v16 = vsub.f32 %v1549_v13, %v1553_v15 }
 0xc1d   : > { %v1555_v17 = vmul.f32 %v1554_v16, %v1554_v16 }
 0xc1f   : > { %v1556_v18 = vsel %vm488_vm1, %v1555_v17, 0.0 }
 0xc20   : > { %1557 = vadd.xlane.f32.xlu1 %v1556_v18 }
 0xcad   : > { %v1558_v21 = vpop.xlane.xlu1 %1557 }
 0xcae   : > { %v1559_v24 = vmul.f32 0.03125, %v1558_v21 }
 0xcb0   : > { %v1560_v4 = vadd.f32 1e-05, %v1559_v24 }
 0xcb2   : > { %2078 = vrsqrt.f32 %v1560_v4 }
 0xcbc   : > { %v2079_v26 = vpop.eup %2078 }
 0xcbd   : > { %v1562_v27 = vmul.f32 %v2079_v26, %v1554_v16 }
 0xcbf   : > { %v1567_v28 = vpack.c.bf16 %v1562_v27, %v1562_v27 }
 0xcc1   : > { %1973 = vmatmul.mubr.msk.bf16.vlgmr.msra.gmra.mrb[24].mxu0 %vm488_vm1, %v1567_v28 }
 0xd94   : > { %v1624_v35 = vpop.f32.mrb[24].mxu0 }
 0xd95   : > { %v1625_v37 = vadd.f32 %v1840_v34, %v1624_v35  ;;  %v1974_v39 = vpop.f32.mrb[25].mxu0 }
 0xd96   : > { %v1627_v40 = vpop.f32.mrb[26].mxu0 }
 0xd97   : > { %v1630_v41 = vmax.f32 %v1625_v37, 0.0  ;;  %v1975_v25 = vpop.f32.mrb[27].mxu0 }
 0xd99   : > { %v1639_v43 = vpack.c.bf16 %v1630_v41, %v1630_v41 }
 0xd9b   : > { %1985 = vmatmul.mubr.msk.bf16.vlgmr.msra.gmra.mrb[24].mxu1 %vm1671_vm11, %v1639_v43 }
 0xe6e   : > { %v1709_v5 = vpop.f32.mrb[24].mxu1 }
 0xe6f   : > { %v1710_v45 = vadd.f32 %v1844_v1, %v1709_v5  ;;  %v1986_v46 = vpop.f32.mrb[25].mxu1 }
 0xe70   : > { %v1712_v47 = vpop.f32.mrb[26].mxu1 }
 0xe71   : > { %v1987_v49 = vpop.f32.mrb[27].mxu1  ;;  %v1715_v50 = vadd.f32 %v1710_v45, %v1562_v27 }
 0xe73   : > { %v1716_v30 = vsel %vm488_vm1, %v1715_v50, 0.0 }
 0xe74   : > { %1717 = vadd.xlane.f32.xlu0 %v1716_v30 }
 0xf01   : > { %v1718_v53 = vpop.xlane.xlu0 %1717 }
 0xf02   : > { %v1719_v36 = vmul.f32 0.03125, %v1718_v53 }
 0xf04   : > { %v1720_v54 = vsub.f32 %v1715_v50, %v1719_v36 }
 0xf06   : > { %v1721_v55 = vmul.f32 %v1720_v54, %v1720_v54 }
 0xf08   : > { %v1722_v38 = vsel %vm488_vm1, %v1721_v55, 0.0 }
 0xf09   : > { %1723 = vadd.xlane.f32.xlu1 %v1722_v38 }
 0xf96   : > { %v1724_v42 = vpop.xlane.xlu1 %1723 }
 0xf97   : > { %v1725_v44 = vmul.f32 0.03125, %v1724_v42 }
 0xf99   : > { %v1726_v48 = vadd.f32 1e-05, %v1725_v44 }
 0xf9b   : > { %2080 = vrsqrt.f32 %v1726_v48 }
 0xfa5   : > { %v2081_v56 = vpop.eup %2080 }
 0xfa6   : > { %v1728_v57 = vmul.f32 %v2081_v56, %v1720_v54 }
 0xfa8   : > { %1729 = vst.msk [vmem:[%s466_s29] sm:$0xff] %vm488_vm1, %v1728_v57 }
 0xfa9 PF: > { %s23_s25 = sadd.s32 1, %s2088_s25  }
 0xfaa   : > { %p20_p4 = scmp.ge.s32.totalorder %s23_s25, 4  }
 0xfac   :  { %22 = sbr.rel (!%p20_p4) target bundleno = 1 (0x1), region = 108 }

</bundles_post_ra>
